<compile_context>
chip_gen: v5e
topology: v5e:2x2
jax: 0.10.0
libtpu: 0.0.40
codegen_flags: <defaults>
</compile_context>

<pallas_src>
import functools

import jax
import jax.numpy as jnp
import numpy as np
from jax.experimental import pallas as pl
from jax.experimental.pallas import tpu as pltpu

K = 5                     # conv kernel size
W_ROW = 32                # input spatial width (32x32 CIFAR images)
N_LANES = W_ROW * W_ROW   # 1024 flattened spatial lanes (multiple of 128)
CP = 8                    # channel sublane padding
PATCH_ROWS = K * K * CP   # 200 rows of the im2col patch matrix
NP = 128                  # lane padding for all FC dims


# ------------------------------ fused kernel --------------------------------

def _convnn_fused_kernel(x_ref, w1_ref, b1_ref, w2_ref, b2_ref, sel_ref,
                         fw1_ref, fb1_ref, fw2_ref, fb2_ref, fw3_ref, fb3_ref,
                         o_ref, patch1_ref, patch2_ref):
    """Full ConvNN forward for one image.

    Layout: images live as (8 channel sublanes, 1024 spatial lanes) with flat
    index p = h*32 + w.  Valid conv/pool outputs never read wrapped lanes
    (max flat index 891 + 132 < 1024), so circular rolls are safe; garbage
    lanes only ever feed other garbage lanes and are dropped at the flatten.
    """
    f32 = jnp.float32
    n = x_ref.shape[-1]                                   # 1024

    def shift_left(v, s):
        # result[:, p] = v[:, p + s]   (circular lane roll; axis must be >= 0)
        return v if s == 0 else pltpu.roll(v, shift=n - s, axis=1)

    # ---- conv1: in-kernel im2col (25 static lane rolls) + ONE MXU matmul ----
    x = x_ref[...]                                        # (8, 1024)
    for t in range(K * K):
        kh, kw = t // K, t % K
        patch1_ref[pl.ds(t * CP, CP), :] = shift_left(x, kh * W_ROW + kw)
    acc1 = jnp.dot(w1_ref[...], patch1_ref[...],
                   preferred_element_type=f32)            # (8, 1024)

    # ---- bias + ReLU + 2x2/2 max-pool (pool(relu(z+b)) == relu(max(z)+b)) ----
    m1 = jnp.maximum(acc1, shift_left(acc1, 1))
    m1 = jnp.maximum(m1, shift_left(m1, W_ROW))
    a1 = jnp.maximum(m1 + b1_ref[...], 0.0)               # pooled (i,j) at lane 64i+2j

    # ---- conv2 directly on the stride-2 sparse layout (no compaction) ----
    for t in range(K * K):
        kh, kw = t // K, t % K
        patch2_ref[pl.ds(t * CP, CP), :] = shift_left(a1, 2 * kh * W_ROW + 2 * kw)
    acc2 = jnp.dot(w2_ref[...], patch2_ref[...],
                   preferred_element_type=f32)            # (16, 1024)
    m2 = jnp.maximum(acc2, shift_left(acc2, 2))
    m2 = jnp.maximum(m2, shift_left(m2, 2 * W_ROW))
    a2 = jnp.maximum(m2 + b2_ref[...], 0.0)               # pooled (i,j) at lane 128i+4j

    # ---- flatten: gather the 25 valid lanes/channel via a 0/1 matmul ----
    d2 = jnp.dot(a2, sel_ref[...], preferred_element_type=f32)   # (16, 128), k=i*5+j

    # ---- fc1: y[n] = sum_{c,k} d2[c,k] * W1[c*25+k, n] ----
    h = jnp.zeros((1, fb1_ref.shape[-1]), f32)
    for c in range(d2.shape[0]):                          # 16 row-matmuls, f32 acc
        h = h + jnp.dot(d2[c:c + 1, :], fw1_ref[c], preferred_element_type=f32)
    h = jnp.maximum(h + fb1_ref[...], 0.0)

    # ---- fc2 / fc3 (padded lanes stay exactly 0 through ReLU) ----
    h = jnp.maximum(jnp.dot(h, fw2_ref[...], preferred_element_type=f32)
                    + fb2_ref[...], 0.0)
    h = jnp.maximum(jnp.dot(h, fw3_ref[...], preferred_element_type=f32)
                    + fb3_ref[...], 0.0)
    o_ref[...] = h                                        # (1, 128)


# --------------------------- one-time weight packing -------------------------

def _pack_params(p):
    """Pack/zero-pad all weights once (hoisted out of the per-forward path)."""
    f32 = jnp.float32

    def pack_conv(w, oc_pad):
        oc, c = w.shape[0], w.shape[1]
        wt = jnp.transpose(w.astype(f32), (0, 2, 3, 1))              # (oc, K, K, c)
        wt = jnp.pad(wt, ((0, oc_pad - oc), (0, 0), (0, 0), (0, CP - c)))
        return wt.reshape(oc_pad, PATCH_ROWS)                        # col = (kh*K+kw)*8 + c

    w1p = pack_conv(p["w1"], 8)                                      # (8, 200)
    b1p = jnp.pad(p["b1"].astype(f32), (0, 2)).reshape(8, 1)
    w2p = pack_conv(p["w2"], 16)                                     # (16, 200)
    b2p = p["b2"].astype(f32).reshape(16, 1)

    # Lane-gather matrix: pooled2 value (i, j) lives at lane 128*i + 4*j.
    sel = np.zeros((N_LANES, NP), np.float32)
    for i in range(5):
        for j in range(5):
            sel[128 * i + 4 * j, i * 5 + j] = 1.0

    fw1p = jnp.pad(p["fw1"].astype(f32).reshape(16, 25, 120),
                   ((0, 0), (0, NP - 25), (0, NP - 120)))            # (16, 128, 128)
    fb1p = jnp.pad(p["fb1"].astype(f32), (0, NP - 120)).reshape(1, NP)
    fw2p = jnp.pad(p["fw2"].astype(f32), ((0, NP - 120), (0, NP - 80)))
    fb2p = jnp.pad(p["fb2"].astype(f32), (0, NP - 80)).reshape(1, NP)
    fw3p = jnp.pad(p["fw3"].astype(f32), ((0, NP - 80), (0, NP - 10)))
    fb3p = jnp.pad(p["fb3"].astype(f32), (0, NP - 10)).reshape(1, NP)

    return dict(w1p=w1p, b1p=b1p, w2p=w2p, b2p=b2p, sel=jnp.asarray(sel),
                fw1p=fw1p, fb1p=fb1p, fw2p=fw2p, fb2p=fb2p,
                fw3p=fw3p, fb3p=fb3p)


# ------------------------------- forward pass --------------------------------

@jax.jit
def convnn_forward(x, packed):
    B, C, H, W = x.shape
    assert (H, W) == (32, 32) and C == 3, "ConvNN flatten size implies 3x32x32 input"
    f32 = jnp.float32
    # Only per-call glue: pad channels to 8 sublanes + flatten spatial to lanes.
    xq = jnp.pad(x.astype(f32), ((0, 0), (0, CP - C), (0, 0), (0, 0)))
    xq = xq.reshape(B, CP, N_LANES)

    out = pl.pallas_call(
        _convnn_fused_kernel,
        out_shape=jax.ShapeDtypeStruct((B, 1, NP), f32),
        grid=(B,),
        in_specs=[
            pl.BlockSpec((None, CP, N_LANES), lambda i: (i, 0, 0)),   # image
            pl.BlockSpec((8, PATCH_ROWS), lambda i: (0, 0)),          # w1p
            pl.BlockSpec((8, 1), lambda i: (0, 0)),                   # b1p
            pl.BlockSpec((16, PATCH_ROWS), lambda i: (0, 0)),         # w2p
            pl.BlockSpec((16, 1), lambda i: (0, 0)),                  # b2p
            pl.BlockSpec((N_LANES, NP), lambda i: (0, 0)),            # sel
            pl.BlockSpec((16, NP, NP), lambda i: (0, 0, 0)),          # fw1p
            pl.BlockSpec((1, NP), lambda i: (0, 0)),                  # fb1p
            pl.BlockSpec((NP, NP), lambda i: (0, 0)),                 # fw2p
            pl.BlockSpec((1, NP), lambda i: (0, 0)),                  # fb2p
            pl.BlockSpec((NP, NP), lambda i: (0, 0)),                 # fw3p
            pl.BlockSpec((1, NP), lambda i: (0, 0)),                  # fb3p
        ],
        out_specs=pl.BlockSpec((None, 1, NP), lambda i: (i, 0, 0)),
        scratch_shapes=[pltpu.VMEM((PATCH_ROWS, N_LANES), f32),
                        pltpu.VMEM((PATCH_ROWS, N_LANES), f32)],
        compiler_params=pltpu.CompilerParams(
            dimension_semantics=("parallel",)),
    )(xq, packed["w1p"], packed["b1p"], packed["w2p"], packed["b2p"],
      packed["sel"], packed["fw1p"], packed["fb1p"], packed["fw2p"],
      packed["fb2p"], packed["fw3p"], packed["fb3p"])

    return out.reshape(B, NP)[:, :10]


# ----------------------- params (deterministic init) ------------------------

def init_params(key):
    ks = jax.random.split(key, 10)

    def u(k, shape, fan_in):
        bound = 1.0 / np.sqrt(fan_in)
        return jax.random.uniform(k, shape, jnp.float32, -bound, bound)

    return {
        "w1": u(ks[0], (6, 3, 5, 5), 3 * 5 * 5),
        "b1": u(ks[1], (6,), 3 * 5 * 5),
        "w2": u(ks[2], (16, 6, 5, 5), 6 * 5 * 5),
        "b2": u(ks[3], (16,), 6 * 5 * 5),
        # Linear weights stored as (in, out) for GEMM (torch stores (out, in)).
        "fw1": u(ks[4], (400, 120), 400),
        "fb1": u(ks[5], (120,), 400),
        "fw2": u(ks[6], (120, 80), 120),
        "fb2": u(ks[7], (80,), 120),
        "fw3": u(ks[8], (80, 10), 80),
        "fb3": u(ks[9], (10,), 80),
    }


# ------------------------------ pure-JAX ref ---------------------------------

def _ref_forward(x, p):
    def conv(xx, w, b):
        out = jax.lax.conv_general_dilated(
            xx, w, window_strides=(1, 1), padding="VALID",
            dimension_numbers=("NCHW", "OIHW", "NCHW"))
        return jnp.maximum(out + b[None, :, None, None], 0.0)

    def pool(xx):
        B, C, H, W = xx.shape
        return jnp.max(xx.reshape(B, C, H // 2, 2, W // 2, 2), axis=(3, 5))

    out = pool(conv(x, p["w1"], p["b1"]))
    out = pool(conv(out, p["w2"], p["b2"]))
    out = out.reshape(-1, 400)
    out = jnp.maximum(out @ p["fw1"] + p["fb1"], 0.0)
    out = jnp.maximum(out @ p["fw2"] + p["fb2"], 0.0)
    out = jnp.maximum(out @ p["fw3"] + p["fb3"], 0.0)
    return out


# ---------------------------------- main -------------------------------------

if __name__ == "__main__":
    key = jax.random.PRNGKey(0)
    kx, kp = jax.random.split(key)
    # 32x32 spatial is required so flatten size == 16*5*5, as the module implies.
    x = jax.random.normal(kx, (2, 3, 32, 32), jnp.float32)
    params = init_params(kp)
    packed = _pack_params(params)          # one-time weight packing (hoisted)

    out = jax.block_until_ready(convnn_forward(x, packed))
    ref = jax.block_until_ready(_ref_forward(x, params))
    np.testing.assert_allclose(np.asarray(out), np.asarray(ref),
                               rtol=1e-3, atol=1e-3)

    assert out.shape == (2, 10) and out.dtype == jnp.float32
    print("KERNEL_OK")
</pallas_src>

<mosaic_0001>
module attributes {stable_mosaic.version = 11 : i64} {
  func.func @_convnn_fused_kernel(%arg0: i32, %arg1: memref<1x8x1024xf32, #tpu.memory_space<vmem>>, %arg2: memref<8x200xf32, #tpu.memory_space<vmem>>, %arg3: memref<8x1xf32, #tpu.memory_space<vmem>>, %arg4: memref<16x200xf32, #tpu.memory_space<vmem>>, %arg5: memref<16x1xf32, #tpu.memory_space<vmem>>, %arg6: memref<1024x128xf32, #tpu.memory_space<vmem>>, %arg7: memref<16x128x128xf32, #tpu.memory_space<vmem>>, %arg8: memref<1x128xf32, #tpu.memory_space<vmem>>, %arg9: memref<128x128xf32, #tpu.memory_space<vmem>>, %arg10: memref<1x128xf32, #tpu.memory_space<vmem>>, %arg11: memref<128x128xf32, #tpu.memory_space<vmem>>, %arg12: memref<1x128xf32, #tpu.memory_space<vmem>>, %arg13: memref<1x1x128xf32, #tpu.memory_space<vmem>>, %arg14: memref<200x1024xf32, #tpu.memory_space<vmem>>, %arg15: memref<200x1024xf32, #tpu.memory_space<vmem>>) attributes {dimension_semantics = [#tpu.dimension_semantics<parallel>], iteration_bounds = array<i64: 2>, scalar_prefetch = 0 : i64, scratch_operands = 2 : i64, tpu.core_type = #tpu.core_type<tc>, window_params = [{transform_indices = @transform_0, window_bounds = array<i64: 1, 8, 1024>}, {pipeline_mode = #tpu.pipeline_mode<synchronous>, transform_indices = @transform_1, window_bounds = array<i64: 8, 200>}, {pipeline_mode = #tpu.pipeline_mode<synchronous>, transform_indices = @transform_2, window_bounds = array<i64: 8, 1>}, {pipeline_mode = #tpu.pipeline_mode<synchronous>, transform_indices = @transform_3, window_bounds = array<i64: 16, 200>}, {pipeline_mode = #tpu.pipeline_mode<synchronous>, transform_indices = @transform_4, window_bounds = array<i64: 16, 1>}, {pipeline_mode = #tpu.pipeline_mode<synchronous>, transform_indices = @transform_5, window_bounds = array<i64: 1024, 128>}, {pipeline_mode = #tpu.pipeline_mode<synchronous>, transform_indices = @transform_6, window_bounds = array<i64: 16, 128, 128>}, {pipeline_mode = #tpu.pipeline_mode<synchronous>, transform_indices = @transform_7, window_bounds = array<i64: 1, 128>}, {pipeline_mode = #tpu.pipeline_mode<synchronous>, transform_indices = @transform_8, window_bounds = array<i64: 128, 128>}, {pipeline_mode = #tpu.pipeline_mode<synchronous>, transform_indices = @transform_9, window_bounds = array<i64: 1, 128>}, {pipeline_mode = #tpu.pipeline_mode<synchronous>, transform_indices = @transform_10, window_bounds = array<i64: 128, 128>}, {pipeline_mode = #tpu.pipeline_mode<synchronous>, transform_indices = @transform_11, window_bounds = array<i64: 1, 128>}, {transform_indices = @transform_12, window_bounds = array<i64: 1, 1, 128>}]} {
    %c0 = arith.constant 0 : index
    %c0_0 = arith.constant 0 : index
    %c0_1 = arith.constant 0 : index
    %0 = vector.load %arg1[%c0, %c0_0, %c0_1] : memref<1x8x1024xf32, #tpu.memory_space<vmem>>, vector<1x8x1024xf32>
    %1 = vector.shape_cast %0 : vector<1x8x1024xf32> to vector<8x1024xf32>
    %c0_2 = arith.constant 0 : index
    %c0_3 = arith.constant 0 : index
    %2 = vector.load %arg14[%c0_2, %c0_3] : memref<200x1024xf32, #tpu.memory_space<vmem>>, vector<8x1024xf32>
    tpu.vector_store %arg14[%c0_2, %c0_3], %1 {strides = array<i32>} : memref<200x1024xf32, #tpu.memory_space<vmem>>, vector<8x1024xf32>,
    %c1023_i32 = arith.constant 1023 : i32
    %3 = tpu.dynamic_rotate %1 by %c1023_i32 dim 1 : vector<8x1024xf32>, i32 -> vector<8x1024xf32>
    %c8 = arith.constant 8 : index
    %c0_4 = arith.constant 0 : index
    %4 = vector.load %arg14[%c8, %c0_4] : memref<200x1024xf32, #tpu.memory_space<vmem>>, vector<8x1024xf32>
    tpu.vector_store %arg14[%c8, %c0_4], %3 {strides = array<i32>} : memref<200x1024xf32, #tpu.memory_space<vmem>>, vector<8x1024xf32>,
    %c1022_i32 = arith.constant 1022 : i32
    %5 = tpu.dynamic_rotate %1 by %c1022_i32 dim 1 : vector<8x1024xf32>, i32 -> vector<8x1024xf32>
    %c16 = arith.constant 16 : index
    %c0_5 = arith.constant 0 : index
    %6 = vector.load %arg14[%c16, %c0_5] : memref<200x1024xf32, #tpu.memory_space<vmem>>, vector<8x1024xf32>
    tpu.vector_store %arg14[%c16, %c0_5], %5 {strides = array<i32>} : memref<200x1024xf32, #tpu.memory_space<vmem>>, vector<8x1024xf32>,
    %c1021_i32 = arith.constant 1021 : i32
    %7 = tpu.dynamic_rotate %1 by %c1021_i32 dim 1 : vector<8x1024xf32>, i32 -> vector<8x1024xf32>
    %c24 = arith.constant 24 : index
    %c0_6 = arith.constant 0 : index
    %8 = vector.load %arg14[%c24, %c0_6] : memref<200x1024xf32, #tpu.memory_space<vmem>>, vector<8x1024xf32>
    tpu.vector_store %arg14[%c24, %c0_6], %7 {strides = array<i32>} : memref<200x1024xf32, #tpu.memory_space<vmem>>, vector<8x1024xf32>,
    %c1020_i32 = arith.constant 1020 : i32
    %9 = tpu.dynamic_rotate %1 by %c1020_i32 dim 1 : vector<8x1024xf32>, i32 -> vector<8x1024xf32>
    %c32 = arith.constant 32 : index
    %c0_7 = arith.constant 0 : index
    %10 = vector.load %arg14[%c32, %c0_7] : memref<200x1024xf32, #tpu.memory_space<vmem>>, vector<8x1024xf32>
    tpu.vector_store %arg14[%c32, %c0_7], %9 {strides = array<i32>} : memref<200x1024xf32, #tpu.memory_space<vmem>>, vector<8x1024xf32>,
    %c992_i32 = arith.constant 992 : i32
    %11 = tpu.dynamic_rotate %1 by %c992_i32 dim 1 : vector<8x1024xf32>, i32 -> vector<8x1024xf32>
    %c40 = arith.constant 40 : index
    %c0_8 = arith.constant 0 : index
    %12 = vector.load %arg14[%c40, %c0_8] : memref<200x1024xf32, #tpu.memory_space<vmem>>, vector<8x1024xf32>
    tpu.vector_store %arg14[%c40, %c0_8], %11 {strides = array<i32>} : memref<200x1024xf32, #tpu.memory_space<vmem>>, vector<8x1024xf32>,
    %c991_i32 = arith.constant 991 : i32
    %13 = tpu.dynamic_rotate %1 by %c991_i32 dim 1 : vector<8x1024xf32>, i32 -> vector<8x1024xf32>
    %c48 = arith.constant 48 : index
    %c0_9 = arith.constant 0 : index
    %14 = vector.load %arg14[%c48, %c0_9] : memref<200x1024xf32, #tpu.memory_space<vmem>>, vector<8x1024xf32>
    tpu.vector_store %arg14[%c48, %c0_9], %13 {strides = array<i32>} : memref<200x1024xf32, #tpu.memory_space<vmem>>, vector<8x1024xf32>,
    %c990_i32 = arith.constant 990 : i32
    %15 = tpu.dynamic_rotate %1 by %c990_i32 dim 1 : vector<8x1024xf32>, i32 -> vector<8x1024xf32>
    %c56 = arith.constant 56 : index
    %c0_10 = arith.constant 0 : index
    %16 = vector.load %arg14[%c56, %c0_10] : memref<200x1024xf32, #tpu.memory_space<vmem>>, vector<8x1024xf32>
    tpu.vector_store %arg14[%c56, %c0_10], %15 {strides = array<i32>} : memref<200x1024xf32, #tpu.memory_space<vmem>>, vector<8x1024xf32>,
    %c989_i32 = arith.constant 989 : i32
    %17 = tpu.dynamic_rotate %1 by %c989_i32 dim 1 : vector<8x1024xf32>, i32 -> vector<8x1024xf32>
    %c64 = arith.constant 64 : index
    %c0_11 = arith.constant 0 : index
    %18 = vector.load %arg14[%c64, %c0_11] : memref<200x1024xf32, #tpu.memory_space<vmem>>, vector<8x1024xf32>
    tpu.vector_store %arg14[%c64, %c0_11], %17 {strides = array<i32>} : memref<200x1024xf32, #tpu.memory_space<vmem>>, vector<8x1024xf32>,
    %c988_i32 = arith.constant 988 : i32
    %19 = tpu.dynamic_rotate %1 by %c988_i32 dim 1 : vector<8x1024xf32>, i32 -> vector<8x1024xf32>
    %c72 = arith.constant 72 : index
    %c0_12 = arith.constant 0 : index
    %20 = vector.load %arg14[%c72, %c0_12] : memref<200x1024xf32, #tpu.memory_space<vmem>>, vector<8x1024xf32>
    tpu.vector_store %arg14[%c72, %c0_12], %19 {strides = array<i32>} : memref<200x1024xf32, #tpu.memory_space<vmem>>, vector<8x1024xf32>,
    %c960_i32 = arith.constant 960 : i32
    %21 = tpu.dynamic_rotate %1 by %c960_i32 dim 1 : vector<8x1024xf32>, i32 -> vector<8x1024xf32>
    %c80 = arith.constant 80 : index
    %c0_13 = arith.constant 0 : index
    %22 = vector.load %arg14[%c80, %c0_13] : memref<200x1024xf32, #tpu.memory_space<vmem>>, vector<8x1024xf32>
    tpu.vector_store %arg14[%c80, %c0_13], %21 {strides = array<i32>} : memref<200x1024xf32, #tpu.memory_space<vmem>>, vector<8x1024xf32>,
    %c959_i32 = arith.constant 959 : i32
    %23 = tpu.dynamic_rotate %1 by %c959_i32 dim 1 : vector<8x1024xf32>, i32 -> vector<8x1024xf32>
    %c88 = arith.constant 88 : index
    %c0_14 = arith.constant 0 : index
    %24 = vector.load %arg14[%c88, %c0_14] : memref<200x1024xf32, #tpu.memory_space<vmem>>, vector<8x1024xf32>
    tpu.vector_store %arg14[%c88, %c0_14], %23 {strides = array<i32>} : memref<200x1024xf32, #tpu.memory_space<vmem>>, vector<8x1024xf32>,
    %c958_i32 = arith.constant 958 : i32
    %25 = tpu.dynamic_rotate %1 by %c958_i32 dim 1 : vector<8x1024xf32>, i32 -> vector<8x1024xf32>
    %c96 = arith.constant 96 : index
    %c0_15 = arith.constant 0 : index
    %26 = vector.load %arg14[%c96, %c0_15] : memref<200x1024xf32, #tpu.memory_space<vmem>>, vector<8x1024xf32>
    tpu.vector_store %arg14[%c96, %c0_15], %25 {strides = array<i32>} : memref<200x1024xf32, #tpu.memory_space<vmem>>, vector<8x1024xf32>,
    %c957_i32 = arith.constant 957 : i32
    %27 = tpu.dynamic_rotate %1 by %c957_i32 dim 1 : vector<8x1024xf32>, i32 -> vector<8x1024xf32>
    %c104 = arith.constant 104 : index
    %c0_16 = arith.constant 0 : index
    %28 = vector.load %arg14[%c104, %c0_16] : memref<200x1024xf32, #tpu.memory_space<vmem>>, vector<8x1024xf32>
    tpu.vector_store %arg14[%c104, %c0_16], %27 {strides = array<i32>} : memref<200x1024xf32, #tpu.memory_space<vmem>>, vector<8x1024xf32>,
    %c956_i32 = arith.constant 956 : i32
    %29 = tpu.dynamic_rotate %1 by %c956_i32 dim 1 : vector<8x1024xf32>, i32 -> vector<8x1024xf32>
    %c112 = arith.constant 112 : index
    %c0_17 = arith.constant 0 : index
    %30 = vector.load %arg14[%c112, %c0_17] : memref<200x1024xf32, #tpu.memory_space<vmem>>, vector<8x1024xf32>
    tpu.vector_store %arg14[%c112, %c0_17], %29 {strides = array<i32>} : memref<200x1024xf32, #tpu.memory_space<vmem>>, vector<8x1024xf32>,
    %c928_i32 = arith.constant 928 : i32
    %31 = tpu.dynamic_rotate %1 by %c928_i32 dim 1 : vector<8x1024xf32>, i32 -> vector<8x1024xf32>
    %c120 = arith.constant 120 : index
    %c0_18 = arith.constant 0 : index
    %32 = vector.load %arg14[%c120, %c0_18] : memref<200x1024xf32, #tpu.memory_space<vmem>>, vector<8x1024xf32>
    tpu.vector_store %arg14[%c120, %c0_18], %31 {strides = array<i32>} : memref<200x1024xf32, #tpu.memory_space<vmem>>, vector<8x1024xf32>,
    %c927_i32 = arith.constant 927 : i32
    %33 = tpu.dynamic_rotate %1 by %c927_i32 dim 1 : vector<8x1024xf32>, i32 -> vector<8x1024xf32>
    %c128 = arith.constant 128 : index
    %c0_19 = arith.constant 0 : index
    %34 = vector.load %arg14[%c128, %c0_19] : memref<200x1024xf32, #tpu.memory_space<vmem>>, vector<8x1024xf32>
    tpu.vector_store %arg14[%c128, %c0_19], %33 {strides = array<i32>} : memref<200x1024xf32, #tpu.memory_space<vmem>>, vector<8x1024xf32>,
    %c926_i32 = arith.constant 926 : i32
    %35 = tpu.dynamic_rotate %1 by %c926_i32 dim 1 : vector<8x1024xf32>, i32 -> vector<8x1024xf32>
    %c136 = arith.constant 136 : index
    %c0_20 = arith.constant 0 : index
    %36 = vector.load %arg14[%c136, %c0_20] : memref<200x1024xf32, #tpu.memory_space<vmem>>, vector<8x1024xf32>
    tpu.vector_store %arg14[%c136, %c0_20], %35 {strides = array<i32>} : memref<200x1024xf32, #tpu.memory_space<vmem>>, vector<8x1024xf32>,
    %c925_i32 = arith.constant 925 : i32
    %37 = tpu.dynamic_rotate %1 by %c925_i32 dim 1 : vector<8x1024xf32>, i32 -> vector<8x1024xf32>
    %c144 = arith.constant 144 : index
    %c0_21 = arith.constant 0 : index
    %38 = vector.load %arg14[%c144, %c0_21] : memref<200x1024xf32, #tpu.memory_space<vmem>>, vector<8x1024xf32>
    tpu.vector_store %arg14[%c144, %c0_21], %37 {strides = array<i32>} : memref<200x1024xf32, #tpu.memory_space<vmem>>, vector<8x1024xf32>,
    %c924_i32 = arith.constant 924 : i32
    %39 = tpu.dynamic_rotate %1 by %c924_i32 dim 1 : vector<8x1024xf32>, i32 -> vector<8x1024xf32>
    %c152 = arith.constant 152 : index
    %c0_22 = arith.constant 0 : index
    %40 = vector.load %arg14[%c152, %c0_22] : memref<200x1024xf32, #tpu.memory_space<vmem>>, vector<8x1024xf32>
    tpu.vector_store %arg14[%c152, %c0_22], %39 {strides = array<i32>} : memref<200x1024xf32, #tpu.memory_space<vmem>>, vector<8x1024xf32>,
    %c896_i32 = arith.constant 896 : i32
    %41 = tpu.dynamic_rotate %1 by %c896_i32 dim 1 : vector<8x1024xf32>, i32 -> vector<8x1024xf32>
    %c160 = arith.constant 160 : index
    %c0_23 = arith.constant 0 : index
    %42 = vector.load %arg14[%c160, %c0_23] : memref<200x1024xf32, #tpu.memory_space<vmem>>, vector<8x1024xf32>
    tpu.vector_store %arg14[%c160, %c0_23], %41 {strides = array<i32>} : memref<200x1024xf32, #tpu.memory_space<vmem>>, vector<8x1024xf32>,
    %c895_i32 = arith.constant 895 : i32
    %43 = tpu.dynamic_rotate %1 by %c895_i32 dim 1 : vector<8x1024xf32>, i32 -> vector<8x1024xf32>
    %c168 = arith.constant 168 : index
    %c0_24 = arith.constant 0 : index
    %44 = vector.load %arg14[%c168, %c0_24] : memref<200x1024xf32, #tpu.memory_space<vmem>>, vector<8x1024xf32>
    tpu.vector_store %arg14[%c168, %c0_24], %43 {strides = array<i32>} : memref<200x1024xf32, #tpu.memory_space<vmem>>, vector<8x1024xf32>,
    %c894_i32 = arith.constant 894 : i32
    %45 = tpu.dynamic_rotate %1 by %c894_i32 dim 1 : vector<8x1024xf32>, i32 -> vector<8x1024xf32>
    %c176 = arith.constant 176 : index
    %c0_25 = arith.constant 0 : index
    %46 = vector.load %arg14[%c176, %c0_25] : memref<200x1024xf32, #tpu.memory_space<vmem>>, vector<8x1024xf32>
    tpu.vector_store %arg14[%c176, %c0_25], %45 {strides = array<i32>} : memref<200x1024xf32, #tpu.memory_space<vmem>>, vector<8x1024xf32>,
    %c893_i32 = arith.constant 893 : i32
    %47 = tpu.dynamic_rotate %1 by %c893_i32 dim 1 : vector<8x1024xf32>, i32 -> vector<8x1024xf32>
    %c184 = arith.constant 184 : index
    %c0_26 = arith.constant 0 : index
    %48 = vector.load %arg14[%c184, %c0_26] : memref<200x1024xf32, #tpu.memory_space<vmem>>, vector<8x1024xf32>
    tpu.vector_store %arg14[%c184, %c0_26], %47 {strides = array<i32>} : memref<200x1024xf32, #tpu.memory_space<vmem>>, vector<8x1024xf32>,
    %c892_i32 = arith.constant 892 : i32
    %49 = tpu.dynamic_rotate %1 by %c892_i32 dim 1 : vector<8x1024xf32>, i32 -> vector<8x1024xf32>
    %c192 = arith.constant 192 : index
    %c0_27 = arith.constant 0 : index
    %50 = vector.load %arg14[%c192, %c0_27] : memref<200x1024xf32, #tpu.memory_space<vmem>>, vector<8x1024xf32>
    tpu.vector_store %arg14[%c192, %c0_27], %49 {strides = array<i32>} : memref<200x1024xf32, #tpu.memory_space<vmem>>, vector<8x1024xf32>,
    %c0_28 = arith.constant 0 : index
    %c0_29 = arith.constant 0 : index
    %51 = vector.load %arg2[%c0_28, %c0_29] : memref<8x200xf32, #tpu.memory_space<vmem>>, vector<8x200xf32>
    %c0_30 = arith.constant 0 : index
    %c0_31 = arith.constant 0 : index
    %52 = vector.load %arg14[%c0_30, %c0_31] : memref<200x1024xf32, #tpu.memory_space<vmem>>, vector<200x1024xf32>
    %cst = arith.constant dense<0.000000e+00> : vector<8x1024xf32>
    %53 = tpu.matmul %51, %52, %cst {dimension_numbers = #tpu.dot_dimension_numbers<[1], [0], [0], [1], [0, 0, 1, 1], [], []>} : vector<8x200xf32>, vector<200x1024xf32>, vector<8x1024xf32> -> vector<8x1024xf32>
    %c1023_i32_32 = arith.constant 1023 : i32
    %54 = tpu.dynamic_rotate %53 by %c1023_i32_32 dim 1 : vector<8x1024xf32>, i32 -> vector<8x1024xf32>
    %55 = arith.maximumf %53, %54 : vector<8x1024xf32>
    %c992_i32_33 = arith.constant 992 : i32
    %56 = tpu.dynamic_rotate %55 by %c992_i32_33 dim 1 : vector<8x1024xf32>, i32 -> vector<8x1024xf32>
    %57 = arith.maximumf %55, %56 : vector<8x1024xf32>
    %c0_34 = arith.constant 0 : index
    %c0_35 = arith.constant 0 : index
    %58 = vector.load %arg3[%c0_34, %c0_35] : memref<8x1xf32, #tpu.memory_space<vmem>>, vector<8x1xf32>
    %59 = vector.broadcast %58 : vector<8x1xf32> to vector<8x1024xf32>
    %60 = arith.addf %57, %59 : vector<8x1024xf32>
    %cst_36 = arith.constant 0.000000e+00 : f32
    %61 = vector.broadcast %cst_36 : f32 to vector<8x1024xf32>
    %62 = arith.maximumf %60, %61 : vector<8x1024xf32>
    %c0_37 = arith.constant 0 : index
    %c0_38 = arith.constant 0 : index
    %63 = vector.load %arg15[%c0_37, %c0_38] : memref<200x1024xf32, #tpu.memory_space<vmem>>, vector<8x1024xf32>
    tpu.vector_store %arg15[%c0_37, %c0_38], %62 {strides = array<i32>} : memref<200x1024xf32, #tpu.memory_space<vmem>>, vector<8x1024xf32>,
    %c1022_i32_39 = arith.constant 1022 : i32
    %64 = tpu.dynamic_rotate %62 by %c1022_i32_39 dim 1 : vector<8x1024xf32>, i32 -> vector<8x1024xf32>
    %c8_40 = arith.constant 8 : index
    %c0_41 = arith.constant 0 : index
    %65 = vector.load %arg15[%c8_40, %c0_41] : memref<200x1024xf32, #tpu.memory_space<vmem>>, vector<8x1024xf32>
    tpu.vector_store %arg15[%c8_40, %c0_41], %64 {strides = array<i32>} : memref<200x1024xf32, #tpu.memory_space<vmem>>, vector<8x1024xf32>,
    %c1020_i32_42 = arith.constant 1020 : i32
    %66 = tpu.dynamic_rotate %62 by %c1020_i32_42 dim 1 : vector<8x1024xf32>, i32 -> vector<8x1024xf32>
    %c16_43 = arith.constant 16 : index
    %c0_44 = arith.constant 0 : index
    %67 = vector.load %arg15[%c16_43, %c0_44] : memref<200x1024xf32, #tpu.memory_space<vmem>>, vector<8x1024xf32>
    tpu.vector_store %arg15[%c16_43, %c0_44], %66 {strides = array<i32>} : memref<200x1024xf32, #tpu.memory_space<vmem>>, vector<8x1024xf32>,
    %c1018_i32 = arith.constant 1018 : i32
    %68 = tpu.dynamic_rotate %62 by %c1018_i32 dim 1 : vector<8x1024xf32>, i32 -> vector<8x1024xf32>
    %c24_45 = arith.constant 24 : index
    %c0_46 = arith.constant 0 : index
    %69 = vector.load %arg15[%c24_45, %c0_46] : memref<200x1024xf32, #tpu.memory_space<vmem>>, vector<8x1024xf32>
    tpu.vector_store %arg15[%c24_45, %c0_46], %68 {strides = array<i32>} : memref<200x1024xf32, #tpu.memory_space<vmem>>, vector<8x1024xf32>,
    %c1016_i32 = arith.constant 1016 : i32
    %70 = tpu.dynamic_rotate %62 by %c1016_i32 dim 1 : vector<8x1024xf32>, i32 -> vector<8x1024xf32>
    %c32_47 = arith.constant 32 : index
    %c0_48 = arith.constant 0 : index
    %71 = vector.load %arg15[%c32_47, %c0_48] : memref<200x1024xf32, #tpu.memory_space<vmem>>, vector<8x1024xf32>
    tpu.vector_store %arg15[%c32_47, %c0_48], %70 {strides = array<i32>} : memref<200x1024xf32, #tpu.memory_space<vmem>>, vector<8x1024xf32>,
    %c960_i32_49 = arith.constant 960 : i32
    %72 = tpu.dynamic_rotate %62 by %c960_i32_49 dim 1 : vector<8x1024xf32>, i32 -> vector<8x1024xf32>
    %c40_50 = arith.constant 40 : index
    %c0_51 = arith.constant 0 : index
    %73 = vector.load %arg15[%c40_50, %c0_51] : memref<200x1024xf32, #tpu.memory_space<vmem>>, vector<8x1024xf32>
    tpu.vector_store %arg15[%c40_50, %c0_51], %72 {strides = array<i32>} : memref<200x1024xf32, #tpu.memory_space<vmem>>, vector<8x1024xf32>,
    %c958_i32_52 = arith.constant 958 : i32
    %74 = tpu.dynamic_rotate %62 by %c958_i32_52 dim 1 : vector<8x1024xf32>, i32 -> vector<8x1024xf32>
    %c48_53 = arith.constant 48 : index
    %c0_54 = arith.constant 0 : index
    %75 = vector.load %arg15[%c48_53, %c0_54] : memref<200x1024xf32, #tpu.memory_space<vmem>>, vector<8x1024xf32>
    tpu.vector_store %arg15[%c48_53, %c0_54], %74 {strides = array<i32>} : memref<200x1024xf32, #tpu.memory_space<vmem>>, vector<8x1024xf32>,
    %c956_i32_55 = arith.constant 956 : i32
    %76 = tpu.dynamic_rotate %62 by %c956_i32_55 dim 1 : vector<8x1024xf32>, i32 -> vector<8x1024xf32>
    %c56_56 = arith.constant 56 : index
    %c0_57 = arith.constant 0 : index
    %77 = vector.load %arg15[%c56_56, %c0_57] : memref<200x1024xf32, #tpu.memory_space<vmem>>, vector<8x1024xf32>
    tpu.vector_store %arg15[%c56_56, %c0_57], %76 {strides = array<i32>} : memref<200x1024xf32, #tpu.memory_space<vmem>>, vector<8x1024xf32>,
    %c954_i32 = arith.constant 954 : i32
    %78 = tpu.dynamic_rotate %62 by %c954_i32 dim 1 : vector<8x1024xf32>, i32 -> vector<8x1024xf32>
    %c64_58 = arith.constant 64 : index
    %c0_59 = arith.constant 0 : index
    %79 = vector.load %arg15[%c64_58, %c0_59] : memref<200x1024xf32, #tpu.memory_space<vmem>>, vector<8x1024xf32>
    tpu.vector_store %arg15[%c64_58, %c0_59], %78 {strides = array<i32>} : memref<200x1024xf32, #tpu.memory_space<vmem>>, vector<8x1024xf32>,
    %c952_i32 = arith.constant 952 : i32
    %80 = tpu.dynamic_rotate %62 by %c952_i32 dim 1 : vector<8x1024xf32>, i32 -> vector<8x1024xf32>
    %c72_60 = arith.constant 72 : index
    %c0_61 = arith.constant 0 : index
    %81 = vector.load %arg15[%c72_60, %c0_61] : memref<200x1024xf32, #tpu.memory_space<vmem>>, vector<8x1024xf32>
    tpu.vector_store %arg15[%c72_60, %c0_61], %80 {strides = array<i32>} : memref<200x1024xf32, #tpu.memory_space<vmem>>, vector<8x1024xf32>,
    %c896_i32_62 = arith.constant 896 : i32
    %82 = tpu.dynamic_rotate %62 by %c896_i32_62 dim 1 : vector<8x1024xf32>, i32 -> vector<8x1024xf32>
    %c80_63 = arith.constant 80 : index
    %c0_64 = arith.constant 0 : index
    %83 = vector.load %arg15[%c80_63, %c0_64] : memref<200x1024xf32, #tpu.memory_space<vmem>>, vector<8x1024xf32>
    tpu.vector_store %arg15[%c80_63, %c0_64], %82 {strides = array<i32>} : memref<200x1024xf32, #tpu.memory_space<vmem>>, vector<8x1024xf32>,
    %c894_i32_65 = arith.constant 894 : i32
    %84 = tpu.dynamic_rotate %62 by %c894_i32_65 dim 1 : vector<8x1024xf32>, i32 -> vector<8x1024xf32>
    %c88_66 = arith.constant 88 : index
    %c0_67 = arith.constant 0 : index
    %85 = vector.load %arg15[%c88_66, %c0_67] : memref<200x1024xf32, #tpu.memory_space<vmem>>, vector<8x1024xf32>
    tpu.vector_store %arg15[%c88_66, %c0_67], %84 {strides = array<i32>} : memref<200x1024xf32, #tpu.memory_space<vmem>>, vector<8x1024xf32>,
    %c892_i32_68 = arith.constant 892 : i32
    %86 = tpu.dynamic_rotate %62 by %c892_i32_68 dim 1 : vector<8x1024xf32>, i32 -> vector<8x1024xf32>
    %c96_69 = arith.constant 96 : index
    %c0_70 = arith.constant 0 : index
    %87 = vector.load %arg15[%c96_69, %c0_70] : memref<200x1024xf32, #tpu.memory_space<vmem>>, vector<8x1024xf32>
    tpu.vector_store %arg15[%c96_69, %c0_70], %86 {strides = array<i32>} : memref<200x1024xf32, #tpu.memory_space<vmem>>, vector<8x1024xf32>,
    %c890_i32 = arith.constant 890 : i32
    %88 = tpu.dynamic_rotate %62 by %c890_i32 dim 1 : vector<8x1024xf32>, i32 -> vector<8x1024xf32>
    %c104_71 = arith.constant 104 : index
    %c0_72 = arith.constant 0 : index
    %89 = vector.load %arg15[%c104_71, %c0_72] : memref<200x1024xf32, #tpu.memory_space<vmem>>, vector<8x1024xf32>
    tpu.vector_store %arg15[%c104_71, %c0_72], %88 {strides = array<i32>} : memref<200x1024xf32, #tpu.memory_space<vmem>>, vector<8x1024xf32>,
    %c888_i32 = arith.constant 888 : i32
    %90 = tpu.dynamic_rotate %62 by %c888_i32 dim 1 : vector<8x1024xf32>, i32 -> vector<8x1024xf32>
    %c112_73 = arith.constant 112 : index
    %c0_74 = arith.constant 0 : index
    %91 = vector.load %arg15[%c112_73, %c0_74] : memref<200x1024xf32, #tpu.memory_space<vmem>>, vector<8x1024xf32>
    tpu.vector_store %arg15[%c112_73, %c0_74], %90 {strides = array<i32>} : memref<200x1024xf32, #tpu.memory_space<vmem>>, vector<8x1024xf32>,
    %c832_i32 = arith.constant 832 : i32
    %92 = tpu.dynamic_rotate %62 by %c832_i32 dim 1 : vector<8x1024xf32>, i32 -> vector<8x1024xf32>
    %c120_75 = arith.constant 120 : index
    %c0_76 = arith.constant 0 : index
    %93 = vector.load %arg15[%c120_75, %c0_76] : memref<200x1024xf32, #tpu.memory_space<vmem>>, vector<8x1024xf32>
    tpu.vector_store %arg15[%c120_75, %c0_76], %92 {strides = array<i32>} : memref<200x1024xf32, #tpu.memory_space<vmem>>, vector<8x1024xf32>,
    %c830_i32 = arith.constant 830 : i32
    %94 = tpu.dynamic_rotate %62 by %c830_i32 dim 1 : vector<8x1024xf32>, i32 -> vector<8x1024xf32>
    %c128_77 = arith.constant 128 : index
    %c0_78 = arith.constant 0 : index
    %95 = vector.load %arg15[%c128_77, %c0_78] : memref<200x1024xf32, #tpu.memory_space<vmem>>, vector<8x1024xf32>
    tpu.vector_store %arg15[%c128_77, %c0_78], %94 {strides = array<i32>} : memref<200x1024xf32, #tpu.memory_space<vmem>>, vector<8x1024xf32>,
    %c828_i32 = arith.constant 828 : i32
    %96 = tpu.dynamic_rotate %62 by %c828_i32 dim 1 : vector<8x1024xf32>, i32 -> vector<8x1024xf32>
    %c136_79 = arith.constant 136 : index
    %c0_80 = arith.constant 0 : index
    %97 = vector.load %arg15[%c136_79, %c0_80] : memref<200x1024xf32, #tpu.memory_space<vmem>>, vector<8x1024xf32>
    tpu.vector_store %arg15[%c136_79, %c0_80], %96 {strides = array<i32>} : memref<200x1024xf32, #tpu.memory_space<vmem>>, vector<8x1024xf32>,
    %c826_i32 = arith.constant 826 : i32
    %98 = tpu.dynamic_rotate %62 by %c826_i32 dim 1 : vector<8x1024xf32>, i32 -> vector<8x1024xf32>
    %c144_81 = arith.constant 144 : index
    %c0_82 = arith.constant 0 : index
    %99 = vector.load %arg15[%c144_81, %c0_82] : memref<200x1024xf32, #tpu.memory_space<vmem>>, vector<8x1024xf32>
    tpu.vector_store %arg15[%c144_81, %c0_82], %98 {strides = array<i32>} : memref<200x1024xf32, #tpu.memory_space<vmem>>, vector<8x1024xf32>,
    %c824_i32 = arith.constant 824 : i32
    %100 = tpu.dynamic_rotate %62 by %c824_i32 dim 1 : vector<8x1024xf32>, i32 -> vector<8x1024xf32>
    %c152_83 = arith.constant 152 : index
    %c0_84 = arith.constant 0 : index
    %101 = vector.load %arg15[%c152_83, %c0_84] : memref<200x1024xf32, #tpu.memory_space<vmem>>, vector<8x1024xf32>
    tpu.vector_store %arg15[%c152_83, %c0_84], %100 {strides = array<i32>} : memref<200x1024xf32, #tpu.memory_space<vmem>>, vector<8x1024xf32>,
    %c768_i32 = arith.constant 768 : i32
    %102 = tpu.dynamic_rotate %62 by %c768_i32 dim 1 : vector<8x1024xf32>, i32 -> vector<8x1024xf32>
    %c160_85 = arith.constant 160 : index
    %c0_86 = arith.constant 0 : index
    %103 = vector.load %arg15[%c160_85, %c0_86] : memref<200x1024xf32, #tpu.memory_space<vmem>>, vector<8x1024xf32>
    tpu.vector_store %arg15[%c160_85, %c0_86], %102 {strides = array<i32>} : memref<200x1024xf32, #tpu.memory_space<vmem>>, vector<8x1024xf32>,
    %c766_i32 = arith.constant 766 : i32
    %104 = tpu.dynamic_rotate %62 by %c766_i32 dim 1 : vector<8x1024xf32>, i32 -> vector<8x1024xf32>
    %c168_87 = arith.constant 168 : index
    %c0_88 = arith.constant 0 : index
    %105 = vector.load %arg15[%c168_87, %c0_88] : memref<200x1024xf32, #tpu.memory_space<vmem>>, vector<8x1024xf32>
    tpu.vector_store %arg15[%c168_87, %c0_88], %104 {strides = array<i32>} : memref<200x1024xf32, #tpu.memory_space<vmem>>, vector<8x1024xf32>,
    %c764_i32 = arith.constant 764 : i32
    %106 = tpu.dynamic_rotate %62 by %c764_i32 dim 1 : vector<8x1024xf32>, i32 -> vector<8x1024xf32>
    %c176_89 = arith.constant 176 : index
    %c0_90 = arith.constant 0 : index
    %107 = vector.load %arg15[%c176_89, %c0_90] : memref<200x1024xf32, #tpu.memory_space<vmem>>, vector<8x1024xf32>
    tpu.vector_store %arg15[%c176_89, %c0_90], %106 {strides = array<i32>} : memref<200x1024xf32, #tpu.memory_space<vmem>>, vector<8x1024xf32>,
    %c762_i32 = arith.constant 762 : i32
    %108 = tpu.dynamic_rotate %62 by %c762_i32 dim 1 : vector<8x1024xf32>, i32 -> vector<8x1024xf32>
    %c184_91 = arith.constant 184 : index
    %c0_92 = arith.constant 0 : index
    %109 = vector.load %arg15[%c184_91, %c0_92] : memref<200x1024xf32, #tpu.memory_space<vmem>>, vector<8x1024xf32>
    tpu.vector_store %arg15[%c184_91, %c0_92], %108 {strides = array<i32>} : memref<200x1024xf32, #tpu.memory_space<vmem>>, vector<8x1024xf32>,
    %c760_i32 = arith.constant 760 : i32
    %110 = tpu.dynamic_rotate %62 by %c760_i32 dim 1 : vector<8x1024xf32>, i32 -> vector<8x1024xf32>
    %c192_93 = arith.constant 192 : index
    %c0_94 = arith.constant 0 : index
    %111 = vector.load %arg15[%c192_93, %c0_94] : memref<200x1024xf32, #tpu.memory_space<vmem>>, vector<8x1024xf32>
    tpu.vector_store %arg15[%c192_93, %c0_94], %110 {strides = array<i32>} : memref<200x1024xf32, #tpu.memory_space<vmem>>, vector<8x1024xf32>,
    %c0_95 = arith.constant 0 : index
    %c0_96 = arith.constant 0 : index
    %112 = vector.load %arg4[%c0_95, %c0_96] : memref<16x200xf32, #tpu.memory_space<vmem>>, vector<16x200xf32>
    %c0_97 = arith.constant 0 : index
    %c0_98 = arith.constant 0 : index
    %113 = vector.load %arg15[%c0_97, %c0_98] : memref<200x1024xf32, #tpu.memory_space<vmem>>, vector<200x1024xf32>
    %cst_99 = arith.constant dense<0.000000e+00> : vector<16x1024xf32>
    %114 = tpu.matmul %112, %113, %cst_99 {dimension_numbers = #tpu.dot_dimension_numbers<[1], [0], [0], [1], [0, 0, 1, 1], [], []>} : vector<16x200xf32>, vector<200x1024xf32>, vector<16x1024xf32> -> vector<16x1024xf32>
    %c1022_i32_100 = arith.constant 1022 : i32
    %115 = tpu.dynamic_rotate %114 by %c1022_i32_100 dim 1 : vector<16x1024xf32>, i32 -> vector<16x1024xf32>
    %116 = arith.maximumf %114, %115 : vector<16x1024xf32>
    %c960_i32_101 = arith.constant 960 : i32
    %117 = tpu.dynamic_rotate %116 by %c960_i32_101 dim 1 : vector<16x1024xf32>, i32 -> vector<16x1024xf32>
    %118 = arith.maximumf %116, %117 : vector<16x1024xf32>
    %c0_102 = arith.constant 0 : index
    %c0_103 = arith.constant 0 : index
    %119 = vector.load %arg5[%c0_102, %c0_103] : memref<16x1xf32, #tpu.memory_space<vmem>>, vector<16x1xf32>
    %120 = vector.broadcast %119 : vector<16x1xf32> to vector<16x1024xf32>
    %121 = arith.addf %118, %120 : vector<16x1024xf32>
    %cst_104 = arith.constant 0.000000e+00 : f32
    %122 = vector.broadcast %cst_104 : f32 to vector<16x1024xf32>
    %123 = arith.maximumf %121, %122 : vector<16x1024xf32>
    %c0_105 = arith.constant 0 : index
    %c0_106 = arith.constant 0 : index
    %124 = vector.load %arg6[%c0_105, %c0_106] : memref<1024x128xf32, #tpu.memory_space<vmem>>, vector<1024x128xf32>
    %cst_107 = arith.constant dense<0.000000e+00> : vector<16x128xf32>
    %125 = tpu.matmul %123, %124, %cst_107 {dimension_numbers = #tpu.dot_dimension_numbers<[1], [0], [0], [1], [0, 0, 1, 1], [], []>} : vector<16x1024xf32>, vector<1024x128xf32>, vector<16x128xf32> -> vector<16x128xf32>
    %cst_108 = arith.constant 0.000000e+00 : f32
    %126 = vector.broadcast %cst_108 : f32 to vector<1x128xf32>
    %127 = vector.extract_strided_slice %125 {offsets = [0, 0], sizes = [1, 128], strides = [1, 1]} : vector<16x128xf32> to vector<1x128xf32>
    %c0_109 = arith.constant 0 : index
    %c0_110 = arith.constant 0 : index
    %c0_111 = arith.constant 0 : index
    %128 = vector.load %arg7[%c0_109, %c0_110, %c0_111] : memref<16x128x128xf32, #tpu.memory_space<vmem>>, vector<1x128x128xf32>
    %129 = vector.shape_cast %128 : vector<1x128x128xf32> to vector<128x128xf32>
    %cst_112 = arith.constant dense<0.000000e+00> : vector<1x128xf32>
    %130 = tpu.matmul %127, %129, %cst_112 {dimension_numbers = #tpu.dot_dimension_numbers<[1], [0], [0], [1], [0, 0, 1, 1], [], []>} : vector<1x128xf32>, vector<128x128xf32>, vector<1x128xf32> -> vector<1x128xf32>
    %131 = arith.addf %126, %130 : vector<1x128xf32>
    %132 = vector.extract_strided_slice %125 {offsets = [1, 0], sizes = [1, 128], strides = [1, 1]} : vector<16x128xf32> to vector<1x128xf32>
    %c1 = arith.constant 1 : index
    %c0_113 = arith.constant 0 : index
    %c0_114 = arith.constant 0 : index
    %133 = vector.load %arg7[%c1, %c0_113, %c0_114] : memref<16x128x128xf32, #tpu.memory_space<vmem>>, vector<1x128x128xf32>
    %134 = vector.shape_cast %133 : vector<1x128x128xf32> to vector<128x128xf32>
    %cst_115 = arith.constant dense<0.000000e+00> : vector<1x128xf32>
    %135 = tpu.matmul %132, %134, %cst_115 {dimension_numbers = #tpu.dot_dimension_numbers<[1], [0], [0], [1], [0, 0, 1, 1], [], []>} : vector<1x128xf32>, vector<128x128xf32>, vector<1x128xf32> -> vector<1x128xf32>
    %136 = arith.addf %131, %135 : vector<1x128xf32>
    %137 = vector.extract_strided_slice %125 {offsets = [2, 0], sizes = [1, 128], strides = [1, 1]} : vector<16x128xf32> to vector<1x128xf32>
    %c2 = arith.constant 2 : index
    %c0_116 = arith.constant 0 : index
    %c0_117 = arith.constant 0 : index
    %138 = vector.load %arg7[%c2, %c0_116, %c0_117] : memref<16x128x128xf32, #tpu.memory_space<vmem>>, vector<1x128x128xf32>
    %139 = vector.shape_cast %138 : vector<1x128x128xf32> to vector<128x128xf32>
    %cst_118 = arith.constant dense<0.000000e+00> : vector<1x128xf32>
    %140 = tpu.matmul %137, %139, %cst_118 {dimension_numbers = #tpu.dot_dimension_numbers<[1], [0], [0], [1], [0, 0, 1, 1], [], []>} : vector<1x128xf32>, vector<128x128xf32>, vector<1x128xf32> -> vector<1x128xf32>
    %141 = arith.addf %136, %140 : vector<1x128xf32>
    %142 = vector.extract_strided_slice %125 {offsets = [3, 0], sizes = [1, 128], strides = [1, 1]} : vector<16x128xf32> to vector<1x128xf32>
    %c3 = arith.constant 3 : index
    %c0_119 = arith.constant 0 : index
    %c0_120 = arith.constant 0 : index
    %143 = vector.load %arg7[%c3, %c0_119, %c0_120] : memref<16x128x128xf32, #tpu.memory_space<vmem>>, vector<1x128x128xf32>
    %144 = vector.shape_cast %143 : vector<1x128x128xf32> to vector<128x128xf32>
    %cst_121 = arith.constant dense<0.000000e+00> : vector<1x128xf32>
    %145 = tpu.matmul %142, %144, %cst_121 {dimension_numbers = #tpu.dot_dimension_numbers<[1], [0], [0], [1], [0, 0, 1, 1], [], []>} : vector<1x128xf32>, vector<128x128xf32>, vector<1x128xf32> -> vector<1x128xf32>
    %146 = arith.addf %141, %145 : vector<1x128xf32>
    %147 = vector.extract_strided_slice %125 {offsets = [4, 0], sizes = [1, 128], strides = [1, 1]} : vector<16x128xf32> to vector<1x128xf32>
    %c4 = arith.constant 4 : index
    %c0_122 = arith.constant 0 : index
    %c0_123 = arith.constant 0 : index
    %148 = vector.load %arg7[%c4, %c0_122, %c0_123] : memref<16x128x128xf32, #tpu.memory_space<vmem>>, vector<1x128x128xf32>
    %149 = vector.shape_cast %148 : vector<1x128x128xf32> to vector<128x128xf32>
    %cst_124 = arith.constant dense<0.000000e+00> : vector<1x128xf32>
    %150 = tpu.matmul %147, %149, %cst_124 {dimension_numbers = #tpu.dot_dimension_numbers<[1], [0], [0], [1], [0, 0, 1, 1], [], []>} : vector<1x128xf32>, vector<128x128xf32>, vector<1x128xf32> -> vector<1x128xf32>
    %151 = arith.addf %146, %150 : vector<1x128xf32>
    %152 = vector.extract_strided_slice %125 {offsets = [5, 0], sizes = [1, 128], strides = [1, 1]} : vector<16x128xf32> to vector<1x128xf32>
    %c5 = arith.constant 5 : index
    %c0_125 = arith.constant 0 : index
    %c0_126 = arith.constant 0 : index
    %153 = vector.load %arg7[%c5, %c0_125, %c0_126] : memref<16x128x128xf32, #tpu.memory_space<vmem>>, vector<1x128x128xf32>
    %154 = vector.shape_cast %153 : vector<1x128x128xf32> to vector<128x128xf32>
    %cst_127 = arith.constant dense<0.000000e+00> : vector<1x128xf32>
    %155 = tpu.matmul %152, %154, %cst_127 {dimension_numbers = #tpu.dot_dimension_numbers<[1], [0], [0], [1], [0, 0, 1, 1], [], []>} : vector<1x128xf32>, vector<128x128xf32>, vector<1x128xf32> -> vector<1x128xf32>
    %156 = arith.addf %151, %155 : vector<1x128xf32>
    %157 = vector.extract_strided_slice %125 {offsets = [6, 0], sizes = [1, 128], strides = [1, 1]} : vector<16x128xf32> to vector<1x128xf32>
    %c6 = arith.constant 6 : index
    %c0_128 = arith.constant 0 : index
    %c0_129 = arith.constant 0 : index
    %158 = vector.load %arg7[%c6, %c0_128, %c0_129] : memref<16x128x128xf32, #tpu.memory_space<vmem>>, vector<1x128x128xf32>
    %159 = vector.shape_cast %158 : vector<1x128x128xf32> to vector<128x128xf32>
    %cst_130 = arith.constant dense<0.000000e+00> : vector<1x128xf32>
    %160 = tpu.matmul %157, %159, %cst_130 {dimension_numbers = #tpu.dot_dimension_numbers<[1], [0], [0], [1], [0, 0, 1, 1], [], []>} : vector<1x128xf32>, vector<128x128xf32>, vector<1x128xf32> -> vector<1x128xf32>
    %161 = arith.addf %156, %160 : vector<1x128xf32>
    %162 = vector.extract_strided_slice %125 {offsets = [7, 0], sizes = [1, 128], strides = [1, 1]} : vector<16x128xf32> to vector<1x128xf32>
    %c7 = arith.constant 7 : index
    %c0_131 = arith.constant 0 : index
    %c0_132 = arith.constant 0 : index
    %163 = vector.load %arg7[%c7, %c0_131, %c0_132] : memref<16x128x128xf32, #tpu.memory_space<vmem>>, vector<1x128x128xf32>
    %164 = vector.shape_cast %163 : vector<1x128x128xf32> to vector<128x128xf32>
    %cst_133 = arith.constant dense<0.000000e+00> : vector<1x128xf32>
    %165 = tpu.matmul %162, %164, %cst_133 {dimension_numbers = #tpu.dot_dimension_numbers<[1], [0], [0], [1], [0, 0, 1, 1], [], []>} : vector<1x128xf32>, vector<128x128xf32>, vector<1x128xf32> -> vector<1x128xf32>
    %166 = arith.addf %161, %165 : vector<1x128xf32>
    %167 = vector.extract_strided_slice %125 {offsets = [8, 0], sizes = [1, 128], strides = [1, 1]} : vector<16x128xf32> to vector<1x128xf32>
    %c8_134 = arith.constant 8 : index
    %c0_135 = arith.constant 0 : index
    %c0_136 = arith.constant 0 : index
    %168 = vector.load %arg7[%c8_134, %c0_135, %c0_136] : memref<16x128x128xf32, #tpu.memory_space<vmem>>, vector<1x128x128xf32>
    %169 = vector.shape_cast %168 : vector<1x128x128xf32> to vector<128x128xf32>
    %cst_137 = arith.constant dense<0.000000e+00> : vector<1x128xf32>
    %170 = tpu.matmul %167, %169, %cst_137 {dimension_numbers = #tpu.dot_dimension_numbers<[1], [0], [0], [1], [0, 0, 1, 1], [], []>} : vector<1x128xf32>, vector<128x128xf32>, vector<1x128xf32> -> vector<1x128xf32>
    %171 = arith.addf %166, %170 : vector<1x128xf32>
    %172 = vector.extract_strided_slice %125 {offsets = [9, 0], sizes = [1, 128], strides = [1, 1]} : vector<16x128xf32> to vector<1x128xf32>
    %c9 = arith.constant 9 : index
    %c0_138 = arith.constant 0 : index
    %c0_139 = arith.constant 0 : index
    %173 = vector.load %arg7[%c9, %c0_138, %c0_139] : memref<16x128x128xf32, #tpu.memory_space<vmem>>, vector<1x128x128xf32>
    %174 = vector.shape_cast %173 : vector<1x128x128xf32> to vector<128x128xf32>
    %cst_140 = arith.constant dense<0.000000e+00> : vector<1x128xf32>
    %175 = tpu.matmul %172, %174, %cst_140 {dimension_numbers = #tpu.dot_dimension_numbers<[1], [0], [0], [1], [0, 0, 1, 1], [], []>} : vector<1x128xf32>, vector<128x128xf32>, vector<1x128xf32> -> vector<1x128xf32>
    %176 = arith.addf %171, %175 : vector<1x128xf32>
    %177 = vector.extract_strided_slice %125 {offsets = [10, 0], sizes = [1, 128], strides = [1, 1]} : vector<16x128xf32> to vector<1x128xf32>
    %c10 = arith.constant 10 : index
    %c0_141 = arith.constant 0 : index
    %c0_142 = arith.constant 0 : index
    %178 = vector.load %arg7[%c10, %c0_141, %c0_142] : memref<16x128x128xf32, #tpu.memory_space<vmem>>, vector<1x128x128xf32>
    %179 = vector.shape_cast %178 : vector<1x128x128xf32> to vector<128x128xf32>
    %cst_143 = arith.constant dense<0.000000e+00> : vector<1x128xf32>
    %180 = tpu.matmul %177, %179, %cst_143 {dimension_numbers = #tpu.dot_dimension_numbers<[1], [0], [0], [1], [0, 0, 1, 1], [], []>} : vector<1x128xf32>, vector<128x128xf32>, vector<1x128xf32> -> vector<1x128xf32>
    %181 = arith.addf %176, %180 : vector<1x128xf32>
    %182 = vector.extract_strided_slice %125 {offsets = [11, 0], sizes = [1, 128], strides = [1, 1]} : vector<16x128xf32> to vector<1x128xf32>
    %c11 = arith.constant 11 : index
    %c0_144 = arith.constant 0 : index
    %c0_145 = arith.constant 0 : index
    %183 = vector.load %arg7[%c11, %c0_144, %c0_145] : memref<16x128x128xf32, #tpu.memory_space<vmem>>, vector<1x128x128xf32>
    %184 = vector.shape_cast %183 : vector<1x128x128xf32> to vector<128x128xf32>
    %cst_146 = arith.constant dense<0.000000e+00> : vector<1x128xf32>
    %185 = tpu.matmul %182, %184, %cst_146 {dimension_numbers = #tpu.dot_dimension_numbers<[1], [0], [0], [1], [0, 0, 1, 1], [], []>} : vector<1x128xf32>, vector<128x128xf32>, vector<1x128xf32> -> vector<1x128xf32>
    %186 = arith.addf %181, %185 : vector<1x128xf32>
    %187 = vector.extract_strided_slice %125 {offsets = [12, 0], sizes = [1, 128], strides = [1, 1]} : vector<16x128xf32> to vector<1x128xf32>
    %c12 = arith.constant 12 : index
    %c0_147 = arith.constant 0 : index
    %c0_148 = arith.constant 0 : index
    %188 = vector.load %arg7[%c12, %c0_147, %c0_148] : memref<16x128x128xf32, #tpu.memory_space<vmem>>, vector<1x128x128xf32>
    %189 = vector.shape_cast %188 : vector<1x128x128xf32> to vector<128x128xf32>
    %cst_149 = arith.constant dense<0.000000e+00> : vector<1x128xf32>
    %190 = tpu.matmul %187, %189, %cst_149 {dimension_numbers = #tpu.dot_dimension_numbers<[1], [0], [0], [1], [0, 0, 1, 1], [], []>} : vector<1x128xf32>, vector<128x128xf32>, vector<1x128xf32> -> vector<1x128xf32>
    %191 = arith.addf %186, %190 : vector<1x128xf32>
    %192 = vector.extract_strided_slice %125 {offsets = [13, 0], sizes = [1, 128], strides = [1, 1]} : vector<16x128xf32> to vector<1x128xf32>
    %c13 = arith.constant 13 : index
    %c0_150 = arith.constant 0 : index
    %c0_151 = arith.constant 0 : index
    %193 = vector.load %arg7[%c13, %c0_150, %c0_151] : memref<16x128x128xf32, #tpu.memory_space<vmem>>, vector<1x128x128xf32>
    %194 = vector.shape_cast %193 : vector<1x128x128xf32> to vector<128x128xf32>
    %cst_152 = arith.constant dense<0.000000e+00> : vector<1x128xf32>
    %195 = tpu.matmul %192, %194, %cst_152 {dimension_numbers = #tpu.dot_dimension_numbers<[1], [0], [0], [1], [0, 0, 1, 1], [], []>} : vector<1x128xf32>, vector<128x128xf32>, vector<1x128xf32> -> vector<1x128xf32>
    %196 = arith.addf %191, %195 : vector<1x128xf32>
    %197 = vector.extract_strided_slice %125 {offsets = [14, 0], sizes = [1, 128], strides = [1, 1]} : vector<16x128xf32> to vector<1x128xf32>
    %c14 = arith.constant 14 : index
    %c0_153 = arith.constant 0 : index
    %c0_154 = arith.constant 0 : index
    %198 = vector.load %arg7[%c14, %c0_153, %c0_154] : memref<16x128x128xf32, #tpu.memory_space<vmem>>, vector<1x128x128xf32>
    %199 = vector.shape_cast %198 : vector<1x128x128xf32> to vector<128x128xf32>
    %cst_155 = arith.constant dense<0.000000e+00> : vector<1x128xf32>
    %200 = tpu.matmul %197, %199, %cst_155 {dimension_numbers = #tpu.dot_dimension_numbers<[1], [0], [0], [1], [0, 0, 1, 1], [], []>} : vector<1x128xf32>, vector<128x128xf32>, vector<1x128xf32> -> vector<1x128xf32>
    %201 = arith.addf %196, %200 : vector<1x128xf32>
    %202 = vector.extract_strided_slice %125 {offsets = [15, 0], sizes = [1, 128], strides = [1, 1]} : vector<16x128xf32> to vector<1x128xf32>
    %c15 = arith.constant 15 : index
    %c0_156 = arith.constant 0 : index
    %c0_157 = arith.constant 0 : index
    %203 = vector.load %arg7[%c15, %c0_156, %c0_157] : memref<16x128x128xf32, #tpu.memory_space<vmem>>, vector<1x128x128xf32>
    %204 = vector.shape_cast %203 : vector<1x128x128xf32> to vector<128x128xf32>
    %cst_158 = arith.constant dense<0.000000e+00> : vector<1x128xf32>
    %205 = tpu.matmul %202, %204, %cst_158 {dimension_numbers = #tpu.dot_dimension_numbers<[1], [0], [0], [1], [0, 0, 1, 1], [], []>} : vector<1x128xf32>, vector<128x128xf32>, vector<1x128xf32> -> vector<1x128xf32>
    %206 = arith.addf %201, %205 : vector<1x128xf32>
    %c0_159 = arith.constant 0 : index
    %c0_160 = arith.constant 0 : index
    %207 = vector.load %arg8[%c0_159, %c0_160] : memref<1x128xf32, #tpu.memory_space<vmem>>, vector<1x128xf32>
    %208 = arith.addf %206, %207 : vector<1x128xf32>
    %cst_161 = arith.constant 0.000000e+00 : f32
    %209 = vector.broadcast %cst_161 : f32 to vector<1x128xf32>
    %210 = arith.maximumf %208, %209 : vector<1x128xf32>
    %c0_162 = arith.constant 0 : index
    %c0_163 = arith.constant 0 : index
    %211 = vector.load %arg9[%c0_162, %c0_163] : memref<128x128xf32, #tpu.memory_space<vmem>>, vector<128x128xf32>
    %cst_164 = arith.constant dense<0.000000e+00> : vector<1x128xf32>
    %212 = tpu.matmul %210, %211, %cst_164 {dimension_numbers = #tpu.dot_dimension_numbers<[1], [0], [0], [1], [0, 0, 1, 1], [], []>} : vector<1x128xf32>, vector<128x128xf32>, vector<1x128xf32> -> vector<1x128xf32>
    %c0_165 = arith.constant 0 : index
    %c0_166 = arith.constant 0 : index
    %213 = vector.load %arg10[%c0_165, %c0_166] : memref<1x128xf32, #tpu.memory_space<vmem>>, vector<1x128xf32>
    %214 = arith.addf %212, %213 : vector<1x128xf32>
    %cst_167 = arith.constant 0.000000e+00 : f32
    %215 = vector.broadcast %cst_167 : f32 to vector<1x128xf32>
    %216 = arith.maximumf %214, %215 : vector<1x128xf32>
    %c0_168 = arith.constant 0 : index
    %c0_169 = arith.constant 0 : index
    %217 = vector.load %arg11[%c0_168, %c0_169] : memref<128x128xf32, #tpu.memory_space<vmem>>, vector<128x128xf32>
    %cst_170 = arith.constant dense<0.000000e+00> : vector<1x128xf32>
    %218 = tpu.matmul %216, %217, %cst_170 {dimension_numbers = #tpu.dot_dimension_numbers<[1], [0], [0], [1], [0, 0, 1, 1], [], []>} : vector<1x128xf32>, vector<128x128xf32>, vector<1x128xf32> -> vector<1x128xf32>
    %c0_171 = arith.constant 0 : index
    %c0_172 = arith.constant 0 : index
    %219 = vector.load %arg12[%c0_171, %c0_172] : memref<1x128xf32, #tpu.memory_space<vmem>>, vector<1x128xf32>
    %220 = arith.addf %218, %219 : vector<1x128xf32>
    %cst_173 = arith.constant 0.000000e+00 : f32
    %221 = vector.broadcast %cst_173 : f32 to vector<1x128xf32>
    %222 = arith.maximumf %220, %221 : vector<1x128xf32>
    %c0_174 = arith.constant 0 : index
    %c0_175 = arith.constant 0 : index
    %c0_176 = arith.constant 0 : index
    %223 = vector.load %arg13[%c0_174, %c0_175, %c0_176] : memref<1x1x128xf32, #tpu.memory_space<vmem>>, vector<1x1x128xf32>
    %224 = vector.shape_cast %223 : vector<1x1x128xf32> to vector<1x128xf32>
    %225 = vector.shape_cast %222 : vector<1x128xf32> to vector<1x1x128xf32>
    tpu.vector_store %arg13[%c0_174, %c0_175, %c0_176], %225 {strides = array<i32>} : memref<1x1x128xf32, #tpu.memory_space<vmem>>, vector<1x1x128xf32>,
    return
  }
  func.func @transform_0(%arg0: i32) -> (i32, i32, i32) {
    %c0_i32 = arith.constant 0 : i32
    %c0_i32_0 = arith.constant 0 : i32
    %c0_i32_1 = arith.constant 0 : i32
    return %arg0, %c0_i32, %c0_i32_0 : i32, i32, i32
  }
  func.func @transform_1(%arg0: i32) -> (i32, i32) {
    %c0_i32 = arith.constant 0 : i32
    %c0_i32_0 = arith.constant 0 : i32
    %c0_i32_1 = arith.constant 0 : i32
    return %c0_i32, %c0_i32_0 : i32, i32
  }
  func.func @transform_2(%arg0: i32) -> (i32, i32) {
    %c0_i32 = arith.constant 0 : i32
    %c0_i32_0 = arith.constant 0 : i32
    %c0_i32_1 = arith.constant 0 : i32
    return %c0_i32, %c0_i32_0 : i32, i32
  }
  func.func @transform_3(%arg0: i32) -> (i32, i32) {
    %c0_i32 = arith.constant 0 : i32
    %c0_i32_0 = arith.constant 0 : i32
    %c0_i32_1 = arith.constant 0 : i32
    return %c0_i32, %c0_i32_0 : i32, i32
  }
  func.func @transform_4(%arg0: i32) -> (i32, i32) {
    %c0_i32 = arith.constant 0 : i32
    %c0_i32_0 = arith.constant 0 : i32
    %c0_i32_1 = arith.constant 0 : i32
    return %c0_i32, %c0_i32_0 : i32, i32
  }
  func.func @transform_5(%arg0: i32) -> (i32, i32) {
    %c0_i32 = arith.constant 0 : i32
    %c0_i32_0 = arith.constant 0 : i32
    %c0_i32_1 = arith.constant 0 : i32
    return %c0_i32, %c0_i32_0 : i32, i32
  }
  func.func @transform_6(%arg0: i32) -> (i32, i32, i32) {
    %c0_i32 = arith.constant 0 : i32
    %c0_i32_0 = arith.constant 0 : i32
    %c0_i32_1 = arith.constant 0 : i32
    %c0_i32_2 = arith.constant 0 : i32
    return %c0_i32, %c0_i32_0, %c0_i32_1 : i32, i32, i32
  }
  func.func @transform_7(%arg0: i32) -> (i32, i32) {
    %c0_i32 = arith.constant 0 : i32
    %c0_i32_0 = arith.constant 0 : i32
    %c0_i32_1 = arith.constant 0 : i32
    return %c0_i32, %c0_i32_0 : i32, i32
  }
  func.func @transform_8(%arg0: i32) -> (i32, i32) {
    %c0_i32 = arith.constant 0 : i32
    %c0_i32_0 = arith.constant 0 : i32
    %c0_i32_1 = arith.constant 0 : i32
    return %c0_i32, %c0_i32_0 : i32, i32
  }
  func.func @transform_9(%arg0: i32) -> (i32, i32) {
    %c0_i32 = arith.constant 0 : i32
    %c0_i32_0 = arith.constant 0 : i32
    %c0_i32_1 = arith.constant 0 : i32
    return %c0_i32, %c0_i32_0 : i32, i32
  }
  func.func @transform_10(%arg0: i32) -> (i32, i32) {
    %c0_i32 = arith.constant 0 : i32
    %c0_i32_0 = arith.constant 0 : i32
    %c0_i32_1 = arith.constant 0 : i32
    return %c0_i32, %c0_i32_0 : i32, i32
  }
  func.func @transform_11(%arg0: i32) -> (i32, i32) {
    %c0_i32 = arith.constant 0 : i32
    %c0_i32_0 = arith.constant 0 : i32
    %c0_i32_1 = arith.constant 0 : i32
    return %c0_i32, %c0_i32_0 : i32, i32
  }
  func.func @transform_12(%arg0: i32) -> (i32, i32, i32) {
    %c0_i32 = arith.constant 0 : i32
    %c0_i32_0 = arith.constant 0 : i32
    %c0_i32_1 = arith.constant 0 : i32
    return %arg0, %c0_i32, %c0_i32_0 : i32, i32, i32
  }
}

</mosaic_0001>

<bundles_post_ra>
// kernel: convnn_forward.1
= control target key start
LH: loop header
LB: loop body
LE: loop exit
PB: predicated region body
PF: predicated region fallthrough
CT: control target
= control target key end

     0   :  { %s7987_s0 = inlined_call_operand.vmem [shape: f32[2,8,1024], index: 0, kind: input, shape index: {}]   ;;  %s7988_s1 = inlined_call_operand.vmem [shape: f32[8,200], index: 1, kind: input, shape index: {}]   ;;  %s7989_s2 = inlined_call_operand.vmem [shape: f32[8,1], index: 2, kind: input, shape index: {}]   ;;  %s7990_s3 = inlined_call_operand.vmem [shape: f32[16,200], index: 3, kind: input, shape index: {}]   ;;  %s7991_s4 = inlined_call_operand.vmem [shape: f32[16,1], index: 4, kind: input, shape index: {}]   ;;  %s7992_s5 = inlined_call_operand.vmem [shape: f32[1024,128], index: 5, kind: input, shape index: {}]   ;;  %s7993_s6 = inlined_call_operand.hbm [shape: f32[16,128,128], index: 6, kind: input, shape index: {}]   ;;  %s7994_s7 = inlined_call_operand.vmem [shape: f32[1,128], index: 7, kind: input, shape index: {}]   ;;  %s7995_s8 = inlined_call_operand.vmem [shape: f32[128,128], index: 8, kind: input, shape index: {}]   ;;  %s7996_s9 = inlined_call_operand.vmem [shape: f32[1,128], index: 9, kind: input, shape index: {}]   ;;  %s7997_s10 = inlined_call_operand.vmem [shape: f32[128,128], index: 10, kind: input, shape index: {}]   ;;  %s7998_s11 = inlined_call_operand.vmem [shape: f32[1,128], index: 11, kind: input, shape index: {}]   ;;  %s7999_s12 = inlined_call_operand.hbm [shape: f32[2,1,128], index: 12, kind: output, shape index: {}]  }
   0x1   :  { %8175 = sst [smem:[#allocation26_spill]] %s7987_s0 }
   0x2   :  { %8176 = sst [smem:[#allocation27_spill]] %s7993_s6 }
   0x3   :  { %17 = vsyncpa [#allocation5], 0 }
   0x4   :  { %18 = vsyncpa [#allocation6], 0 }
   0x5   :  { %20 = vsyncpa [#allocation6 + $0x1], 0  ;;  %s4804_s21 = smov 0   ;;  %s4806_s22 = smov 0  }
   0x6   :  { %s4808_s23 = smov 0   ;;  %s4810_s24 = smov 0  }
   0x7 LB: > { %8177 = sst [smem:[#allocation10_spill]] %s4698_s21  ;;  %s4825_s25 = sadd.s32 4294967295, %s4710_s24   ;;  %s4710_s24 = sphi %s4810_s24, %s8456_s24   ;;  %s4706_s23 = sphi %s4808_s23, %s8458_s23   ;;  %s4702_s22 = sphi %s4806_s22, %s8460_s22   ;;  %s4698_s21 = sphi %s4804_s21, %s8459_s21  }
   0x8   : > { %8178 = sst [smem:[#allocation11_spill]] %s4706_s23  ;;  %s4002_s26 = sadd.s32 4294967294, %s4710_s24  }
   0x9   : > { %s4829_s27 = sadd.s32 1, %s4710_s24   ;;  %s290_s28 = sadd.s32 1, %s4706_s23 }
   0xa   : > { %8179 = sst [smem:[#allocation12_spill]] %s4829_s27  ;;  %s287_s29 = ssub.s32 %s4710_s24, %s4829_s27 }
   0xb   : > { %p300_p0 = scmp.ne.s32.totalorder %s4706_s23, %s4702_s22  ;;  %p288_p1 = scmp.eq.s32.totalorder %s287_s29, 0 }
   0xc   : > { %p301_p2 = scmp.eq.s32.totalorder %s4825_s25, 1  ;;  %p306_p3 = scmp.ne.s32.totalorder %s4702_s22, %s4698_s21 }
   0xd   : > { %p307_p4 = scmp.eq.s32.totalorder %s4002_s26, 1  ;;  %p4003_p7 = scmp.ge.s32.totalorder %s4710_s24, 1 }
   0xe   : > { %s4840_s30 = scalar_select %p288_p1, %s4706_s23, %s290_s28  }
   0xf   : > { %p4842_p5 = por %p301_p2, %p300_p0  ;;  %p4846_p6 = por %p307_p4, %p306_p3 }
  0x10   : > { %8180 = sst [smem:[#allocation13_spill]] %s4840_s30  ;;  %p314_p8 = scmp.lt.s32.totalorder %s4710_s24, 3 }
  0x11   : > { %s8182_s14 = scalar_select %p4846_p6, 1, 0 }
  0x12   : > { %p4051_p9 = scmp.eq.s32.totalorder %s4825_s25, 0  ;;  %p315_p10 = pnand %p4003_p7, %p314_p8 }
  0x13   : > { %8183 = sst [smem:[#allocation14_spill]] %s8182_s14  ;;  %s4712_s18 = smov [#allocation4]  }
  0x14   : > { %s8184_s6 = sld [smem:[#allocation27_spill]]  ;;  %p4043_p11 = pneg %p315_p10 }
  0x15   : > { %s342_s19 = sshll.u32 %s4712_s18, 4  ;;  %s4713_s20 = smov 128   ;;  %s343_s19 = int_to_ptr.vmem [resolvable:$true] %s342_s19 }
  0x16   : > { %p4044_p12 = pnand %p4051_p9, %p4043_p11  ;;  %s4714_s26 = smov 8  }
  0x17   : > { %381 = sbr.rel (%p315_p10) target bundleno = 1994 (0x7ca), region = 68 }
  0x1a   : > { %s340_s17 = sshll.u32 %s8184_s6, 4  ;;  %s341_s17 = int_to_ptr.hbm [resolvable:$true] %s340_s17 }
  0x1b   : > { %4046 = dma.hbm_to_vmem [thread:$0]  (!%p4044_p12), %s341_s17, 32768, %s343_s19, [#allocation5], %s4713_s20, %s4713_s20, %s4714_s26  }
  0x1c   : > { %4689 = dma.done.wait (%p4051_p9), [#allocation5], 32768  }
  0x1d   : > { %4691 = vsyncadd (%p4051_p9), [#allocation5], 4294934528  ;;  %p423_p13 = scmp.lt.s32.totalorder %s4825_s25, 1  ;;  %s8185_s0 = sld [smem:[#allocation26_spill]]  ;;  %v460_v12 = vlaneseq  ;;  %vm8133_vm14 = vcmask 588800  }
  0x1e   : > { %s8008_s17 = smov 124   ;;  %s8002_s19 = smov 61  }
  0x1f   : > { %s424_s28 = scalar_select %p423_p13, %s4825_s25, 1  ;;  %v4931_v13 = vand.u32 127, %v460_v12 }
  0x20   : > { %s4717_s20 = smov 32   ;;  %s8000_s26 = smov 63  }
  0x21   : > { %s4036_s29 = sshll.u32 %s424_s28, 6  ;;  %s8004_s28 = smov 62   ;;  %vm561_vm0 = vcmp.lt.s32.totalorder %v4931_v13, 124  ;;  %vm528_vm1 = vcmp.lt.s32.totalorder %v4931_v13, 125  ;;  %vm495_vm2 = vcmp.lt.s32.totalorder %v4931_v13, 126  ;;  %vm8088_vm3 = vcmp.lt.s32.totalorder %v4931_v13, 127 }
  0x22   : > { %s8012_s15 = smov 64   ;;  %s8010_s16 = smov 125   ;;  %vm8093_vm4 = vcmp.lt.s32.totalorder %v4931_v13, 28  ;;  %vm8065_vm5 = vcmp.lt.s32.totalorder %v4931_v13, 29  ;;  %vm990_vm6 = vcmp.lt.s32.totalorder %v4931_v13, 30  ;;  %vm957_vm7 = vcmp.lt.s32.totalorder %v4931_v13, 31 }
  0x23   : > { %s4867_s18 = scalar_lea.vmem %s8185_s0, %s4036_s29  ;;  %s8006_s29 = smov 60   ;;  %vm8062_vm8 = vcmp.lt.s32.totalorder %v4931_v13, 32  ;;  %vm8064_vm9 = vcmp.lt.s32.totalorder %v4931_v13, 60  ;;  %vm858_vm10 = vcmp.lt.s32.totalorder %v4931_v13, 61  ;;  %vm825_vm11 = vcmp.lt.s32.totalorder %v4931_v13, 62 }
  0x24   : > { %v4870_v0 = vld [vmem:[%s4867_s18 + $0x8] sm:$0xff]  ;;  %v4873_v1 = vld [vmem:[%s4867_s18 + $0x10] sm:$0xff]  ;;  %v4884_v3 = vld [vmem:[%s4867_s18 + $0x18] sm:$0xff]  ;;  %s8193_s0 = smov 94   ;;  %s8195_s6 = smov 95   ;;  %vm792_vm12 = vcmp.lt.s32.totalorder %v4931_v13, 63 }
  0x25   : > { %v4133_v2 = vpack.i.bf16 %v4873_v1, %v4870_v0  ;;  %v432_v4 = vld [vmem:[%s4867_s18 + $0x20] sm:$0xff]  ;;  %v4223_v8 = vpack.i.bf16 %v4884_v3, %v4873_v1  ;;  %v433_v10 = vld [vmem:[%s4867_s18 + $0x28] sm:$0xff]  ;;  %v4935_v14 = vld [vmem:[%s4867_s18 + $0x30] sm:$0xff]  ;;  %s8197_s30 = smov 125   ;;  %s8199_s23 = smov 126   ;;  %vm759_vm13 = vcmp.lt.s32.totalorder %v4931_v13, 64 }
  0x26   : > { %v4148_v5 = vpack.i.bf16 %v432_v4, %v4884_v3  ;;  %v4898_v6 = vld [vmem:[%s4867_s18] sm:$0xff]  ;;  %v4922_v11 = vpack.i.bf16 %v433_v10, %v432_v4  ;;  %v4938_v15 = vld [vmem:[%s4867_s18 + $0x38] sm:$0xff]  ;;  %s8204_s27 = smov 28   ;;  %s8205_s21 = smov 29   ;;  %vm726_vm15 = vcmp.lt.s32.totalorder %v4931_v13, 92 }
  0x27   : > { %4134 = vrot.lane.b32.xlu2 %v4133_v2, %s8008_s17  ;;  %4124 = vrot.lane.b32.xlu1 %v4133_v2, %s8002_s19  ;;  %s8014_s19 = smov 126   ;;  %v4198_v7 = vpack.i.bf16 %v4870_v0, %v4898_v6  ;;  %v4218_v9 = vpack.i.bf16 %v4884_v3, %v4898_v6  ;;  %v4947_v19 = vpack.i.bf16 %v4938_v15, %v4935_v14  ;;  %s8206_s14 = smov 30  }
  0x28   : > { %4114 = vrot.lane.b32.xlu0 %v4133_v2, %s4717_s20  ;;  %v4333_v23 = vpack.i.bf16 %v4898_v6, %v433_v10 }
  0x2f   : > { %4139 = vrot.lane.b32.xlu2 %v4133_v2, %s8000_s26  ;;  %4129 = vrot.lane.b32.xlu1 %v4133_v2, %s8004_s28  ;;  %s8026_s26 = smov 92   ;;  %s8016_s28 = smov 93  }
  0x30   : > { %4119 = vrot.lane.b32.xlu0 %v4133_v2, %s8006_s29  ;;  %s8020_s29 = smov 127  }
  0x37   : > { %4154 = vrot.lane.b32.xlu2 %v4133_v2, %s8012_s15  ;;  %4149 = vrot.lane.b32.xlu1 %v4148_v5, %s8008_s17  ;;  %s8018_s17 = smov 94   ;;  %s8030_s15 = smov 29  }
  0x38   : > { %4144 = vrot.lane.b32.xlu0 %v4133_v2, %s8010_s16 }
  0x3f   : > { %4169 = vrot.lane.b32.xlu2 %v4133_v2, %s8026_s26  ;;  %4164 = vrot.lane.b32.xlu1 %v4148_v5, %s8010_s16  ;;  %s8028_s16 = smov 28   ;;  %s8188_s26 = smov 61  }
  0x40   : > { %4159 = vrot.lane.b32.xlu0 %v4133_v2, %s8014_s19 }
  0x47   : > { %4184 = vrot.lane.b32.xlu2 %v4133_v2, %s8016_s28  ;;  %4179 = vrot.lane.b32.xlu1 %v4148_v5, %s8014_s19  ;;  %s8022_s19 = smov 96   ;;  %s8024_s28 = smov 95  }
  0x48   : > { %4174 = vrot.lane.b32.xlu0 %v4133_v2, %s8020_s29 }
  0x4f   : > { %4194 = vrot.lane.b32.xlu1 %v4133_v2, %s8018_s17  ;;  %4199 = vrot.lane.b32.xlu2 %v4198_v7, %s8028_s16  ;;  %s8032_s17 = smov 30  }
  0x50   : > { %4189 = vrot.lane.b32.xlu0 %v4148_v5, %s8020_s29  ;;  %s8034_s29 = smov 31  }
  0x57   : > { %4209 = vrot.lane.b32.xlu1 %v4198_v7, %s8030_s15  ;;  %4214 = vrot.lane.b32.xlu2 %v4133_v2, %s8022_s19  ;;  %s8186_s19 = smov 60  }
  0x58   : > { %4204 = vrot.lane.b32.xlu0 %v4133_v2, %s8024_s28  ;;  %s8187_s28 = smov 62  }
  0x5f   : > { %4224 = vrot.lane.b32.xlu1 %v4223_v8, %s8028_s16  ;;  %4229 = vrot.lane.b32.xlu2 %v4198_v7, %s8032_s17  ;;  %s8189_s16 = smov 63  }
  0x60   : > { %4219 = vrot.lane.b32.xlu0 %v4218_v9, %s4717_s20 }
  0x67   : > { %4239 = vrot.lane.b32.xlu1 %v4223_v8, %s8030_s15  ;;  %4244 = vrot.lane.b32.xlu2 %v4198_v7, %s8034_s29  ;;  %s8190_s15 = smov 92  }
  0x68   : > { %4234 = vrot.lane.b32.xlu0 %v4218_v9, %s8186_s19 }
  0x6f   : > { %4254 = vrot.lane.b32.xlu1 %v4223_v8, %s8032_s17  ;;  %4259 = vrot.lane.b32.xlu2 %v4218_v9, %s8187_s28  ;;  %s8191_s17 = smov 64  }
  0x70   : > { %4249 = vrot.lane.b32.xlu0 %v4218_v9, %s8188_s26 }
  0x77   : > { %4269 = vrot.lane.b32.xlu1 %v4218_v9, %s8189_s16  ;;  %4274 = vrot.lane.b32.xlu2 %v4922_v11, %s4717_s20 }
  0x78   : > { %4264 = vrot.lane.b32.xlu0 %v4223_v8, %s8034_s29  ;;  %s8192_s29 = smov 93  }
  0x7f   : > { %4284 = vrot.lane.b32.xlu1 %v4922_v11, %s8186_s19  ;;  %4289 = vrot.lane.b32.xlu2 %v4218_v9, %s8190_s15 }
  0x80   : > { %4279 = vrot.lane.b32.xlu0 %v4218_v9, %s8191_s17 }
  0x81   : > { %v4940_v16 = vpop.permute.xlu2 %4134 }
  0x82   : > { %v4137_v17 = vunpack.i.h.bf16 %v4940_v16  ;;  %v8046_v18 = vunpack.i.l.bf16 %v4940_v16 }
  0x84   : > { %v4953_v20 = vsel %vm561_vm0, %v8046_v18, %v4137_v17 }
  0x85   : > { %1346 = vmatpush.msra.mxu2 %v4953_v20 }
  0x87   : > { %4299 = vrot.lane.b32.xlu1 %v4947_v19, %s4717_s20  ;;  %4304 = vrot.lane.b32.xlu2 %v4218_v9, %s8192_s29  ;;  %s8194_s20 = smov 124  }
  0x88   : > { %4294 = vrot.lane.b32.xlu0 %v4922_v11, %s8188_s26 }
  0x89   : > { %v4961_v21 = vpop.permute.xlu2 %4139 }
  0x8f   : > { %4314 = vrot.lane.b32.xlu1 %v4947_v19, %s8186_s19  ;;  %4319 = vrot.lane.b32.xlu2 %v4218_v9, %s8193_s0 }
  0x90   : > { %4309 = vrot.lane.b32.xlu0 %v4922_v11, %s8187_s28 }
  0x91   : > { %v4968_v22 = vpop.permute.xlu2 %4154 }
  0x97   : > { %4329 = vrot.lane.b32.xlu1 %v4947_v19, %s8188_s26  ;;  %4334 = vrot.lane.b32.xlu2 %v4333_v23, %s8194_s20  ;;  %s8196_s26 = smov 96  }
  0x98   : > { %4324 = vrot.lane.b32.xlu0 %v4922_v11, %s8189_s16 }
  0x99   : > { %v4976_v24 = vpop.permute.xlu2 %4169  ;;  %v4978_v25 = vpop.permute.xlu1 %4124 }
  0x9a   : > { %v4980_v26 = vpop.permute.xlu0 %4114 }
  0x9f   : > { %4344 = vrot.lane.b32.xlu1 %v4922_v11, %s8191_s17  ;;  %4349 = vrot.lane.b32.xlu2 %v4947_v19, %s8187_s28 }
  0xa0   : > { %4339 = vrot.lane.b32.xlu0 %v4218_v9, %s8195_s6 }
  0xa1   : > { %v4987_v27 = vpop.permute.xlu2 %4184  ;;  %v4989_v28 = vpop.permute.xlu1 %4129 }
  0xa2   : > { %v4991_v29 = vpop.permute.xlu0 %4119 }
  0xa7   : > { %4359 = vrot.lane.b32.xlu1 %v4218_v9, %s8196_s26  ;;  %4364 = vrot.lane.b32.xlu2 %v4922_v11, %s8190_s15 }
  0xa8   : > { %4354 = vrot.lane.b32.xlu0 %v4333_v23, %s8197_s30 }
  0xa9   : > { %v4997_v30 = vpop.permute.xlu1 %4149  ;;  %v4999_v31 = vpop.permute.xlu2 %4199 }
  0xaa   : > { %8198 = vst [vmem:[#allocation15_spill] sm:$0xff] %v4999_v31  ;;  %v8050_v32 = vunpack.i.l.bf16 %v4997_v30  ;;  %v5002_v33 = vpop.permute.xlu0 %4144  ;;  %v4202_v50 = vunpack.i.h.bf16 %v4999_v31  ;;  %v8042_v51 = vunpack.i.l.bf16 %v4999_v31 }
  0xab   : > { %v4147_v34 = vunpack.i.h.bf16 %v5002_v33  ;;  %v8045_v35 = vunpack.i.l.bf16 %v5002_v33 }
  0xac   : > { %v5011_v36 = vsel %vm561_vm0, %v4137_v17, %v8050_v32  ;;  %v1063_v56 = vsel %vm8093_vm4, %v8042_v51, %v4202_v50  ;;  %v4117_v17 = vunpack.i.h.bf16 %v4980_v26  ;;  %v4126_v51 = vunpack.i.l.bf16 %v4978_v25 }
  0xad   : > { %v5017_v37 = vsel %vm528_vm1, %v8045_v35, %v4147_v34  ;;  %1386 = vmatpush.msra.mxu3 %v5011_v36  ;;  %v8061_v35 = vunpack.i.h.bf16 %v4989_v28  ;;  %v8060_v32 = vunpack.i.l.bf16 %v4968_v22 }
  0xae   : > { %1347 = vmatpush.msra.mxu2 %v5017_v37 }
  0xaf   : > { %4374 = vrot.lane.b32.xlu1 %v4333_v23, %s8199_s23  ;;  %4379 = vrot.lane.b32.xlu2 %v4922_v11, %s8192_s29 }
  0xb0   : > { %4369 = vrot.lane.b32.xlu0 %v4947_v19, %s8189_s16  ;;  %s8200_s16 = smov 127  }
  0xb1   : > { %v5026_v38 = vpop.permute.xlu1 %4164  ;;  %v5028_v39 = vpop.permute.xlu2 %4214 }
  0xb2   : > { %v8049_v40 = vunpack.i.l.bf16 %v5026_v38  ;;  %v5031_v41 = vpop.permute.xlu0 %4159 }
  0xb3   : > { %v4162_v42 = vunpack.i.h.bf16 %v5031_v41  ;;  %v8044_v43 = vunpack.i.l.bf16 %v5031_v41 }
  0xb4   : > { %v5040_v44 = vsel %vm528_vm1, %v4147_v34, %v8049_v40 }
  0xb5   : > { %v5046_v45 = vsel %vm495_vm2, %v8044_v43, %v4162_v42  ;;  %1387 = vmatpush.msra.mxu3 %v5040_v44 }
  0xb6   : > { %1348 = vmatpush.msra.mxu2 %v5046_v45 }
  0xb7   : > { %4384 = vrot.lane.b32.xlu1 %v4333_v23, %s8200_s16  ;;  %4389 = vrot.lane.b32.xlu2 %v4922_v11, %s8193_s0  ;;  %v4116_v23 = vunpack.i.l.bf16 %v4980_v26  ;;  %v8057_v26 = vunpack.i.h.bf16 %v4961_v21 }
  0xb8   : > { %755 = vrot.lane.b32.xlu0 %v4935_v14, %s8191_s17 }
  0xb9   : > { %v5055_v46 = vpop.permute.xlu1 %4179  ;;  %v5057_v47 = vpop.permute.xlu2 %4229  ;;  %v930_v43 = vsel %vm8062_vm8, %v4116_v23, %v4117_v17 }
  0xba   : > { %8201 = vst [vmem:[#allocation16_spill] sm:$0xff] %v5057_v47  ;;  %v8048_v48 = vunpack.i.l.bf16 %v5055_v46  ;;  %v5060_v49 = vpop.permute.xlu0 %4174  ;;  %v4232_v62 = vunpack.i.h.bf16 %v5057_v47  ;;  %v8039_v63 = vunpack.i.l.bf16 %v5057_v47 }
  0xbb   : > { %v4177_v52 = vunpack.i.h.bf16 %v5060_v49  ;;  %v8043_v53 = vunpack.i.l.bf16 %v5060_v49 }
  0xbc   : > { %v5071_v54 = vsel %vm495_vm2, %v4162_v42, %v8048_v48  ;;  %v997_v12 = vsel %vm990_vm6, %v8039_v63, %v4232_v62  ;;  %v4122_v42 = vunpack.i.h.bf16 %v4991_v29  ;;  %v8063_v48 = vunpack.i.l.bf16 %v4989_v28 }
  0xbd   : > { %v5078_v55 = vsel %vm8088_vm3, %v8043_v53, %v4177_v52  ;;  %1388 = vmatpush.msra.mxu3 %v5071_v54 }
  0xbe   : > { %1349 = vmatpush.msra.mxu2 %v5078_v55 }
  0xbf   : > { %4394 = vrot.lane.b32.xlu1 %v4922_v11, %s8195_s6  ;;  %689 = vrot.lane.b32.xlu2 %v4935_v14, %s8192_s29 }
  0xc0   : > { %722 = vrot.lane.b32.xlu0 %v4935_v14, %s8190_s15  ;;  %1350 = vmatpush.msra.mxu2 %v4870_v0 }
  0xc1   : > { %v5095_v57 = vpop.permute.xlu1 %4194  ;;  %v5097_v58 = vpop.permute.xlu2 %4244 }
  0xc2   : > { %8202 = vst [vmem:[#allocation17_spill] sm:$0xff] %v5097_v58  ;;  %v5099_v59 = vpop.permute.xlu0 %4189  ;;  %1351 = vmatpush.msra.mxu2 %v1063_v56  ;;  %v8040_v9 = vunpack.i.l.bf16 %v5097_v58  ;;  %v8058_v56 = vunpack.i.l.bf16 %v4961_v21 }
  0xc3   : > { %v8047_v60 = vunpack.i.l.bf16 %v5099_v59 }
  0xc5   : > { %v5106_v61 = vsel %vm8088_vm3, %v4177_v52, %v8047_v60  ;;  %v4121_v52 = vunpack.i.l.bf16 %v4991_v29 }
  0xc6   : > { %1389 = vmatpush.msra.mxu3 %v5106_v61 }
  0xc7   : > { %4404 = vrot.lane.b32.xlu1 %v4922_v11, %s8196_s26  ;;  %656 = vrot.lane.b32.xlu2 %v4935_v14, %s8193_s0  ;;  %v897_v40 = vsel %vm8064_vm9, %v4121_v52, %v4122_v42 }
  0xc8   : > { %4399 = vrot.lane.b32.xlu0 %v4947_v19, %s8194_s20  ;;  %1390 = vmatpush.msra.mxu3 %v4873_v1  ;;  %v8051_v1 = vunpack.i.h.bf16 %v5097_v58 }
  0xc9   : > { %v5118_v2 = vpop.permute.xlu1 %4209  ;;  %v5120_v4 = vpop.permute.xlu2 %4259 }
  0xca   : > { %8203 = vst [vmem:[#allocation18_spill] sm:$0xff] %v5118_v2  ;;  %v5123_v5 = vpop.permute.xlu0 %4204  ;;  %v4212_v7 = vunpack.i.h.bf16 %v5118_v2  ;;  %v8041_v8 = vunpack.i.l.bf16 %v5118_v2  ;;  %v964_v34 = vsel %vm957_vm7, %v8040_v9, %v8051_v1 }
  0xcb   : > { %v8073_v29 = vunpack.i.h.bf16 %v5123_v5 }
  0xcc   : > { %v1030_v10 = vsel %vm8065_vm5, %v8041_v8, %v4212_v7  ;;  %v4127_v8 = vunpack.i.h.bf16 %v4978_v25  ;;  %v8208_v25 = vunpack.i.l.bf16 %v4989_v28 }
  0xcd   : > { %1352 = vmatpush.msra.mxu2 %v1030_v10  ;;  %v8059_v10 = vunpack.i.h.bf16 %v4968_v22 }
  0xcf   : > { %4414 = vrot.lane.b32.xlu1 %v4947_v19, %s8197_s30  ;;  %623 = vrot.lane.b32.xlu2 %v4935_v14, %s8195_s6  ;;  %s8207_s30 = smov 31  }
  0xd0   : > { %4409 = vrot.lane.b32.xlu0 %v4922_v11, %s8204_s27  ;;  %1353 = vmatpush.msra.mxu2 %v997_v12 }
  0xd1   : > { %v5164_v63 = vpop.permute.xlu1 %4224  ;;  %v5166_v9 = vpop.permute.xlu2 %4274 }
  0xd2   : > { %v5171_v53 = vpop.permute.xlu0 %4219  ;;  %v8056_v12 = vunpack.i.l.bf16 %v5164_v63  ;;  %1354 = vmatpush.msra.mxu2 %v964_v34 }
  0xd3   : > { %v8054_v18 = vunpack.i.h.bf16 %v5171_v53  ;;  %v8055_v60 = vunpack.i.l.bf16 %v5171_v53 }
  0xd4   : > { %1359 = vmatpush.msrb.mxu2 %v930_v43  ;;  %v1062_v34 = vsel %vm8093_vm4, %v4202_v50, %v8056_v12  ;;  %v5213_v50 = vld [vmem:[%s7988_s1 + $0x8] sm:$0xff]  ;;  %v8070_v12 = vunpack.i.h.bf16 %v4987_v27 }
  0xd5   : > { %v931_v43 = vsel %vm8062_vm8, %v8055_v60, %v4116_v23  ;;  %1391 = vmatpush.msra.mxu3 %v1062_v34  ;;  %v929_v1 = vsel %vm8062_vm8, %v4117_v17, %v8054_v18  ;;  %v798_v34 = vsel %vm792_vm12, %v8058_v56, %v8057_v26  ;;  %4010 = vmatmul.msk.f32.vlgmr.msra.gmra.mxu2 %vm8133_vm14, %v5213_v50  ;;  %vm8068_vm8 = vcmp.lt.s32.totalorder %v4931_v13, 93 }
  0xd6   : > { %1360 = vmatpush.msrb.mxu2 %v897_v40  ;;  %1319 = vmatpush.msra.mxu0 %v931_v43  ;;  %v864_v40 = vsel %vm858_vm10, %v4126_v51, %v4127_v8  ;;  %v765_v43 = vsel %vm759_vm13, %v8060_v32, %v8059_v10  ;;  %v8071_v10 = vunpack.i.l.bf16 %v4987_v27 }
  0xd7   : > { %1399 = vmatpush.msra.mxu1 %v929_v1  ;;  %4424 = vrot.lane.b32.xlu1 %v4947_v19, %s8199_s23  ;;  %v831_v1 = vsel %vm825_vm11, %v8063_v48, %v8061_v35  ;;  %v8072_v48 = vunpack.i.h.bf16 %v5095_v57 }
  0xd8   : > { %1361 = vmatpush.msrb.mxu2 %v864_v40  ;;  %4419 = vrot.lane.b32.xlu0 %v4922_v11, %s8205_s21  ;;  %v4172_v40 = vunpack.i.h.bf16 %v4976_v24 }
  0xd9   : > { %590 = vrot.lane.b32.xlu2 %v4935_v14, %s8196_s26  ;;  %v5225_v17 = vpop.permute.xlu1 %4239  ;;  %v5227_v23 = vpop.permute.xlu2 %4289 }
  0xda   : > { %1362 = vmatpush.msrb.mxu2 %v831_v1  ;;  %v4171_v1 = vunpack.i.l.bf16 %v4976_v24  ;;  %v5243_v18 = vpop.permute.xlu0 %4234  ;;  %v8069_v60 = vunpack.i.l.bf16 %v5225_v17 }
  0xdb   : > { %v8066_v26 = vunpack.i.h.bf16 %v5243_v18  ;;  %v8067_v56 = vunpack.i.l.bf16 %v5243_v18 }
  0xdc   : > { %1363 = vmatpush.msrb.mxu2 %v798_v34  ;;  %v1029_v32 = vsel %vm8065_vm5, %v4212_v7, %v8069_v60  ;;  %v4196_v7 = vunpack.i.l.bf16 %v5095_v57  ;;  %vm627_vm5 = vcmp.lt.s32.totalorder %v4931_v13, 95  ;;  %v8075_v60 = vunpack.i.h.bf16 %v5120_v4 }
  0xdd   : > { %v898_v35 = vsel %vm8064_vm9, %v8067_v56, %v4121_v52  ;;  %1392 = vmatpush.msra.mxu3 %v1029_v32  ;;  %v896_v34 = vsel %vm8064_vm9, %v4122_v42, %v8066_v26  ;;  %v732_v32 = vsel %vm726_vm15, %v4171_v1, %v4172_v40  ;;  %vm660_vm9 = vcmp.lt.s32.totalorder %v4931_v13, 94 }
  0xde   : > { %1364 = vmatpush.msrb.mxu2 %v765_v43  ;;  %1320 = vmatpush.msra.mxu0 %v898_v35  ;;  %v8082_v42 = vunpack.i.l.bf16 %v5123_v5  ;;  %v699_v35 = vsel %vm8068_vm8, %v8071_v10, %v8070_v12  ;;  %v8076_v43 = vunpack.i.h.bf16 %v5028_v39  ;;  %vm594_vm8 = vcmp.lt.s32.totalorder %v4931_v13, 96 }
  0xdf   : > { %1400 = vmatpush.msra.mxu1 %v896_v34  ;;  %4434 = vrot.lane.b32.xlu1 %v4947_v19, %s8200_s16  ;;  %v8077_v34 = vunpack.i.l.bf16 %v5028_v39  ;;  %v8087_v12 = vunpack.i.l.bf16 %v5120_v4 }
  0xe0   : > { %1365 = vmatpush.msrb.mxu2 %v732_v32  ;;  %4429 = vrot.lane.b32.xlu0 %v4922_v11, %s8206_s14  ;;  %v633_v10 = vsel %vm627_vm5, %v8082_v42, %v8073_v29 }
  0xe1   : > { %4439 = vrot.lane.b32.xlu2 %v4922_v11, %s8207_s30  ;;  %v5293_v19 = vpop.permute.xlu1 %4254  ;;  %v5295_v52 = vpop.permute.xlu2 %4304 }
  0xe2   : > { %1366 = vmatpush.msrb.mxu2 %v699_v35  ;;  %v5300_v32 = vpop.permute.xlu0 %4249  ;;  %v8095_v11 = vunpack.i.l.bf16 %v5293_v19  ;;  %v666_v35 = vsel %vm660_vm9, %v4196_v7, %v8072_v48  ;;  %v8097_v42 = vunpack.i.l.bf16 %v5295_v52 }
  0xe3   : > { %v8074_v26 = vunpack.i.h.bf16 %v5300_v32  ;;  %v8083_v56 = vunpack.i.l.bf16 %v5300_v32 }
  0xe4   : > { %1367 = vmatpush.msrb.mxu2 %v666_v35  ;;  %v996_v35 = vsel %vm990_vm6, %v4232_v62, %v8095_v11  ;;  %v600_v62 = vsel %vm594_vm8, %v8077_v34, %v8076_v43  ;;  %v8212_v43 = vunpack.i.h.bf16 %v5097_v58  ;;  %v8080_v34 = vunpack.i.h.bf16 %v5055_v46 }
  0xe5   : > { %v865_v48 = vsel %vm858_vm10, %v8083_v56, %v4126_v51  ;;  %1393 = vmatpush.msra.mxu3 %v996_v35  ;;  %v863_v29 = vsel %vm858_vm10, %v4127_v8, %v8074_v26  ;;  %v8209_v51 = vunpack.i.h.bf16 %v4989_v28  ;;  %v4152_v35 = vunpack.i.h.bf16 %v4997_v30 }
  0xe6   : > { %1368 = vmatpush.msrb.mxu2 %v633_v10  ;;  %1321 = vmatpush.msra.mxu0 %v865_v48  ;;  %v832_v48 = vsel %vm825_vm11, %v8087_v12, %v8208_v25  ;;  %v8217_v56 = vunpack.i.l.bf16 %v4968_v22 }
  0xe7   : > { %1401 = vmatpush.msra.mxu1 %v863_v29  ;;  %1019 = vrot.lane.b32.xlu1 %v4935_v14, %s8205_s21  ;;  %v830_v8 = vsel %vm825_vm11, %v8209_v51, %v8075_v60  ;;  %v8081_v51 = vunpack.i.h.bf16 %v5026_v38 }
  0xe8   : > { %1369 = vmatpush.msrb.mxu2 %v600_v62  ;;  %1052 = vrot.lane.b32.xlu0 %v4935_v14, %s8204_s27 }
  0xe9   : > { %757 = vrot.lane.b32.xlu2 %v4938_v15, %s8191_s17  ;;  %1322 = vmatpush.msra.mxu0 %v832_v48  ;;  %v5362_v10 = vpop.permute.xlu1 %4269  ;;  %v5364_v29 = vpop.permute.xlu2 %4319  ;;  %v8210_v48 = vunpack.i.l.bf16 %v4961_v21 }
  0xea   : > { %1402 = vmatpush.msra.mxu1 %v830_v8  ;;  %1370 = vmatpush.msrb.mxu2 %v4953_v20  ;;  %v5368_v62 = vpop.permute.xlu0 %4264  ;;  %v8078_v25 = vunpack.i.h.bf16 %v5362_v10  ;;  %v8079_v26 = vunpack.i.l.bf16 %v5362_v10  ;;  %v8211_v20 = vunpack.i.h.bf16 %v4961_v21  ;;  %v8096_v12 = vunpack.i.l.bf16 %v5364_v29 }
  0xeb   : > { %v8086_v28 = vunpack.i.l.bf16 %v5368_v62  ;;  %v8101_v11 = vunpack.i.h.bf16 %v5368_v62 }
  0xec   : > { %1371 = vmatpush.msrb.mxu2 %v5017_v37  ;;  %v799_v8 = vsel %vm792_vm12, %v8079_v26, %v8210_v48  ;;  %v797_v60 = vsel %vm792_vm12, %v8211_v20, %v8078_v25  ;;  %v8213_v48 = vunpack.i.l.bf16 %v4997_v30  ;;  %v8214_v30 = vunpack.i.l.bf16 %v5026_v38 }
  0xed   : > { %1323 = vmatpush.msra.mxu0 %v799_v8  ;;  %v963_v37 = vsel %vm957_vm7, %v8212_v43, %v8086_v28  ;;  %1403 = vmatpush.msra.mxu1 %v797_v60  ;;  %v8084_v8 = vunpack.i.h.bf16 %v5099_v59  ;;  %v8091_v26 = vunpack.i.h.bf16 %v5227_v23  ;;  %v8103_v28 = vunpack.i.h.bf16 %v5225_v17 }
  0xee   : > { %1372 = vmatpush.msrb.mxu2 %v5046_v45  ;;  %1394 = vmatpush.msra.mxu3 %v963_v37  ;;  %v5399_v21 = vsel %vm561_vm0, %v8213_v48, %v4152_v35  ;;  %v5414_v45 = vsel %vm528_vm1, %v8214_v30, %v8081_v51  ;;  %v8215_v37 = vunpack.i.l.bf16 %v5055_v46  ;;  %v8092_v51 = vunpack.i.h.bf16 %v5164_v63 }
  0xef   : > { %724 = vrot.lane.b32.xlu1 %v4938_v15, %s8190_s15  ;;  %4011 = vmatmul.msk.f32.vlgmr.msra.gmra.mxu3 %vm8133_vm14, %v5213_v50  ;;  %s4735_s15 = smov 58  }
  0xf0   : > { %1426 = vmatpush.msrb.mxu3 %v5399_v21  ;;  %1373 = vmatpush.msrb.mxu2 %v5078_v55  ;;  %v5432_v48 = vsel %vm495_vm2, %v8215_v37, %v8080_v34  ;;  %v8216_v37 = vunpack.i.l.bf16 %v5099_v59 }
  0xf1   : > { %986 = vrot.lane.b32.xlu0 %v4935_v14, %s8206_s14  ;;  %953 = vrot.lane.b32.xlu2 %v4935_v14, %s8207_s30  ;;  %v5419_v60 = vpop.permute.xlu1 %4284  ;;  %v5421_v43 = vpop.permute.xlu2 %4334  ;;  %v8089_v14 = vunpack.i.l.bf16 %v5227_v23 }
  0xf2   : > { %1427 = vmatpush.msrb.mxu3 %v5414_v45  ;;  %v5423_v55 = vpop.permute.xlu0 %4279  ;;  %v8085_v20 = vunpack.i.l.bf16 %v5421_v43  ;;  %1374 = vmatpush.msrb.mxu2 %v4870_v0  ;;  %v5448_v0 = vsel %vm8088_vm3, %v8216_v37, %v8084_v8  ;;  %v8218_v8 = vunpack.i.h.bf16 %v4968_v22  ;;  %vm8222_vm3 = vcmp.lt.s32.totalorder %v4931_v13, 93 }
  0xf3   : > { %v8094_v30 = vunpack.i.h.bf16 %v5423_v55  ;;  %v8090_v25 = vunpack.i.l.bf16 %v5423_v55  ;;  %v733_v22 = vsel %vm726_vm15, %v8089_v14, %v4171_v1  ;;  %v8219_v1 = vunpack.i.l.bf16 %v5164_v63 }
  0xf4   : > { %1428 = vmatpush.msrb.mxu3 %v5432_v48  ;;  %v5454_v34 = vsel %vm561_vm0, %v4152_v35, %v8085_v20  ;;  %v8105_v20 = vunpack.i.h.bf16 %v5295_v52 }
  0xf5   : > { %v766_v37 = vsel %vm759_vm13, %v8090_v25, %v8217_v56  ;;  %v764_v35 = vsel %vm759_vm13, %v8218_v8, %v8094_v30  ;;  %1466 = vmatpush.msra.mxu2 %v5454_v34  ;;  %v8104_v56 = vunpack.i.h.bf16 %v5364_v29  ;;  %v4277_v8 = vunpack.i.h.bf16 %v5166_v9 }
  0xf6   : > { %1429 = vmatpush.msrb.mxu3 %v5448_v0  ;;  %1324 = vmatpush.msra.mxu0 %v766_v37  ;;  %v8102_v37 = vunpack.i.h.bf16 %v5293_v19 }
  0xf7   : > { %1404 = vmatpush.msra.mxu1 %v764_v35  ;;  %658 = vrot.lane.b32.xlu1 %v4938_v15, %s8193_s0  ;;  %v1061_v35 = vsel %vm8093_vm4, %v8219_v1, %v8092_v51  ;;  %v8223_v51 = vunpack.i.h.bf16 %v4987_v27  ;;  %vm8224_vm4 = vmmov %vm8222_vm3 }
  0xf8   : > { %1430 = vmatpush.msrb.mxu3 %v4884_v3  ;;  %1325 = vmatpush.msra.mxu0 %v733_v22  ;;  %v731_v3 = vsel %vm726_vm15, %v4172_v40, %v8091_v26  ;;  %v8221_v40 = vunpack.i.l.bf16 %v4987_v27  ;;  %v667_v27 = vsel %vm660_vm9, %v8096_v12, %v4196_v7  ;;  %v8229_v7 = vunpack.i.l.bf16 %v5293_v19 }
  0xf9   : > { %691 = vrot.lane.b32.xlu0 %v4938_v15, %s8192_s29  ;;  %625 = vrot.lane.b32.xlu2 %v4938_v15, %s8195_s6  ;;  %v5503_v22 = vpop.permute.xlu1 %4299  ;;  %v5505_v24 = vpop.permute.xlu2 %4349  ;;  %v698_v30 = vsel %vm8224_vm4, %v8223_v51, %v8105_v20  ;;  %v8227_v51 = vunpack.i.h.bf16 %v5095_v57  ;;  %vm8228_vm4 = vcmp.lt.s32.totalorder %v4931_v13, 32  ;;  %v8112_v12 = vunpack.i.l.bf16 %v5166_v9  ;;  %s421_s6 = sand.u32 1, %s4702_s22  }
  0xfa   : > { %1405 = vmatpush.msra.mxu1 %v731_v3  ;;  %8220 = vst [vmem:[#allocation19_spill] sm:$0xff] %v5505_v24  ;;  %v700_v14 = vsel %vm8222_vm3, %v8097_v42, %v8221_v40  ;;  %1431 = vmatpush.msrb.mxu3 %v1061_v35  ;;  %v5513_v3 = vpop.permute.xlu0 %4294  ;;  %v8100_v25 = vunpack.i.h.bf16 %v5503_v22  ;;  %v8098_v26 = vunpack.i.l.bf16 %v5503_v22  ;;  %v8099_v1 = vunpack.i.h.bf16 %v5505_v24 }
  0xfb   : > { %1326 = vmatpush.msra.mxu0 %v700_v14  ;;  %v8225_v35 = vunpack.i.l.bf16 %v5225_v17  ;;  %vm8226_vm3 = vcmp.lt.s32.totalorder %v4931_v13, 29  ;;  %v4287_v14 = vunpack.i.h.bf16 %v5419_v60  ;;  %v8235_v42 = vunpack.i.l.bf16 %v5368_v62 }
  0xfc   : > { %1406 = vmatpush.msra.mxu1 %v698_v30  ;;  %v665_v30 = vsel %vm660_vm9, %v8227_v51, %v8104_v56  ;;  %v8233_v51 = vunpack.i.l.bf16 %v5120_v4 }
  0xfd   : > { %v1028_v40 = vsel %vm8226_vm3, %v8225_v35, %v8103_v28  ;;  %1327 = vmatpush.msra.mxu0 %v667_v27  ;;  %v5548_v35 = vsel %vm8228_vm4, %v4277_v8, %v8098_v26  ;;  %v8230_v27 = vunpack.i.l.bf16 %v5171_v53  ;;  %vm8231_vm3 = vmmov %vm8228_vm4  ;;  %v4297_v26 = vunpack.i.h.bf16 %v5513_v3 }
  0xfe   : > { %1432 = vmatpush.msrb.mxu3 %v1028_v40  ;;  %1407 = vmatpush.msra.mxu1 %v665_v30  ;;  %v995_v40 = vsel %vm990_vm6, %v8229_v7, %v8102_v37  ;;  %v5570_v30 = vsel %vm825_vm11, %v8099_v1, %v8233_v51  ;;  %v8106_v7 = vunpack.i.l.bf16 %v5419_v60  ;;  %v8107_v51 = vunpack.i.l.bf16 %v5513_v3  ;;  %vm8236_vm4 = vmmov %vm8231_vm3 }
  0xff   : > { %v5562_v57 = vsel %vm8231_vm3, %v8100_v25, %v8230_v27  ;;  %8234 = vst [vmem:[#allocation21_spill] sm:$0xff] %v5570_v30  ;;  %v962_v27 = vsel %vm957_vm7, %v8235_v42, %v8101_v11  ;;  %592 = vrot.lane.b32.xlu1 %v4938_v15, %s8196_s26  ;;  %vm8237_vm3 = vcmp.lt.s32.totalorder %v4931_v13, 60  ;;  %v8108_v1 = vunpack.i.l.bf16 %v5505_v24 }
 0x100   : > { %8232 = vst [vmem:[#allocation20_spill] sm:$0xff] %v5562_v57  ;;  %1433 = vmatpush.msrb.mxu3 %v995_v40  ;;  %v927_v40 = vsel %vm8236_vm4, %v8112_v12, %v4277_v8  ;;  %v894_v42 = vsel %vm8237_vm3, %v8106_v7, %v4287_v14  ;;  %vm8238_vm4 = vmmov %vm8237_vm3  ;;  %v8250_v24 = vunpack.i.h.bf16 %v5123_v5 }
 0x101   : > { %1054 = vrot.lane.b32.xlu0 %v4938_v15, %s8204_s27  ;;  %1021 = vrot.lane.b32.xlu2 %v4938_v15, %s8205_s21  ;;  %v5599_v25 = vpop.permute.xlu2 %4364 }
 0x102   : > { %1434 = vmatpush.msrb.mxu3 %v962_v27  ;;  %v5597_v27 = vpop.permute.xlu1 %4314  ;;  %v5601_v11 = vpop.permute.xlu0 %4309 }
 0x103   : > { %v8110_v37 = vunpack.i.h.bf16 %v5597_v27  ;;  %v8109_v8 = vunpack.i.l.bf16 %v5597_v27  ;;  %4012 = vmatmul.msk.f32.vlgmr.msrb.gmra.mxu3 %vm8133_vm14, %v5213_v50  ;;  %v4312_v28 = vunpack.i.h.bf16 %v5601_v11  ;;  %v8111_v56 = vunpack.i.l.bf16 %v5601_v11 }
 0x104   : > { %1479 = vmatpush.msra.mxu3 %v927_v40  ;;  %v861_v40 = vsel %vm858_vm10, %v8107_v51, %v4297_v26  ;;  %v8239_v51 = vunpack.i.l.bf16 %v5243_v18  ;;  %vm8270_vm14 = vcmp.lt.s32.totalorder %v4931_v13, 32 }
 0x105   : > { %v5617_v20 = vsel %vm8238_vm4, %v4287_v14, %v8109_v8  ;;  %v828_v7 = vsel %vm825_vm11, %v8111_v56, %v4312_v28  ;;  %vm8253_vm4 = vcmp.lt.s32.totalorder %v4931_v13, 93 }
 0x106   : > { %1480 = vmatpush.msra.mxu3 %v894_v42  ;;  %v5627_v42 = vsel %vm825_vm11, %v4312_v28, %v8108_v1  ;;  %v5635_v14 = vsel %vm8237_vm3, %v8110_v37, %v8239_v51  ;;  %vm8264_vm3 = vcmp.lt.s32.totalorder %v4931_v13, 127 }
 0x107   : > { %8240 = vst [vmem:[#allocation22_spill] sm:$0xff] %v5635_v14  ;;  %955 = vrot.lane.b32.xlu1 %v4938_v15, %s8207_s30 }
 0x108   : > { %1481 = vmatpush.msra.mxu3 %v861_v40  ;;  %v5642_v40 = vld [vmem:[%s7988_s1] sm:$0xff] }
 0x109   : > { %988 = vrot.lane.b32.xlu0 %v4938_v15, %s8206_s14  ;;  %1375 = vmatmul.f32.vlgmr.msrb.gmra.mxu2 %v5642_v40  ;;  %v5649_v1 = vpop.permute.xlu2 %4379  ;;  %s4738_s14 = smov 122  }
 0x10a   : > { %1482 = vmatpush.msra.mxu3 %v828_v7  ;;  %v5647_v28 = vpop.permute.xlu1 %4329  ;;  %v5651_v51 = vpop.permute.xlu0 %4324  ;;  %v8242_v7 = vunpack.i.l.bf16 %v5300_v32 }
 0x10b   : > { %8241 = vst [vmem:[#allocation23_spill] sm:$0xff] %v5647_v28  ;;  %v8116_v8 = vunpack.i.l.bf16 %v5647_v28  ;;  %v8118_v37 = vunpack.i.h.bf16 %v5651_v51  ;;  %v8119_v56 = vunpack.i.l.bf16 %v5651_v51  ;;  %v8243_v58 = vunpack.i.h.bf16 %v5647_v28 }
 0x10d   : > { %v5661_v15 = vsel %vm858_vm10, %v4297_v26, %v8116_v8  ;;  %v795_v12 = vsel %vm792_vm12, %v8119_v56, %v8118_v37  ;;  %v5675_v47 = vsel %vm858_vm10, %v8243_v58, %v8242_v7  ;;  %v8245_v8 = vunpack.i.h.bf16 %v5599_v25 }
 0x10e   : > { %8244 = vst [vmem:[#allocation24_spill] sm:$0xff] %v5675_v47  ;;  %1483 = vmatpush.msra.mxu3 %v795_v12  ;;  %v8246_v47 = vunpack.i.l.bf16 %v5599_v25  ;;  %v8247_v58 = vunpack.i.l.bf16 %v5123_v5 }
 0x110   : > { %v729_v14 = vsel %vm726_vm15, %v8246_v47, %v8245_v8  ;;  %v8251_v47 = vunpack.i.h.bf16 %v5649_v1  ;;  %v8252_v8 = vunpack.i.l.bf16 %v5649_v1 }
 0x111   : > { %v5688_v7 = vpop.permute.xlu2 %4389 }
 0x112   : > { %v5678_v26 = vpop.permute.xlu1 %4344  ;;  %v5682_v30 = vpop.permute.xlu0 %4339  ;;  %v696_v28 = vsel %vm8253_vm4, %v8252_v8, %v8251_v47  ;;  %v8255_v47 = vunpack.i.l.bf16 %v5028_v39  ;;  %v8256_v8 = vunpack.i.h.bf16 %v5028_v39  ;;  %vm8267_vm4 = vmmov %vm8264_vm3 }
 0x113   : > { %v8122_v37 = vunpack.i.h.bf16 %v5678_v26  ;;  %v8123_v56 = vunpack.i.l.bf16 %v5678_v26  ;;  %v8248_v12 = vunpack.i.l.bf16 %v5682_v30  ;;  %v8249_v57 = vunpack.i.h.bf16 %v5682_v30 }
 0x115   : > { %v762_v31 = vsel %vm759_vm13, %v8123_v56, %v8122_v37  ;;  %v634_v2 = vsel %vm627_vm5, %v8248_v12, %v8247_v58  ;;  %v632_v37 = vsel %vm627_vm5, %v8250_v24, %v8249_v57  ;;  %v8126_v56 = vunpack.i.l.bf16 %v5688_v7 }
 0x116   : > { %1484 = vmatpush.msra.mxu3 %v762_v31  ;;  %1328 = vmatpush.msra.mxu0 %v634_v2  ;;  %v8254_v58 = vunpack.i.h.bf16 %v5688_v7  ;;  %v8132_v2 = vunpack.i.h.bf16 %v5421_v43 }
 0x117   : > { %1408 = vmatpush.msra.mxu1 %v632_v37 }
 0x118   : > { %1485 = vmatpush.msra.mxu3 %v729_v14  ;;  %v663_v5 = vsel %vm660_vm9, %v8126_v56, %v8254_v58 }
 0x11a   : > { %v5729_v31 = vpop.permute.xlu1 %4359  ;;  %1486 = vmatpush.msra.mxu3 %v696_v28  ;;  %v5732_v37 = vpop.permute.xlu0 %4354 }
 0x11b   : > { %v8139_v24 = vunpack.i.h.bf16 %v5729_v31  ;;  %v8127_v57 = vunpack.i.l.bf16 %v5729_v31  ;;  %v8135_v14 = vunpack.i.l.bf16 %v5732_v37  ;;  %v8131_v12 = vunpack.i.h.bf16 %v5732_v37 }
 0x11c   : > { %1487 = vmatpush.msra.mxu3 %v663_v5  ;;  %v8257_v5 = vunpack.i.h.bf16 %v5026_v38  ;;  %v8259_v38 = vunpack.i.l.bf16 %v5002_v33 }
 0x11d   : > { %v601_v28 = vsel %vm594_vm8, %v8127_v57, %v8255_v47  ;;  %v599_v58 = vsel %vm594_vm8, %v8256_v8, %v8139_v24  ;;  %v8258_v47 = vunpack.i.l.bf16 %v4940_v16  ;;  %v5781_v8 = vpop.permute.xlu2 %689 }
 0x11e   : > { %1329 = vmatpush.msra.mxu0 %v601_v28  ;;  %1409 = vmatpush.msra.mxu1 %v599_v58  ;;  %v5756_v56 = vsel %vm528_vm1, %v8257_v5, %v8135_v14  ;;  %v5775_v28 = vsel %vm528_vm1, %v8131_v12, %v8259_v38 }
 0x11f   : > { %1467 = vmatpush.msra.mxu2 %v5756_v56  ;;  %v5765_v39 = vsel %vm561_vm0, %v8132_v2, %v8258_v47  ;;  %v8260_v47 = vunpack.i.l.bf16 %v5031_v41  ;;  %v8262_v41 = vunpack.i.l.bf16 %v5362_v10  ;;  %v8269_v2 = vunpack.i.h.bf16 %v5171_v53 }
 0x120   : > { %1330 = vmatpush.msra.mxu0 %v5765_v39  ;;  %1410 = vmatpush.msra.mxu1 %v5011_v36 }
 0x122   : > { %v5777_v16 = vpop.permute.xlu1 %4374  ;;  %1331 = vmatpush.msra.mxu0 %v5775_v28  ;;  %1411 = vmatpush.msra.mxu1 %v5040_v44  ;;  %v5783_v58 = vpop.permute.xlu0 %4369  ;;  %v8261_v44 = vunpack.i.h.bf16 %v5055_v46  ;;  %v4606_v46 = vld [vmem:[%s4867_s18 + $0x10] sm:$0xff] }
 0x123   : > { %v8128_v36 = vunpack.i.h.bf16 %v5777_v16  ;;  %v8129_v33 = vunpack.i.l.bf16 %v5777_v16  ;;  %v8130_v5 = vunpack.i.h.bf16 %v5783_v58 }
 0x124   : > { %1412 = vmatpush.msra.mxu1 %v5071_v54 }
 0x125   : > { %v5795_v38 = vsel %vm495_vm2, %v8128_v36, %v8260_v47  ;;  %v5803_v57 = vsel %vm495_vm2, %v8261_v44, %v8129_v33  ;;  %v5813_v54 = vsel %vm792_vm12, %v8130_v5, %v8262_v41  ;;  %v5824_v33 = vpop.permute.xlu2 %656  ;;  %v8263_v41 = vunpack.i.l.bf16 %v5060_v49 }
 0x126   : > { %1332 = vmatpush.msra.mxu0 %v5795_v38  ;;  %1413 = vmatpush.msra.mxu1 %v5106_v61  ;;  %v8268_v49 = vunpack.i.l.bf16 %v5166_v9 }
 0x127   : > { %1468 = vmatpush.msra.mxu2 %v5803_v57 }
 0x128   : > { %1414 = vmatpush.msra.mxu1 %v4606_v46  ;;  %v8266_v46 = vunpack.i.h.bf16 %v5099_v59  ;;  %v8271_v59 = vunpack.i.l.bf16 %v5419_v60 }
 0x129   : > { %1415 = vmatmul.f32.vlgmr.msra.gmra.mxu1 %v5642_v40 }
 0x12a   : > { %v5818_v47 = vpop.permute.xlu1 %4384  ;;  %v5820_v44 = vpop.permute.xlu0 %755 }
 0x12b   : > { %v8134_v61 = vunpack.i.h.bf16 %v5818_v47  ;;  %v8136_v36 = vunpack.i.l.bf16 %v5818_v47 }
 0x12d   : > { %v5832_v5 = vsel %vm8264_vm3, %v8134_v61, %v8263_v41  ;;  %v465_v12 = vsel %vm8267_vm4, %v8266_v46, %v8136_v36  ;;  %v928_v41 = vsel %vm8270_vm14, %v8269_v2, %v8268_v49  ;;  %v4607_v61 = vld [vmem:[%s4867_s18 + $0x20] sm:$0xff]  ;;  %v8272_v46 = vunpack.i.h.bf16 %v5243_v18 }
 0x12e   : > { %8265 = vst [vmem:[#allocation25_spill] sm:$0xff] %v5832_v5  ;;  %1333 = vmatpush.msra.mxu0 %v5832_v5  ;;  %1469 = vmatpush.msra.mxu2 %v465_v12  ;;  %vm8273_vm3 = vcmp.lt.s32.totalorder %v4931_v13, 60  ;;  %v8274_v2 = vunpack.i.l.bf16 %v5513_v3  ;;  %v8275_v49 = vunpack.i.h.bf16 %v5300_v32  ;;  %v5878_v3 = vpop.permute.xlu2 %623  ;;  %v8278_v32 = vunpack.i.l.bf16 %v5651_v51 }
 0x12f   : > { %v895_v36 = vsel %vm8273_vm3, %v8272_v46, %v8271_v59  ;;  %v8277_v59 = vunpack.i.h.bf16 %v5120_v4  ;;  %v8279_v46 = vunpack.i.h.bf16 %v5362_v10  ;;  %v8281_v4 = vunpack.i.h.bf16 %v5423_v55 }
 0x130   : > { %1334 = vmatpush.msra.mxu0 %v4898_v6  ;;  %1470 = vmatpush.msra.mxu2 %v4607_v61  ;;  %v862_v60 = vsel %vm858_vm10, %v8275_v49, %v8274_v2  ;;  %vm8287_vm14 = vcmp.lt.s32.totalorder %v4931_v13, 93  ;;  %vm8294_vm4 = vcmp.lt.s32.totalorder %v4931_v13, 28  ;;  %vm8300_vm3 = vcmp.lt.s32.totalorder %v4931_v13, 29 }
 0x131   : > { %1335 = vmatmul.f32.vlgmr.msra.gmra.mxu0 %v5642_v40  ;;  %v796_v2 = vsel %vm792_vm12, %v8279_v46, %v8278_v32  ;;  %v8283_v32 = vunpack.i.h.bf16 %v5227_v23 }
 0x132   : > { %1439 = vmatpush.msrb.mxu0 %v928_v41  ;;  %v5849_v14 = vpop.permute.xlu1 %4394  ;;  %v5858_v6 = vpop.permute.xlu0 %722  ;;  %v8276_v41 = vunpack.i.l.bf16 %v5601_v11  ;;  %v8280_v11 = vunpack.i.l.bf16 %v5678_v26 }
 0x133   : > { %v8137_v53 = vunpack.i.h.bf16 %v5849_v14  ;;  %v4396_v9 = vunpack.i.l.bf16 %v5849_v14 }
 0x134   : > { %1440 = vmatpush.msrb.mxu0 %v895_v36  ;;  %v829_v36 = vsel %vm825_vm11, %v8277_v59, %v8276_v41 }
 0x135   : > { %v630_v18 = vsel %vm627_vm5, %v4396_v9, %v8137_v53  ;;  %v8286_v53 = vunpack.i.h.bf16 %v5295_v52 }
 0x136   : > { %1441 = vmatpush.msrb.mxu0 %v862_v60  ;;  %1488 = vmatpush.msra.mxu3 %v630_v18  ;;  %v763_v60 = vsel %vm759_vm13, %v8281_v4, %v8280_v11  ;;  %v8284_v11 = vunpack.i.l.bf16 %v5421_v43 }
 0x138   : > { %1442 = vmatpush.msrb.mxu0 %v829_v36  ;;  %v8282_v36 = vunpack.i.l.bf16 %v5599_v25 }
 0x13a   : > { %1443 = vmatpush.msrb.mxu0 %v796_v2  ;;  %v5886_v49 = vpop.permute.xlu1 %4404  ;;  %v4400_v18 = vpop.permute.xlu0 %4399  ;;  %v730_v46 = vsel %vm726_vm15, %v8283_v32, %v8282_v36  ;;  %v8288_v32 = vunpack.i.l.bf16 %v5688_v7 }
 0x13b   : > { %v8138_v41 = vunpack.i.h.bf16 %v5886_v49  ;;  %v4406_v59 = vunpack.i.l.bf16 %v5886_v49  ;;  %v4401_v10 = vunpack.i.l.bf16 %v4400_v18  ;;  %v4402_v24 = vunpack.i.h.bf16 %v4400_v18 }
 0x13c   : > { %1444 = vmatpush.msrb.mxu0 %v763_v60  ;;  %v8285_v60 = vunpack.i.l.bf16 %v5649_v1  ;;  %v8293_v18 = vunpack.i.h.bf16 %v5164_v63 }
 0x13d   : > { %v597_v2 = vsel %vm594_vm8, %v4406_v59, %v8138_v41  ;;  %v5910_v4 = vsel %vm561_vm0, %v8284_v11, %v4401_v10  ;;  %v5926_v11 = vpop.permute.xlu2 %590 }
 0x13e   : > { %1445 = vmatpush.msrb.mxu0 %v730_v46  ;;  %1489 = vmatpush.msra.mxu3 %v597_v2  ;;  %v697_v36 = vsel %vm8287_vm14, %v8286_v53, %v8285_v60  ;;  %v8289_v46 = vunpack.i.h.bf16 %v5364_v29  ;;  %v8290_v53 = vunpack.i.h.bf16 %v5682_v30 }
 0x13f   : > { %1506 = vmatpush.msrb.mxu1 %v5910_v4 }
 0x140   : > { %1446 = vmatpush.msrb.mxu0 %v697_v36  ;;  %1490 = vmatpush.msra.mxu3 %v5454_v34  ;;  %v664_v2 = vsel %vm660_vm9, %v8289_v46, %v8288_v32  ;;  %v631_v60 = vsel %vm627_vm5, %v8290_v53, %v4396_v9  ;;  %v8291_v32 = vunpack.i.h.bf16 %v5729_v31 }
 0x142   : > { %1447 = vmatpush.msrb.mxu0 %v664_v2  ;;  %v4415_v41 = vpop.permute.xlu1 %4414  ;;  %1491 = vmatpush.msra.mxu3 %v5756_v56  ;;  %v5933_v36 = vpop.permute.xlu0 %4409  ;;  %v598_v46 = vsel %vm594_vm8, %v8291_v32, %v4406_v59  ;;  %v8292_v56 = vunpack.i.l.bf16 %v5732_v37  ;;  %v8295_v59 = vunpack.i.h.bf16 %v5421_v43 }
 0x143   : > { %v4416_v34 = vunpack.i.l.bf16 %v4415_v41  ;;  %v4411_v5 = vunpack.i.l.bf16 %v5933_v36  ;;  %v4417_v2 = vunpack.i.h.bf16 %v4415_v41  ;;  %v8296_v41 = vunpack.i.h.bf16 %v5732_v37 }
 0x144   : > { %1448 = vmatpush.msrb.mxu0 %v631_v60  ;;  %1492 = vmatpush.msra.mxu3 %v5803_v57  ;;  %v5959_v53 = vsel %vm561_vm0, %v4402_v24, %v8295_v59  ;;  %v8297_v37 = vunpack.i.l.bf16 %v5777_v16 }
 0x145   : > { %v5945_v9 = vsel %vm528_vm1, %v8292_v56, %v4416_v34  ;;  %v1060_v57 = vsel %vm8294_vm4, %v8293_v18, %v4411_v5 }
 0x146   : > { %1449 = vmatpush.msrb.mxu0 %v598_v46  ;;  %1493 = vmatpush.msra.mxu3 %v465_v12  ;;  %v5967_v12 = vsel %vm528_vm1, %v4417_v2, %v8296_v41  ;;  %v8298_v46 = vunpack.i.h.bf16 %v5777_v16  ;;  %v6003_v16 = vsel %vm528_vm1, %v4416_v34, %v4417_v2  ;;  %v4412_v34 = vunpack.i.h.bf16 %v5933_v36 }
 0x147   : > { %1507 = vmatpush.msrb.mxu1 %v5945_v9  ;;  %1471 = vmatpush.msra.mxu2 %v1060_v57  ;;  %v5999_v57 = vsel %vm561_vm0, %v4401_v10, %v4402_v24  ;;  %vm8302_vm1 = vcmp.lt.s32.totalorder %v4931_v13, 127 }
 0x148   : > { %1450 = vmatpush.msrb.mxu0 %v5399_v21  ;;  %1494 = vmatpush.msra.mxu3 %v4607_v61  ;;  %v5970_v21 = vpop.permute.xlu2 %4439  ;;  %vm8304_vm14 = vmmov %vm8302_vm1 }
 0x149   : > { %1495 = vmatmul.f32.vlgmr.msra.gmra.mxu3 %v5642_v40  ;;  %v4441_v24 = vunpack.i.l.bf16 %v5970_v21  ;;  %vm8305_vm4 = vmmov %vm8302_vm1 }
 0x14a   : > { %1451 = vmatpush.msrb.mxu0 %v5414_v45  ;;  %1586 = vmatpush.msrb.mxu3 %v5959_v53  ;;  %v4425_v63 = vpop.permute.xlu1 %4424  ;;  %v5972_v43 = vpop.permute.xlu0 %4419 }
 0x14b   : > { %v4427_v61 = vunpack.i.h.bf16 %v4425_v63  ;;  %v4426_v60 = vunpack.i.l.bf16 %v4425_v63  ;;  %v4421_v45 = vunpack.i.l.bf16 %v5972_v43 }
 0x14c   : > { %1452 = vmatpush.msrb.mxu0 %v5432_v48  ;;  %1587 = vmatpush.msrb.mxu3 %v5967_v12  ;;  %v8299_v48 = vunpack.i.h.bf16 %v5225_v17 }
 0x14d   : > { %v5982_v32 = vsel %vm495_vm2, %v8297_v37, %v4426_v60  ;;  %v5988_v56 = vsel %vm495_vm2, %v4427_v61, %v8298_v46  ;;  %v6008_v17 = vsel %vm495_vm2, %v4426_v60, %v4427_v61  ;;  %v8301_v61 = vunpack.i.l.bf16 %v5818_v47 }
 0x14e   : > { %1453 = vmatpush.msrb.mxu0 %v5448_v0  ;;  %v1027_v18 = vsel %vm8300_vm3, %v8299_v48, %v4421_v45  ;;  %1508 = vmatpush.msrb.mxu1 %v5982_v32  ;;  %v4608_v0 = vld [vmem:[%s4867_s18 + $0x18] sm:$0xff]  ;;  %v8303_v46 = vunpack.i.h.bf16 %v5818_v47  ;;  %v4422_v47 = vunpack.i.h.bf16 %v5972_v43  ;;  %vm8308_vm3 = vcmp.lt.s32.totalorder %v4931_v13, 28 }
 0x14f   : > { %1588 = vmatpush.msrb.mxu3 %v5988_v56  ;;  %1472 = vmatpush.msra.mxu2 %v1027_v18  ;;  %v1059_v43 = vsel %vm8308_vm3, %v4411_v5, %v4412_v34 }
 0x150   : > { %1454 = vmatpush.msrb.mxu0 %v4608_v0  ;;  %v6015_v2 = vpop.permute.xlu2 %757  ;;  %v8306_v0 = vunpack.i.h.bf16 %v5293_v19  ;;  %v6050_v19 = vld [vmem:[%s4867_s18 + $0x38] sm:$0xff] }
 0x151   : > { %1455 = vmatmul.f32.vlgmr.msrb.gmra.mxu0 %v5642_v40 }
 0x152   : > { %1546 = vmatpush.msra.mxu0 %v5999_v57  ;;  %v4435_v59 = vpop.permute.xlu1 %4434  ;;  %v4430_v63 = vpop.permute.xlu0 %4429 }
 0x153   : > { %v4437_v41 = vunpack.i.h.bf16 %v4435_v59  ;;  %v4436_v37 = vunpack.i.l.bf16 %v4435_v59  ;;  %v4431_v10 = vunpack.i.l.bf16 %v4430_v63 }
 0x154   : > { %1547 = vmatpush.msra.mxu0 %v6003_v16 }
 0x155   : > { %v6021_v60 = vsel %vm8302_vm1, %v8301_v61, %v4436_v37  ;;  %v6027_v48 = vsel %vm8304_vm14, %v4437_v41, %v8303_v46  ;;  %v6031_v18 = vsel %vm8305_vm4, %v4436_v37, %v4437_v41  ;;  %v994_v59 = vsel %vm990_vm6, %v8306_v0, %v4431_v10  ;;  %v6046_v37 = vld [vmem:[%s4867_s18 + $0x28] sm:$0xff]  ;;  %v6058_v0 = vld [vmem:[%s4867_s18 + $0x30] sm:$0xff]  ;;  %vm8311_vm4 = vmmov %vm8308_vm3 }
 0x156   : > { %1548 = vmatpush.msra.mxu0 %v6008_v17  ;;  %1509 = vmatpush.msrb.mxu1 %v6021_v60  ;;  %v8307_v61 = vunpack.i.h.bf16 %v5368_v62  ;;  %v4432_v46 = vunpack.i.h.bf16 %v4430_v63  ;;  %vm8309_vm1 = vcmask 588800   ;;  %vm8310_vm14 = vcmp.lt.s32.totalorder %v4931_v13, 29 }
 0x157   : > { %1589 = vmatpush.msrb.mxu3 %v6027_v48  ;;  %1473 = vmatpush.msra.mxu2 %v994_v59  ;;  %v4442_v59 = vunpack.i.h.bf16 %v5970_v21  ;;  %v1026_v36 = vsel %vm8310_vm14, %v4421_v45, %v4422_v47  ;;  %v4371_v21 = vunpack.i.l.bf16 %v5783_v58  ;;  %vm8312_vm3 = vmmov %vm8310_vm14  ;;  %vm8319_vm14 = vcmp.lt.s32.totalorder %v4931_v13, 60 }
 0x158   : > { %1549 = vmatpush.msra.mxu0 %v6031_v18  ;;  %v961_v41 = vsel %vm957_vm7, %v8307_v61, %v4441_v24  ;;  %1510 = vmatpush.msrb.mxu1 %v6046_v37  ;;  %v993_v61 = vsel %vm990_vm6, %v4431_v10, %v4432_v46  ;;  %v8314_v10 = vunpack.i.l.bf16 %v5503_v22 }
 0x159   : > { %1590 = vmatpush.msrb.mxu3 %v6050_v19  ;;  %1474 = vmatpush.msra.mxu2 %v961_v41  ;;  %v6081_v41 = vpop.permute.xlu2 %953  ;;  %v960_v45 = vsel %vm957_vm7, %v4441_v24, %v4442_v59  ;;  %v8318_v24 = vunpack.i.l.bf16 %v5597_v27 }
 0x15a   : > { %1550 = vmatpush.msra.mxu0 %v6058_v0  ;;  %4013 = vmatmul.msk.f32.vlgmr.msra.gmra.mxu2 %vm8309_vm1, %v5213_v50  ;;  %v6063_v62 = vpop.permute.xlu1 %1019  ;;  %v6067_v63 = vpop.permute.xlu0 %1052  ;;  %vm8315_vm1 = vcmp.lt.s32.totalorder %v4931_v13, 32 }
 0x15b   : > { %1511 = vmatpush.msrb.mxu1 %v1059_v43  ;;  %1519 = vmatpush.msrb.mxu2 %v5548_v35  ;;  %v1058_v5 = vsel %vm8311_vm4, %v4412_v34, %v6067_v63  ;;  %v1025_v35 = vsel %vm8312_vm3, %v4422_v47, %v6063_v62  ;;  %v8316_v47 = vunpack.i.h.bf16 %v5651_v51  ;;  %vm8320_vm4 = vcmask 588800  }
 0x15c   : > { %1551 = vmatpush.msra.mxu0 %v1058_v5  ;;  %vm8333_vm3 = vmmov %vm8320_vm4 }
 0x15d   : > { %1512 = vmatpush.msrb.mxu1 %v1026_v36  ;;  %1520 = vmatpush.msrb.mxu2 %v5617_v20  ;;  %v8313_v20 = vunpack.i.h.bf16 %v5503_v22  ;;  %v8317_v36 = vunpack.i.h.bf16 %v5597_v27 }
 0x15e   : > { %1552 = vmatpush.msra.mxu0 %v1025_v35 }
 0x15f   : > { %1513 = vmatpush.msrb.mxu1 %v993_v61  ;;  %1521 = vmatpush.msrb.mxu2 %v5661_v15  ;;  %v925_v34 = vsel %vm8315_vm1, %v8314_v10, %v8313_v20  ;;  %v794_v15 = vsel %vm792_vm12, %v8316_v47, %v4371_v21  ;;  %v892_v5 = vsel %vm8319_vm14, %v8318_v24, %v8317_v36  ;;  %v8322_v61 = vld [vmem:[#allocation23_spill] sm:$0xff]  ;;  %v8325_v10 = vunpack.i.h.bf16 %v5599_v25 }
 0x160   : > { %v8323_v35 = vunpack.i.h.bf16 %v8322_v61  ;;  %v8329_v25 = vunpack.i.h.bf16 %v5649_v1  ;;  %vm8343_vm1 = vcmp.lt.s32.totalorder %v4931_v13, 28  ;;  %vm8344_vm14 = vcmp.lt.s32.totalorder %v4931_v13, 29 }
 0x161   : > { %1514 = vmatpush.msrb.mxu1 %v960_v45  ;;  %1522 = vmatpush.msrb.mxu2 %v5627_v42  ;;  %v8321_v42 = vunpack.i.h.bf16 %v5678_v26  ;;  %v8324_v45 = vunpack.i.l.bf16 %v8322_v61  ;;  %v728_v26 = vsel %vm726_vm15, %v8325_v10, %v5858_v6  ;;  %v8335_v61 = vld [vmem:[#allocation22_spill] sm:$0xff] }
 0x162   : > { %v725_v43 = vpop.permute.xlu1 %724  ;;  %4014 = vmatmul.msk.f32.vlgmr.msrb.gmra.mxu1 %vm8320_vm4, %v5213_v50  ;;  %vm8357_vm4 = vmmov %vm8344_vm14 }
 0x163   : > { %1559 = vmatpush.msra.mxu1 %v925_v34  ;;  %1523 = vmatpush.msrb.mxu2 %v794_v15  ;;  %v6105_v22 = vpop.permute.xlu0 %986  ;;  %v761_v51 = vsel %vm759_vm13, %v8321_v42, %v5820_v44  ;;  %v859_v20 = vsel %vm858_vm10, %v8324_v45, %v8323_v35  ;;  %v8326_v34 = vld [vmem:[#allocation19_spill] sm:$0xff]  ;;  %vm8330_vm10 = vcmp.lt.s32.totalorder %v4931_v13, 93  ;;  %v626_v42 = vpop.permute.xlu2 %625  ;;  %v727_v10 = vsel %vm726_vm15, %v5858_v6, %v725_v43 }
 0x164   : > { %v992_v27 = vsel %vm990_vm6, %v4432_v46, %v6105_v22  ;;  %v959_v46 = vsel %vm957_vm7, %v4442_v59, %v6081_v41  ;;  %v8327_v47 = vunpack.i.h.bf16 %v8326_v34  ;;  %v8328_v15 = vunpack.i.l.bf16 %v8326_v34 }
 0x165   : > { %1560 = vmatpush.msra.mxu1 %v892_v5  ;;  %1524 = vmatpush.msrb.mxu2 %v761_v51  ;;  %v695_v24 = vsel %vm8330_vm10, %v8329_v25, %v5781_v8  ;;  %v8331_v5 = vld [vmem:[#allocation20_spill] sm:$0xff]  ;;  %v8332_v59 = vunpack.i.h.bf16 %v5783_v58  ;;  %v760_v58 = vsel %vm759_vm13, %v5820_v44, %v6015_v2 }
 0x166   : > { %1553 = vmatpush.msra.mxu0 %v992_v27  ;;  %v826_v36 = vsel %vm825_vm11, %v8328_v15, %v8327_v47  ;;  %v8334_v27 = vunpack.i.h.bf16 %v5688_v7 }
 0x167   : > { %1561 = vmatpush.msra.mxu1 %v859_v20  ;;  %1525 = vmatpush.msrb.mxu2 %v728_v26  ;;  %v793_v51 = vsel %vm792_vm12, %v4371_v21, %v8332_v59  ;;  %v8336_v21 = vunpack.i.h.bf16 %v5849_v14  ;;  %v8337_v20 = vld [vmem:[#allocation24_spill] sm:$0xff]  ;;  %v8338_v26 = vunpack.i.h.bf16 %v5886_v49  ;;  %vm8340_vm12 = vmmov %vm8330_vm10  ;;  %v8341_v49 = vunpack.i.l.bf16 %v5423_v55 }
 0x168   : > { %1554 = vmatpush.msra.mxu0 %v959_v46  ;;  %v662_v1 = vsel %vm660_vm9, %v8334_v27, %v5824_v33  ;;  %v8339_v46 = vld [vmem:[#allocation21_spill] sm:$0xff] }
 0x169   : > { %1562 = vmatpush.msra.mxu1 %v826_v36  ;;  %1526 = vmatpush.msrb.mxu2 %v695_v24  ;;  %v629_v7 = vsel %vm627_vm5, %v8336_v21, %v5878_v3  ;;  %v596_v44 = vsel %vm594_vm8, %v8338_v26, %v5926_v11  ;;  %v767_v34 = vsel %vm759_vm13, %v6015_v2, %v8341_v49  ;;  %v4734_v21 = vmov 0  }
 0x16a   : > { %1599 = vmatpush.msrb.mxu0 %v8331_v5  ;;  %v659_v35 = vpop.permute.xlu1 %658  ;;  %4443 = vset.pattern.permute.xlu1 %v4734_v21 }
 0x16b   : > { %4015 = vmatmul.msk.f32.vlgmr.msra.gmra.mxu0 %vm8333_vm3, %v5213_v50  ;;  %1563 = vmatpush.msra.mxu1 %v793_v51  ;;  %v692_v45 = vpop.permute.xlu0 %691  ;;  %v661_v6 = vsel %vm660_vm9, %v5824_v33, %v659_v35  ;;  %v1022_v15 = vpop.permute.xlu2 %1021 }
 0x16c   : > { %1600 = vmatpush.msrb.mxu0 %v8335_v61  ;;  %1527 = vmatpush.msrb.mxu2 %v662_v1  ;;  %v694_v14 = vsel %vm8340_vm12, %v5781_v8, %v692_v45  ;;  %v1024_v2 = vsel %vm8344_vm14, %v6063_v62, %v1022_v15  ;;  %v1356_v62 = vpop.f32.mrf.mxu2 }
 0x16d   : > { %1564 = vmatpush.msra.mxu1 %v760_v58  ;;  %v1703_v58 = vld [vmem:[%s7989_s2] sm:$0xff]  ;;  %4604 = vset.pattern.permute.xlu0 %v4734_v21 }
 0x16e   : > { %1601 = vmatpush.msrb.mxu0 %v8337_v20  ;;  %1528 = vmatpush.msrb.mxu2 %v629_v7 }
 0x16f   : > { %1565 = vmatpush.msra.mxu1 %v727_v10  ;;  %4605 = vset.pattern.permute.xlu2 %v4734_v21 }
 0x170   : > { %1602 = vmatpush.msrb.mxu0 %v8339_v46  ;;  %1529 = vmatpush.msrb.mxu2 %v596_v44 }
 0x171   : > { %1566 = vmatpush.msra.mxu1 %v694_v14 }
 0x172   : > { %1603 = vmatpush.msrb.mxu0 %v5813_v54  ;;  %1530 = vmatpush.msrb.mxu2 %v5910_v4  ;;  %v593_v47 = vpop.permute.xlu1 %592  ;;  %v628_v54 = vsel %vm627_vm5, %v5878_v3, %v626_v42  ;;  %v8342_v4 = vunpack.i.l.bf16 %v5227_v23  ;;  %v8345_v23 = vunpack.i.l.bf16 %v5295_v52  ;;  %v8348_v52 = vunpack.i.l.bf16 %v5682_v30 }
 0x173   : > { %1567 = vmatpush.msra.mxu1 %v661_v6  ;;  %v1055_v8 = vpop.permute.xlu0 %1054  ;;  %v595_v33 = vsel %vm594_vm8, %v5926_v11, %v593_v47  ;;  %v8347_v11 = vunpack.i.l.bf16 %v5364_v29 }
 0x174   : > { %1604 = vmatpush.msrb.mxu0 %v767_v34  ;;  %1531 = vmatpush.msrb.mxu2 %v5945_v9  ;;  %v734_v55 = vsel %vm726_vm15, %v725_v43, %v8342_v4  ;;  %v1057_v9 = vsel %vm8343_vm1, %v6067_v63, %v1055_v8  ;;  %vm8346_vm15 = vmmov %vm8330_vm10 }
 0x175   : > { %1568 = vmatpush.msra.mxu1 %v628_v54  ;;  %v701_v3 = vsel %vm8346_vm15, %v692_v45, %v8345_v23  ;;  %1591 = vmatpush.msrb.mxu3 %v1057_v9  ;;  %v668_v63 = vsel %vm660_vm9, %v659_v35, %v8347_v11  ;;  %vm8354_vm9 = vmmov %vm8343_vm1 }
 0x176   : > { %1605 = vmatpush.msrb.mxu0 %v734_v55  ;;  %1532 = vmatpush.msrb.mxu2 %v5982_v32  ;;  %v635_v32 = vsel %vm627_vm5, %v626_v42, %v8348_v52  ;;  %vm8351_vm5 = vmmov %vm8333_vm3 }
 0x177   : > { %1569 = vmatpush.msra.mxu1 %v595_v33  ;;  %1592 = vmatpush.msrb.mxu3 %v1024_v2  ;;  %vm8362_vm10 = vmmov %vm8333_vm3 }
 0x178   : > { %1606 = vmatpush.msrb.mxu0 %v701_v3  ;;  %1533 = vmatpush.msrb.mxu2 %v6021_v60 }
 0x179   : > { %1570 = vmatpush.msra.mxu1 %v5999_v57  ;;  %v8349_v57 = vunpack.i.l.bf16 %v5729_v31  ;;  %v8350_v31 = vld [vmem:[#allocation25_spill] sm:$0xff] }
 0x17a   : > { %1607 = vmatpush.msrb.mxu0 %v668_v63  ;;  %1534 = vmatpush.msrb.mxu2 %v6046_v37  ;;  %v956_v60 = vpop.permute.xlu1 %955 }
 0x17b   : > { %1535 = vmatmul.f32.vlgmr.msrb.gmra.mxu2 %v5642_v40  ;;  %1571 = vmatpush.msra.mxu1 %v6003_v16  ;;  %v989_v29 = vpop.permute.xlu0 %988  ;;  %v602_v37 = vsel %vm594_vm8, %v593_v47, %v8349_v57  ;;  %v8352_v16 = vld [vmem:[#allocation15_spill] sm:$0xff] }
 0x17c   : > { %1626 = vmatpush.msra.mxu2 %v5765_v39  ;;  %1608 = vmatpush.msrb.mxu0 %v635_v32  ;;  %v991_v30 = vsel %vm990_vm6, %v6105_v22, %v989_v29  ;;  %v958_v39 = vsel %vm957_vm7, %v6081_v41, %v956_v60  ;;  %v8360_v41 = vld [vmem:[#allocation17_spill] sm:$0xff]  ;;  %v4613_v22 = vld [vmem:[%s7988_s1 + $0x8] sm:$0xff] }
 0x17d   : > { %1572 = vmatpush.msra.mxu1 %v6008_v17  ;;  %1593 = vmatpush.msrb.mxu3 %v991_v30  ;;  %v8355_v17 = vld [vmem:[#allocation18_spill] sm:$0xff]  ;;  %v8361_v43 = vunpack.i.l.bf16 %v8360_v41 }
 0x17e   : > { %1627 = vmatpush.msra.mxu2 %v5775_v28  ;;  %1609 = vmatpush.msrb.mxu0 %v602_v37  ;;  %v4612_v28 = vld [vmem:[%s4867_s18] sm:$0xff]  ;;  %s3931_s18 = scalar_lea.hbm %s7999_s12, %s4825_s25 }
 0x17f   : > { %1573 = vmatpush.msra.mxu1 %v6031_v18  ;;  %1594 = vmatpush.msrb.mxu3 %v958_v39  ;;  %v8356_v18 = vunpack.i.l.bf16 %v8355_v17 }
 0x180   : > { %1628 = vmatpush.msra.mxu2 %v5795_v38  ;;  %1610 = vmatpush.msrb.mxu0 %v5959_v53  ;;  %v8353_v38 = vunpack.i.l.bf16 %v8352_v16 }
 0x181   : > { %1574 = vmatpush.msra.mxu1 %v6058_v0  ;;  %4016 = vmatmul.msk.f32.vlgmr.msrb.gmra.mxu3 %vm8351_vm5, %v5213_v50  ;;  %v8358_v50 = vld [vmem:[#allocation16_spill] sm:$0xff] }
 0x182   : > { %1629 = vmatpush.msra.mxu2 %v8350_v31  ;;  %1611 = vmatpush.msrb.mxu0 %v5967_v12  ;;  %v1064_v53 = vsel %vm8354_vm9, %v1055_v8, %v8353_v38  ;;  %v1031_v12 = vsel %vm8357_vm4, %v1022_v15, %v8356_v18  ;;  %v8359_v0 = vunpack.i.l.bf16 %v8358_v50  ;;  %vm1813_vm9 = vcmp.lt.s32.totalorder %v4931_v13, 122 }
 0x183   : > { %1575 = vmatmul.f32.vlgmr.msra.gmra.mxu1 %v5642_v40  ;;  %vm2008_vm4 = vcmp.lt.s32.totalorder %v4931_v13, 56 }
 0x184   : > { %1630 = vmatpush.msra.mxu2 %v4612_v28  ;;  %1612 = vmatpush.msrb.mxu0 %v5988_v56  ;;  %v998_v56 = vsel %vm990_vm6, %v989_v29, %v8359_v0  ;;  %vm8363_vm6 = vcmp.lt.s32.totalorder %v4931_v13, 127 }
 0x185   : > { %vm8365_vm3 = vmmov %vm8363_vm6 }
 0x186   : > { %1631 = vmatpush.msra.mxu2 %v1064_v53  ;;  %1613 = vmatpush.msrb.mxu0 %v6027_v48  ;;  %v965_v48 = vsel %vm957_vm7, %v956_v60, %v8361_v43  ;;  %vm8364_vm7 = vmmov %vm8363_vm6 }
 0x187   : > { %vm8366_vm12 = vmmov %vm8365_vm3 }
 0x188   : > { %1632 = vmatpush.msra.mxu2 %v1031_v12  ;;  %1614 = vmatpush.msrb.mxu0 %v6050_v19  ;;  %v1396_v19 = vpop.f32.mrf.mxu3  ;;  %vm8367_vm1 = vmmov %vm8365_vm3 }
 0x189   : > { %1615 = vmatmul.f32.vlgmr.msrb.gmra.mxu0 %v5642_v40  ;;  %vm8368_vm14 = vmmov %vm8367_vm1 }
 0x18a   : > { %1633 = vmatpush.msra.mxu2 %v998_v56  ;;  %vm8369_vm15 = vmmov %vm8367_vm1 }
 0x18b   : > { %vm8370_vm5 = vmmov %vm8367_vm1 }
 0x18c   : > { %1634 = vmatpush.msra.mxu2 %v965_v48  ;;  %v1376_v36 = vpop.f32.mrf.mxu2 }
 0x18d   : > { %4017 = vmatmul.msk.f32.vlgmr.msra.gmra.mxu2 %vm8362_vm10, %v4613_v22  ;;  %v1397_v25 = vadd.f32 %v1396_v19, %v1376_v36  ;;  %vm1975_vm10 = vcmp.lt.s32.totalorder %v4931_v13, 58 }
 0x18f   : > { %1641 = vrot.lane.b32.xlu2 %v1397_v25, %s8200_s16 }
 0x190   : > { %v1436_v40 = vpop.f32.mrf.mxu3 }
 0x1a6   : > { %v1416_v24 = vpop.f32.mrf.mxu1 }
 0x1a7   : > { %v1437_v5 = vadd.f32 %v1436_v40, %v1416_v24 }
 0x1a9   : > { %1643 = vrot.lane.b32.xlu0 %v1437_v5, %s8200_s16 }
 0x1ae   : > { %v1336_v42 = vpop.f32.mrf.mxu0 }
 0x1af   : > { %v1357_v45 = vadd.f32 %v1356_v62, %v1336_v42 }
 0x1cc   : > { %v1496_v27 = vpop.f32.mrf.mxu3 }
 0x1ce   : > { %v1456_v59 = vpop.f32.mrf.mxu0 }
 0x1dd   : > { %v1476_v51 = vpop.f32.mrf.mxu2 }
 0x1de   : > { %v1477_v1 = vadd.f32 %v1476_v51, %v1456_v59 }
 0x1df   : > { %v1516_v61 = vpop.f32.mrf.mxu1 }
 0x1e0   : > { %1645 = vrot.lane.b32.xlu1 %v1477_v1, %s8200_s16  ;;  %v1517_v35 = vadd.f32 %v1516_v61, %v1496_v27 }
 0x1e2   : > { %1647 = vrot.lane.b32.xlu2 %v1517_v35, %s8200_s16 }
 0x1e8   : > { %1639 = vrot.lane.b32.xlu1 %v1357_v45, %s8200_s16  ;;  %v1556_v7 = vpop.f32.mrf.mxu0 }
 0x1e9   : > { %v1642_v34 = vpop.permute.xlu2 %1641 }
 0x1f0   : > { %1706 = vperm.xlu1 %4443, %v1703_v58  }
 0x1fe   : > { %v1536_v20 = vpop.f32.mrf.mxu2 }
 0x1ff   : > { %v1557_v10 = vadd.f32 %v1556_v7, %v1536_v20 }
 0x200   : > { %v1576_v26 = vpop.f32.mrf.mxu1 }
 0x201   : > { %1649 = vrot.lane.b32.xlu0 %v1557_v10, %s8200_s16 }
 0x204   : > { %v1596_v44 = vpop.f32.mrf.mxu3 }
 0x205   : > { %v1597_v46 = vadd.f32 %v1596_v44, %v1576_v26 }
 0x206   : > { %v1616_v14 = vpop.f32.mrf.mxu0 }
 0x207   : > { %1651 = vrot.lane.b32.xlu2 %v1597_v46, %s8200_s16 }
 0x210   : > { %v1636_v6 = vpop.f32.mrf.mxu2 }
 0x211   : > { %v1637_v49 = vadd.f32 %v1636_v6, %v1616_v14 }
 0x213   : > { %1653 = vrot.lane.b32.xlu0 %v1637_v49, %s8200_s16  ;;  %s4737_s16 = smov 120  }
 0x21b   : > { %v1644_v47 = vpop.permute.xlu0 %1643 }
 0x21c   : > { %v1660_v15 = vsel %vm8363_vm6, %v1642_v34, %v1644_v47  ;;  %vm8380_vm6 = vcmp.lt.s32.totalorder %v4931_v13, 60 }
 0x21d   : > { %v1664_v8 = vmax.f32 %v1397_v25, %v1660_v15 }
 0x21f   : > { %1673 = vrot.lane.b32.xlu1 %v1664_v8, %s8196_s26 }
 0x23c   : > { %v1648_v23 = vpop.permute.xlu2 %1647 }
 0x252   : > { %v1646_v54 = vpop.permute.xlu1 %1645 }
 0x253   : > { %v1659_v4 = vsel %vm8364_vm7, %v1644_v47, %v1646_v54  ;;  %v1658_v3 = vsel %vm8366_vm12, %v1646_v54, %v1648_v23  ;;  %vm8383_vm7 = vmmov %vm8380_vm6 }
 0x254   : > { %v1665_v55 = vmax.f32 %v1437_v5, %v1659_v4  ;;  %v1666_v11 = vmax.f32 %v1477_v1, %v1658_v3 }
 0x256   : > { %1675 = vrot.lane.b32.xlu2 %v1665_v55, %s8196_s26 }
 0x25a   : > { %v1640_v33 = vpop.permute.xlu1 %1639 }
 0x25b   : > { %v1661_v9 = vsel %vm8365_vm3, %v1640_v33, %v1642_v34  ;;  %vm8384_vm3 = vcmask 588800  }
 0x25c   : > { %v1663_v2 = vmax.f32 %v1357_v45, %v1661_v9  ;;  %vm8385_vm12 = vmmov %vm8384_vm3 }
 0x25e   : > { %1671 = vrot.lane.b32.xlu0 %v1663_v2, %s8196_s26 }
 0x261   : > { %v1652_v63 = vpop.permute.xlu2 %1651 }
 0x262   : > { %v6308_v16 = vpop.permute.xlu1 %1706 }
 0x266   : > { %1677 = vrot.lane.b32.xlu0 %v1666_v11, %s8196_s26 }
 0x273   : > { %v1650_v52 = vpop.permute.xlu0 %1649 }
 0x274   : > { %v1657_v32 = vsel %vm8367_vm1, %v1648_v23, %v1650_v52  ;;  %v1656_v29 = vsel %vm8368_vm14, %v1650_v52, %v1652_v63  ;;  %vm8394_vm1 = vmmov %vm8380_vm6 }
 0x275   : > { %v1667_v60 = vmax.f32 %v1517_v35, %v1657_v32  ;;  %v1668_v57 = vmax.f32 %v1557_v10, %v1656_v29  ;;  %vm8397_vm14 = vmmov %vm8384_vm3 }
 0x277   : > { %1679 = vrot.lane.b32.xlu2 %v1667_v60, %s8196_s26  ;;  %1681 = vrot.lane.b32.xlu1 %v1668_v57, %s8196_s26 }
 0x285   : > { %v1654_v37 = vpop.permute.xlu0 %1653 }
 0x286   : > { %v1655_v30 = vsel %vm8369_vm15, %v1652_v63, %v1654_v37  ;;  %v1662_v39 = vsel %vm8370_vm5, %v1654_v37, %v1640_v33  ;;  %vm8401_vm15 = vmmov %vm8384_vm3 }
 0x287   : > { %v6300_v31 = vmax.f32 %v1597_v46, %v1655_v30  ;;  %v6302_v28 = vmax.f32 %v1637_v49, %v1662_v39  ;;  %vm8403_vm5 = vmmov %vm8394_vm1 }
 0x289   : > { %1683 = vrot.lane.b32.xlu2 %v6300_v31, %s8196_s26  ;;  %1685 = vrot.lane.b32.xlu0 %v6302_v28, %s8196_s26  ;;  %s4736_s26 = smov 56  }
 0x291   : > { %v1674_v53 = vpop.permute.xlu1 %1673 }
 0x2b0   : > { %v1676_v38 = vpop.permute.xlu2 %1675 }
 0x2b1   : > { %v1692_v17 = vsel %vm594_vm8, %v1674_v53, %v1676_v38 }
 0x2b2   : > { %v1696_v18 = vmax.f32 %v1664_v8, %v1692_v17 }
 0x2b4   : > { %v1710_v0 = vadd.f32 %v6308_v16, %v1696_v18 }
 0x2b6   : > { %v6316_v41 = vmax.f32 %v1710_v0, 0.0 }
 0x2b8   : > { %8371 = vst [vmem:[#allocation23_spill] sm:$0xff] %v6316_v41 }
 0x2d0   : > { %v1672_v12 = vpop.permute.xlu0 %1671 }
 0x2d1   : > { %v1693_v50 = vsel %vm594_vm8, %v1672_v12, %v1674_v53  ;;  %v1680_v24 = vpop.permute.xlu2 %1679 }
 0x2d2   : > { %v1695_v56 = vmax.f32 %v1663_v2, %v1693_v50 }
 0x2d4   : > { %v1709_v62 = vadd.f32 %v6308_v16, %v1695_v56 }
 0x2d6   : > { %v6318_v43 = vmax.f32 %v1709_v62, 0.0 }
 0x2d8   : > { %8372 = vst [vmem:[#allocation19_spill] sm:$0xff] %v6318_v43  ;;  %v1678_v48 = vpop.permute.xlu0 %1677  ;;  %v4454_v22 = vpack.i.bf16 %v6316_v41, %v6318_v43 }
 0x2d9   : > { %v1691_v19 = vsel %vm594_vm8, %v1676_v38, %v1678_v48  ;;  %v1690_v42 = vsel %vm594_vm8, %v1678_v48, %v1680_v24 }
 0x2da   : > { %v1697_v36 = vmax.f32 %v1665_v55, %v1691_v19  ;;  %4455 = vrot.lane.b32.xlu1 %v4454_v22, %s8186_s19  ;;  %4450 = vrot.lane.b32.xlu0 %v4454_v22, %s4735_s15  ;;  %v1698_v59 = vmax.f32 %v1666_v11, %v1690_v42 }
 0x2db   : > { %4445 = vrot.lane.b32.xlu2 %v4454_v22, %s4736_s26 }
 0x2dc   : > { %v1711_v25 = vadd.f32 %v6308_v16, %v1697_v36  ;;  %v1712_v51 = vadd.f32 %v6308_v16, %v1698_v59 }
 0x2de   : > { %v6328_v40 = vmax.f32 %v1711_v25, 0.0  ;;  %v6341_v27 = vmax.f32 %v1712_v51, 0.0 }
 0x2e0   : > { %v4464_v5 = vpack.i.bf16 %v6328_v40, %v6316_v41  ;;  %v4489_v35 = vpack.i.bf16 %v6318_v43, %v6341_v27  ;;  %v4514_v26 = vpack.i.bf16 %v6341_v27, %v6328_v40 }
 0x2e2   : > { %4465 = vrot.lane.b32.xlu1 %v4464_v5, %s8191_s17  ;;  %4460 = vrot.lane.b32.xlu0 %v4454_v22, %s8187_s28 }
 0x2e3   : > { %4470 = vrot.lane.b32.xlu2 %v4464_v5, %s4737_s16  ;;  %v1684_v61 = vpop.permute.xlu2 %1683 }
 0x2e9   : > { %v1682_v1 = vpop.permute.xlu1 %1681 }
 0x2ea   : > { %4485 = vrot.lane.b32.xlu1 %v4464_v5, %s8199_s23  ;;  %4475 = vrot.lane.b32.xlu0 %v4464_v5, %s4738_s14  ;;  %v1688_v45 = vsel %vm594_vm8, %v1682_v1, %v1684_v61  ;;  %v1689_v58 = vsel %vm594_vm8, %v1680_v24, %v1682_v1 }
 0x2eb   : > { %4480 = vrot.lane.b32.xlu2 %v4464_v5, %s8194_s20  ;;  %v1699_v21 = vmax.f32 %v1667_v60, %v1689_v58  ;;  %v1700_v7 = vmax.f32 %v1668_v57, %v1688_v45 }
 0x2ed   : > { %v1713_v20 = vadd.f32 %v6308_v16, %v1699_v21  ;;  %v1714_v10 = vadd.f32 %v6308_v16, %v1700_v7 }
 0x2ef   : > { %v6359_v44 = vmax.f32 %v1713_v20, 0.0  ;;  %v6361_v46 = vmax.f32 %v1714_v10, 0.0 }
 0x2f1   : > { %v4534_v6 = vpack.i.bf16 %v6361_v46, %v6359_v44 }
 0x2f2   : > { %4490 = vrot.lane.b32.xlu1 %v4489_v35, %s8191_s17  ;;  %4495 = vrot.lane.b32.xlu0 %v4489_v35, %s4737_s16 }
 0x2f3   : > { %4500 = vrot.lane.b32.xlu2 %v4489_v35, %s4738_s14 }
 0x2fa   : > { %4510 = vrot.lane.b32.xlu1 %v4489_v35, %s8199_s23  ;;  %4505 = vrot.lane.b32.xlu0 %v4489_v35, %s8194_s20 }
 0x2fb   : > { %4515 = vrot.lane.b32.xlu2 %v4514_v26, %s4736_s26  ;;  %v1686_v14 = vpop.permute.xlu0 %1685 }
 0x2fc   : > { %v1687_v49 = vsel %vm594_vm8, %v1684_v61, %v1686_v14  ;;  %v1694_v34 = vsel %vm594_vm8, %v1686_v14, %v1672_v12  ;;  %vm1846_vm8 = vcmp.lt.s32.totalorder %v4931_v13, 120  ;;  %v3339_v13 = vld [vmem:[#allocation4 + $0x1f8] sm:$0xff] }
 0x2fd   : > { %v1701_v47 = vmax.f32 %v6300_v31, %v1687_v49  ;;  %v1702_v15 = vmax.f32 %v6302_v28, %v1694_v34 }
 0x2ff   : > { %v1715_v8 = vadd.f32 %v6308_v16, %v1701_v47  ;;  %v1716_v54 = vadd.f32 %v6308_v16, %v1702_v15 }
 0x301   : > { %v6379_v4 = vmax.f32 %v1715_v8, 0.0  ;;  %v6381_v55 = vmax.f32 %v1716_v54, 0.0 }
 0x302   : > { %4520 = vrot.lane.b32.xlu1 %v4514_v26, %s4735_s15  ;;  %4535 = vrot.lane.b32.xlu0 %v4534_v6, %s8191_s17 }
 0x303   : > { %4525 = vrot.lane.b32.xlu2 %v4514_v26, %s8186_s19  ;;  %v4559_v33 = vpack.i.bf16 %v6381_v55, %v6379_v4 }
 0x30a   : > { %4530 = vrot.lane.b32.xlu1 %v4514_v26, %s8187_s28  ;;  %4545 = vrot.lane.b32.xlu0 %v4534_v6, %s4738_s14 }
 0x30b   : > { %4540 = vrot.lane.b32.xlu2 %v4534_v6, %s4737_s16 }
 0x312   : > { %4550 = vrot.lane.b32.xlu1 %v4534_v6, %s8194_s20  ;;  %4560 = vrot.lane.b32.xlu0 %v4559_v33, %s8191_s17 }
 0x313   : > { %4555 = vrot.lane.b32.xlu2 %v4534_v6, %s8199_s23 }
 0x31a   : > { %4565 = vrot.lane.b32.xlu1 %v4559_v33, %s4737_s16  ;;  %4575 = vrot.lane.b32.xlu0 %v4559_v33, %s8194_s20  ;;  %s3923_s16 = scalar_lea.sflag [#allocation6], %s421_s6  ;;  %s4664_s20 = scalar_lea.hbm %s7999_s12, 2 }
 0x31b   : > { %4570 = vrot.lane.b32.xlu2 %v4559_v33, %s4738_s14 }
 0x322   : > { %4580 = vrot.lane.b32.xlu1 %v4534_v6, %s4736_s26  ;;  %4590 = vrot.lane.b32.xlu0 %v4534_v6, %s4735_s15 }
 0x323   : > { %4585 = vrot.lane.b32.xlu2 %v4559_v33, %s8199_s23 }
 0x32a   : > { %4595 = vrot.lane.b32.xlu1 %v4534_v6, %s8186_s19  ;;  %2004 = vrot.lane.b32.xlu0 %v6379_v4, %s4736_s26 }
 0x32b   : > { %4600 = vrot.lane.b32.xlu2 %v4534_v6, %s8187_s28 }
 0x332   : > { %1971 = vrot.lane.b32.xlu1 %v6379_v4, %s4735_s15  ;;  %1907 = vrot.lane.b32.xlu0 %v6379_v4, %s8187_s28 }
 0x333   : > { %1939 = vrot.lane.b32.xlu2 %v6379_v4, %s8186_s19 }
 0x335   : > { %v6404_v9 = vpop.permute.xlu2 %4445 }
 0x336   : > { %8373 = vst [vmem:[#allocation20_spill] sm:$0xff] %v6404_v9  ;;  %v4448_v48 = vunpack.i.h.bf16 %v6404_v9  ;;  %v8144_v22 = vunpack.i.l.bf16 %v6404_v9 }
 0x338   : > { %v6505_v35 = vsel %vm2008_vm4, %v8144_v22, %v4448_v48 }
 0x339   : > { %8378 = vst [vmem:[#allocation15_spill] sm:$0xff] %v6505_v35 }
 0x33a   : > { %2006 = vrot.lane.b32.xlu1 %v6381_v55, %s4736_s26  ;;  %1941 = vrot.lane.b32.xlu0 %v6381_v55, %s8186_s19 }
 0x33b   : > { %1973 = vrot.lane.b32.xlu2 %v6381_v55, %s4735_s15  ;;  %s422_s15 = scalar_lea.vmem [#allocation7], %s421_s6 }
 0x33c   : > { %s3933_s26 = sshll.u32 %s422_s15, 4  ;;  %s3934_s26 = int_to_ptr.vmem [resolvable:$true] %s3933_s26 }
 0x33d   : > { %v6412_v2 = vpop.permute.xlu2 %4470 }
 0x33e   : > { %v4473_v29 = vunpack.i.h.bf16 %v6412_v2  ;;  %v4472_v60 = vunpack.i.l.bf16 %v6412_v2 }
 0x340   : > { %v6446_v31 = vsel %vm1846_vm8, %v4472_v60, %v4473_v29 }
 0x342   : > { %1909 = vrot.lane.b32.xlu1 %v6381_v55, %s8187_s28 }
 0x345   : > { %v6416_v23 = vpop.permute.xlu2 %4480 }
 0x346   : > { %v4483_v38 = vunpack.i.h.bf16 %v6416_v23  ;;  %v4482_v53 = vunpack.i.l.bf16 %v6416_v23 }
 0x348   : > { %v6473_v62 = vsel %vm561_vm0, %v4482_v53, %v4483_v38 }
 0x34c   : > { %v6418_v3 = vpop.permute.xlu0 %4450  ;;  %v6420_v11 = vpop.permute.xlu1 %4455 }
 0x34d   : > { %8374 = vst [vmem:[#allocation22_spill] sm:$0xff] %v6418_v3  ;;  %v6422_v63 = vpop.permute.xlu2 %4500  ;;  %v4453_v24 = vunpack.i.h.bf16 %v6418_v3  ;;  %v8143_v5 = vunpack.i.l.bf16 %v6418_v3  ;;  %v4458_v1 = vunpack.i.h.bf16 %v6420_v11  ;;  %v8141_v58 = vunpack.i.l.bf16 %v6420_v11 }
 0x34e   : > { %8375 = vst [vmem:[#allocation24_spill] sm:$0xff] %v6420_v11  ;;  %v4502_v45 = vunpack.i.l.bf16 %v6422_v63 }
 0x34f   : > { %v6538_v14 = vsel %vm1975_vm10, %v8143_v5, %v4453_v24  ;;  %v6556_v34 = vsel %vm8380_vm6, %v8141_v58, %v4458_v1  ;;  %v4503_v58 = vunpack.i.h.bf16 %v6422_v63  ;;  %v6727_v63 = vld [vmem:[%s7990_s3 + $0x10] sm:$0xff]  ;;  %vm8404_vm6 = vmmov %vm8394_vm1 }
 0x350   : > { %8379 = vst [vmem:[#allocation18_spill] sm:$0xff] %v6538_v14 }
 0x351   : > { %8381 = vst [vmem:[#allocation16_spill] sm:$0xff] %v6556_v34 }
 0x354   : > { %v6424_v52 = vpop.permute.xlu0 %4460  ;;  %v6426_v32 = vpop.permute.xlu1 %4465 }
 0x355   : > { %8376 = vst [vmem:[#allocation21_spill] sm:$0xff] %v6424_v52  ;;  %v6430_v57 = vpop.permute.xlu2 %4515  ;;  %v4468_v37 = vunpack.i.h.bf16 %v6426_v32  ;;  %v4467_v30 = vunpack.i.l.bf16 %v6426_v32  ;;  %v4463_v10 = vunpack.i.h.bf16 %v6424_v52  ;;  %v8142_v26 = vunpack.i.l.bf16 %v6424_v52 }
 0x356   : > { %v8157_v32 = vunpack.i.l.bf16 %v6430_v57  ;;  %v8387_v11 = vunpack.i.l.bf16 %v6430_v57 }
 0x357   : > { %v6439_v39 = vsel %vm759_vm13, %v4467_v30, %v4468_v37 }
 0x358   : > { %2355 = vmatpush.msra.mxu3 %v6439_v39 }
 0x35a   : > { %2356 = vmatpush.msra.mxu3 %v6446_v31 }
 0x35c   : > { %v6449_v28 = vpop.permute.xlu0 %4475  ;;  %v6451_v16 = vpop.permute.xlu1 %4485 }
 0x35d   : > { %v4478_v17 = vunpack.i.h.bf16 %v6449_v28  ;;  %v4477_v18 = vunpack.i.l.bf16 %v6449_v28  ;;  %v6458_v12 = vpop.permute.xlu2 %4525  ;;  %v4488_v50 = vunpack.i.h.bf16 %v6451_v16  ;;  %v4487_v0 = vunpack.i.l.bf16 %v6451_v16  ;;  %v6668_v16 = vld [vmem:[%s7990_s3] sm:$0xff] }
 0x35f   : > { %v6466_v56 = vsel %vm1813_vm9, %v4477_v18, %v4478_v17  ;;  %v6482_v19 = vsel %vm495_vm2, %v4487_v0, %v4488_v50  ;;  %v6544_v6 = vsel %vm1813_vm9, %v4478_v17, %v4502_v45  ;;  %v6620_v2 = vsel %vm1813_vm9, %v4503_v58, %v4477_v18 }
 0x360   : > { %2357 = vmatpush.msra.mxu3 %v6466_v56  ;;  %8377 = vst [vmem:[#allocation25_spill] sm:$0xff] %v6482_v19  ;;  %v2014_v18 = vsel %vm2008_vm4, %v4448_v48, %v8157_v32 }
 0x362   : > { %2358 = vmatpush.msra.mxu3 %v6473_v62 }
 0x364   : > { %v6485_v36 = vpop.permute.xlu0 %4495  ;;  %v6487_v25 = vpop.permute.xlu1 %4490  ;;  %2359 = vmatpush.msra.mxu3 %v6482_v19 }
 0x365   : > { %v4497_v42 = vunpack.i.l.bf16 %v6485_v36  ;;  %v6493_v59 = vpop.permute.xlu2 %4540  ;;  %v4492_v51 = vunpack.i.l.bf16 %v6487_v25  ;;  %v8146_v49 = vunpack.i.h.bf16 %v6487_v25  ;;  %v8145_v8 = vunpack.i.h.bf16 %v6485_v36 }
 0x366   : > { %v4542_v61 = vunpack.i.l.bf16 %v6493_v59  ;;  %2360 = vmatpush.msra.mxu3 %v6316_v41  ;;  %v8156_v23 = vunpack.i.h.bf16 %v6493_v59 }
 0x367   : > { %v6512_v21 = vsel %vm1846_vm8, %v4473_v29, %v4497_v42  ;;  %v6518_v7 = vsel %vm759_vm13, %v4468_v37, %v4492_v51  ;;  %v6575_v37 = vsel %vm825_vm11, %v8142_v26, %v4463_v10  ;;  %v6584_v17 = vsel %vm759_vm13, %v8146_v49, %v4467_v30 }
 0x368   : > { %2361 = vmatpush.msra.mxu3 %v6505_v35  ;;  %2385 = vmatpush.msrb.mxu1 %v6512_v21  ;;  %v6526_v20 = vsel %vm1846_vm8, %v4497_v42, %v4542_v61  ;;  %8382 = vst [vmem:[#allocation17_spill] sm:$0xff] %v6575_v37  ;;  %v6604_v30 = vsel %vm1846_vm8, %v8145_v8, %v4472_v60 }
 0x369   : > { %2401 = vmatpush.msrb.mxu2 %v6518_v7  ;;  %2431 = vmatpush.msra.mxu0 %v6526_v20 }
 0x36a   : > { %2362 = vmatpush.msra.mxu3 %v6538_v14  ;;  %2386 = vmatpush.msrb.mxu1 %v6544_v6 }
 0x36b   : > { %2402 = vmatpush.msrb.mxu2 %v6512_v21 }
 0x36c   : > { %v6558_v47 = vpop.permute.xlu0 %4505  ;;  %v6560_v15 = vpop.permute.xlu1 %4510  ;;  %2363 = vmatpush.msra.mxu3 %v6556_v34  ;;  %v8389_v34 = vunpack.i.h.bf16 %v6493_v59 }
 0x36d   : > { %v4507_v54 = vunpack.i.l.bf16 %v6558_v47  ;;  %v6565_v33 = vpop.permute.xlu2 %4555  ;;  %v8147_v29 = vunpack.i.l.bf16 %v6560_v15  ;;  %2403 = vmatpush.msrb.mxu2 %v6544_v6  ;;  %v8149_v26 = vunpack.i.h.bf16 %v6558_v47  ;;  %v8148_v5 = vunpack.i.h.bf16 %v6560_v15 }
 0x36e   : > { %2364 = vmatpush.msra.mxu3 %v6575_v37 }
 0x36f   : > { %v6590_v42 = vsel %vm561_vm0, %v4483_v38, %v4507_v54  ;;  %v6610_v38 = vsel %vm495_vm2, %v4488_v50, %v8147_v29  ;;  %v8151_v50 = vunpack.i.l.bf16 %v6458_v12  ;;  %v6639_v28 = vsel %vm561_vm0, %v8149_v26, %v4482_v53 }
 0x370   : > { %2365 = vmatpush.msra.mxu3 %v6584_v17  ;;  %2387 = vmatpush.msrb.mxu1 %v6590_v42  ;;  %v6656_v53 = vsel %vm495_vm2, %v8148_v5, %v4487_v0 }
 0x371   : > { %2404 = vmatpush.msrb.mxu2 %v6590_v42 }
 0x372   : > { %2366 = vmatpush.msra.mxu3 %v6604_v30  ;;  %2388 = vmatpush.msrb.mxu1 %v6610_v38 }
 0x373   : > { %2405 = vmatpush.msrb.mxu2 %v6610_v38 }
 0x374   : > { %v6622_v60 = vpop.permute.xlu0 %4535  ;;  %v6624_v22 = vpop.permute.xlu1 %4520  ;;  %2367 = vmatpush.msra.mxu3 %v6620_v2  ;;  %2389 = vmatpush.msrb.mxu1 %v6328_v40 }
 0x375   : > { %v6629_v8 = vpop.permute.xlu2 %4570  ;;  %v8152_v49 = vunpack.i.l.bf16 %v6624_v22  ;;  %2406 = vmatpush.msrb.mxu2 %v6328_v40  ;;  %v8155_v26 = vunpack.i.l.bf16 %v6622_v60  ;;  %v4523_v32 = vunpack.i.h.bf16 %v6624_v22 }
 0x376   : > { %v8150_v29 = vunpack.i.h.bf16 %v6629_v8  ;;  %2368 = vmatpush.msra.mxu3 %v6639_v28  ;;  %2390 = vmatpush.msrb.mxu1 %v2014_v18  ;;  %v8167_v3 = vunpack.i.l.bf16 %v6629_v8 }
 0x377   : > { %2407 = vmatpush.msrb.mxu2 %v2014_v18  ;;  %v1981_v48 = vsel %vm1975_vm10, %v4453_v24, %v8152_v49  ;;  %v1948_v24 = vsel %vm8383_vm7, %v4458_v1, %v8151_v50  ;;  %v6722_v49 = vld [vmem:[%s7990_s3 + $0x8] sm:$0xff]  ;;  %vm8411_vm7 = vmmov %vm8384_vm3 }
 0x378   : > { %2369 = vmatpush.msra.mxu3 %v6656_v53  ;;  %2391 = vmatpush.msrb.mxu1 %v1981_v48  ;;  %v6674_v0 = vsel %vm1813_vm9, %v8150_v29, %v4503_v58  ;;  %v6690_v58 = vsel %vm1846_vm8, %v4542_v61, %v8156_v23 }
 0x379   : > { %2408 = vmatpush.msrb.mxu2 %v1981_v48 }
 0x37a   : > { %2370 = vmatpush.msra.mxu3 %v6318_v43  ;;  %2392 = vmatpush.msrb.mxu1 %v1948_v24 }
 0x37b   : > { %2409 = vmatpush.msrb.mxu2 %v1948_v24  ;;  %2371 = vmatmul.f32.vlgmr.msra.gmra.mxu3 %v6668_v16 }
 0x37c   : > { %2477 = vmatpush.msrb.mxu3 %v6690_v58  ;;  %v6693_v18 = vpop.permute.xlu0 %4545  ;;  %v6695_v48 = vpop.permute.xlu1 %4530 }
 0x37d   : > { %v8154_v1 = vunpack.i.h.bf16 %v6693_v18  ;;  %v4547_v24 = vunpack.i.l.bf16 %v6693_v18  ;;  %v8153_v5 = vunpack.i.l.bf16 %v6695_v48  ;;  %v8391_v59 = vunpack.i.h.bf16 %v6693_v18 }
 0x37f   : > { %v1916_v61 = vsel %vm825_vm11, %v4463_v10, %v8153_v5  ;;  %v6711_v29 = vsel %vm1813_vm9, %v4502_v45, %v4547_v24  ;;  %v6717_v50 = vsel %vm1813_vm9, %v4547_v24, %v8154_v1  ;;  %v6739_v45 = vsel %vm759_vm13, %v4492_v51, %v8155_v26 }
 0x380   : > { %2393 = vmatpush.msrb.mxu1 %v1916_v61  ;;  %2410 = vmatpush.msrb.mxu2 %v1916_v61  ;;  %v4557_v1 = vunpack.i.l.bf16 %v6565_v33  ;;  %v4558_v51 = vunpack.i.h.bf16 %v6565_v33 }
 0x381   : > { %2432 = vmatpush.msra.mxu0 %v6711_v29  ;;  %2478 = vmatpush.msrb.mxu3 %v6717_v50 }
 0x382   : > { %4018 = vmatmul.msk.f32.vlgmr.msrb.gmra.mxu1 %vm8384_vm3, %v6722_v49  ;;  %2411 = vmatpush.msrb.mxu2 %v6439_v39  ;;  %v6785_v23 = vsel %vm495_vm2, %v4557_v1, %v4558_v51 }
 0x383   : > { %2447 = vmatpush.msra.mxu1 %v6739_v45  ;;  %2374 = vmatmul.f32.gmra.mxu3 %v6727_v63 }
 0x384   : > { %v6744_v10 = vpop.permute.xlu0 %4560  ;;  %v4551_v24 = vpop.permute.xlu1 %4550  ;;  %2412 = vmatpush.msrb.mxu2 %v6446_v31 }
 0x385   : > { %2448 = vmatpush.msra.mxu1 %v6526_v20  ;;  %v4553_v61 = vunpack.i.h.bf16 %v4551_v24  ;;  %v4552_v5 = vunpack.i.l.bf16 %v4551_v24  ;;  %v6765_v24 = vld [vmem:[%s7990_s3 + $0x18] sm:$0xff]  ;;  %v4563_v43 = vunpack.i.h.bf16 %v6744_v10 }
 0x386   : > { %2413 = vmatpush.msrb.mxu2 %v6466_v56 }
 0x387   : > { %2449 = vmatpush.msra.mxu1 %v6711_v29  ;;  %v6756_v39 = vsel %vm561_vm0, %v4507_v54, %v4552_v5  ;;  %v6760_v26 = vsel %vm561_vm0, %v4552_v5, %v4553_v61  ;;  %v4518_v54 = vunpack.i.h.bf16 %v6430_v57  ;;  %v8386_v5 = vunpack.i.l.bf16 %v6560_v15 }
 0x388   : > { %2414 = vmatpush.msrb.mxu2 %v6473_v62  ;;  %2433 = vmatpush.msra.mxu0 %v6756_v39  ;;  %v8168_v57 = vunpack.i.h.bf16 %v6695_v48 }
 0x389   : > { %2450 = vmatpush.msra.mxu1 %v6756_v39  ;;  %2479 = vmatpush.msrb.mxu3 %v6760_v26  ;;  %v6779_v33 = vsel %vm495_vm2, %v8386_v5, %v4557_v1  ;;  %v6798_v1 = vpop.permute.xlu2 %4585  ;;  %v2013_v14 = vsel %vm2008_vm4, %v8387_v11, %v4518_v54  ;;  %v8390_v11 = vunpack.i.l.bf16 %v6624_v22  ;;  %v8392_v22 = vunpack.i.h.bf16 %v6458_v12 }
 0x38a   : > { %4019 = vmatmul.msk.f32.gmra.mxu1 %vm8385_vm12, %v6765_v24  ;;  %2415 = vmatpush.msrb.mxu2 %v6482_v19  ;;  %v8169_v5 = vunpack.i.l.bf16 %v6798_v1  ;;  %vm8420_vm12 = vmmov %vm8394_vm1 }
 0x38b   : > { %2434 = vmatpush.msra.mxu0 %v6779_v33  ;;  %2451 = vmatpush.msra.mxu1 %v6779_v33 }
 0x38c   : > { %2480 = vmatpush.msrb.mxu3 %v6785_v23  ;;  %v6789_v37 = vpop.permute.xlu0 %4575  ;;  %v6791_v52 = vpop.permute.xlu1 %4565  ;;  %2416 = vmatpush.msrb.mxu2 %v6316_v41  ;;  %v1980_v41 = vsel %vm1975_vm10, %v8390_v11, %v4523_v32 }
 0x38d   : > { %2435 = vmatpush.msra.mxu0 %v6341_v27  ;;  %2452 = vmatpush.msra.mxu1 %v6341_v27  ;;  %v8388_v35 = vunpack.i.l.bf16 %v6791_v52 }
 0x38e   : > { %2481 = vmatpush.msrb.mxu3 %v6359_v44  ;;  %2417 = vmatmul.f32.vlgmr.msrb.gmra.mxu2 %v6668_v16 }
 0x38f   : > { %2436 = vmatpush.msra.mxu0 %v2013_v14  ;;  %2453 = vmatpush.msra.mxu1 %v2013_v14  ;;  %v6814_v9 = vsel %vm1846_vm8, %v8389_v34, %v8388_v35  ;;  %v6829_v35 = vsel %vm1813_vm9, %v8391_v59, %v8167_v3  ;;  %v8393_v34 = vunpack.i.l.bf16 %v6458_v12  ;;  %v8396_v14 = vunpack.i.l.bf16 %v6695_v48 }
 0x390   : > { %2523 = vmatpush.msra.mxu2 %v6814_v9 }
 0x391   : > { %2437 = vmatpush.msra.mxu0 %v1980_v41  ;;  %2454 = vmatpush.msra.mxu1 %v1980_v41  ;;  %v1947_v11 = vsel %vm8394_vm1, %v8393_v34, %v8392_v22  ;;  %v8395_v41 = vunpack.i.l.bf16 %v6789_v37  ;;  %v1915_v22 = vsel %vm825_vm11, %v8396_v14, %v8168_v57  ;;  %v8398_v14 = vunpack.i.h.bf16 %v6622_v60  ;;  %vm8425_vm1 = vmmov %vm8384_vm3 }
 0x392   : > { %2524 = vmatpush.msra.mxu2 %v6829_v35  ;;  %v8399_v57 = vunpack.i.l.bf16 %v6622_v60 }
 0x393   : > { %2438 = vmatpush.msra.mxu0 %v1947_v11  ;;  %2455 = vmatpush.msra.mxu1 %v1947_v11  ;;  %v6843_v18 = vsel %vm561_vm0, %v4553_v61, %v8395_v41  ;;  %v6863_v41 = vsel %vm495_vm2, %v4558_v51, %v8169_v5 }
 0x394   : > { %v6845_v59 = vpop.permute.xlu0 %4590  ;;  %v6847_v3 = vpop.permute.xlu1 %4580  ;;  %2525 = vmatpush.msra.mxu2 %v6843_v18  ;;  %v6873_v11 = vsel %vm759_vm13, %v8399_v57, %v8398_v14 }
 0x395   : > { %v4592_v34 = vunpack.i.l.bf16 %v6845_v59  ;;  %v4582_v61 = vunpack.i.l.bf16 %v6847_v3  ;;  %2439 = vmatpush.msra.mxu0 %v1915_v22  ;;  %2456 = vmatpush.msra.mxu1 %v1915_v22  ;;  %v6881_v22 = vpop.permute.xlu2 %4600  ;;  %v8172_v5 = vunpack.i.h.bf16 %v6845_v59  ;;  %v8400_v14 = vunpack.i.h.bf16 %v6847_v3 }
 0x396   : > { %4020 = vmatmul.msk.f32.vlgmr.msra.gmra.mxu0 %vm8397_vm14, %v6722_v49  ;;  %2526 = vmatpush.msra.mxu2 %v6863_v41  ;;  %vm8440_vm14 = vmmov %vm8425_vm1 }
 0x397   : > { %2493 = vmatpush.msrb.mxu0 %v6873_v11  ;;  %2457 = vmatpush.msra.mxu1 %v6518_v7  ;;  %v2012_v51 = vsel %vm2008_vm4, %v4518_v54, %v4582_v61  ;;  %v1979_v57 = vsel %vm1975_vm10, %v4523_v32, %v4592_v34  ;;  %v6892_v7 = vsel %vm2008_vm4, %v4582_v61, %v8400_v14  ;;  %v4602_v54 = vunpack.i.l.bf16 %v6881_v22 }
 0x398   : > { %2482 = vmatpush.msrb.mxu3 %v2012_v51  ;;  %2527 = vmatpush.msra.mxu2 %v6361_v46  ;;  %v8402_v32 = vunpack.i.h.bf16 %v6458_v12  ;;  %v8405_v12 = vunpack.i.h.bf16 %v6791_v52 }
 0x399   : > { %2494 = vmatpush.msrb.mxu0 %v6690_v58  ;;  %2458 = vmatpush.msra.mxu1 %v6512_v21 }
 0x39a   : > { %2483 = vmatpush.msrb.mxu3 %v1979_v57  ;;  %2528 = vmatpush.msra.mxu2 %v6892_v7 }
 0x39b   : > { %2495 = vmatpush.msrb.mxu0 %v6717_v50  ;;  %2459 = vmatpush.msra.mxu1 %v6544_v6  ;;  %v6910_v6 = vsel %vm1975_vm10, %v4592_v34, %v8172_v5  ;;  %v4562_v5 = vunpack.i.l.bf16 %v6744_v10  ;;  %v8408_v10 = vunpack.i.h.bf16 %v6881_v22 }
 0x39c   : > { %2420 = vmatmul.f32.gmra.mxu2 %v6727_v63  ;;  %v6899_v21 = vpop.permute.xlu1 %4595 }
 0x39d   : > { %2496 = vmatpush.msrb.mxu0 %v6760_v26  ;;  %v8173_v61 = vunpack.i.h.bf16 %v6899_v21  ;;  %v4597_v14 = vunpack.i.l.bf16 %v6899_v21  ;;  %2460 = vmatpush.msra.mxu1 %v6590_v42 }
 0x39e   : > { %2529 = vmatpush.msra.mxu2 %v6910_v6  ;;  %4021 = vmatmul.msk.f32.gmra.mxu0 %vm8401_vm15, %v6765_v24 }
 0x39f   : > { %2497 = vmatpush.msrb.mxu0 %v6785_v23  ;;  %2461 = vmatpush.msra.mxu1 %v6610_v38  ;;  %v1946_v42 = vsel %vm8403_vm5, %v8402_v32, %v4597_v14  ;;  %v6926_v34 = vsel %vm8404_vm6, %v4597_v14, %v8173_v61  ;;  %v8406_v32 = vunpack.i.l.bf16 %v6791_v52  ;;  %v8407_v61 = vunpack.i.h.bf16 %v6695_v48  ;;  %vm8451_vm6 = vmmov %vm8425_vm1 }
 0x3a0   : > { %2484 = vmatpush.msrb.mxu3 %v1946_v42  ;;  %2530 = vmatpush.msra.mxu2 %v6926_v34  ;;  %v4588_v38 = vunpack.i.h.bf16 %v6798_v1 }
 0x3a1   : > { %2498 = vmatpush.msrb.mxu0 %v6359_v44  ;;  %2462 = vmatpush.msra.mxu1 %v6328_v40  ;;  %v6940_v14 = vsel %vm1846_vm8, %v8406_v32, %v8405_v12  ;;  %v1914_v19 = vsel %vm825_vm11, %v8407_v61, %v4602_v54  ;;  %v1913_v40 = vsel %vm825_vm11, %v4602_v54, %v8408_v10  ;;  %v8409_v12 = vunpack.i.h.bf16 %v6629_v8 }
 0x3a2   : > { %2485 = vmatpush.msrb.mxu3 %v1914_v19  ;;  %2531 = vmatpush.msra.mxu2 %v1913_v40  ;;  %v8410_v32 = vunpack.i.l.bf16 %v6629_v8  ;;  %v8412_v61 = vunpack.i.h.bf16 %v6622_v60  ;;  %v6972_v8 = vsel %vm759_vm13, %v4562_v5, %v4563_v43  ;;  %v8414_v10 = vunpack.i.l.bf16 %v6789_v37 }
 0x3a3   : > { %2569 = vmatpush.msrb.mxu1 %v6940_v14  ;;  %2499 = vmatpush.msrb.mxu0 %v2012_v51  ;;  %v8413_v51 = vunpack.i.h.bf16 %v6789_v37 }
 0x3a4   : > { %v6958_v48 = vsel %vm1813_vm9, %v8410_v32, %v8409_v12  ;;  %4022 = vmatmul.msk.f32.vlgmr.msrb.gmra.mxu3 %vm8411_vm7, %v6722_v49  ;;  %v6966_v54 = vsel %vm759_vm13, %v8412_v61, %v4562_v5  ;;  %2585 = vmatpush.msrb.mxu2 %v6972_v8  ;;  %v6984_v12 = vpop.permute.xlu0 %2004  ;;  %v8415_v5 = vunpack.i.l.bf16 %v6798_v1  ;;  %vm8416_vm9 = vmmov %vm8384_vm3 }
 0x3a5   : > { %2570 = vmatpush.msrb.mxu1 %v6958_v48  ;;  %2500 = vmatpush.msrb.mxu0 %v1979_v57  ;;  %v6980_v60 = vsel %vm561_vm0, %v8414_v10, %v8413_v51  ;;  %v8421_v51 = vunpack.i.h.bf16 %v6881_v22  ;;  %v8424_v22 = vunpack.i.h.bf16 %v6791_v52  ;;  %v8427_v52 = vunpack.i.h.bf16 %v6789_v37  ;;  %vm8453_vm7 = vmmov %vm8425_vm1 }
 0x3a6   : > { %2539 = vmatpush.msra.mxu3 %v6966_v54  ;;  %v6993_v57 = vsel %vm495_vm2, %v8415_v5, %v4588_v38  ;;  %2586 = vmatpush.msrb.mxu2 %v6940_v14 }
 0x3a7   : > { %2571 = vmatpush.msrb.mxu1 %v6980_v60  ;;  %2501 = vmatpush.msrb.mxu0 %v1946_v42  ;;  %v7002_v42 = vpop.permute.xlu1 %1971 }
 0x3a8   : > { %2540 = vmatpush.msra.mxu3 %v6814_v9  ;;  %2587 = vmatpush.msrb.mxu2 %v6958_v48 }
 0x3a9   : > { %2572 = vmatpush.msrb.mxu1 %v6993_v57  ;;  %2502 = vmatpush.msrb.mxu0 %v1914_v19  ;;  %v8417_v19 = vunpack.i.h.bf16 %v6847_v3  ;;  %v1940_v3 = vpop.permute.xlu2 %1939 }
 0x3aa   : > { %2541 = vmatpush.msra.mxu3 %v6829_v35  ;;  %2463 = vmatmul.f32.vlgmr.msra.gmra.mxu1 %v6668_v16 }
 0x3ab   : > { %2503 = vmatpush.msrb.mxu0 %v6739_v45  ;;  %2573 = vmatpush.msrb.mxu1 %v6379_v4  ;;  %v2010_v32 = vsel %vm2008_vm4, %v8417_v19, %v6984_v12  ;;  %v8418_v45 = vunpack.i.h.bf16 %v6845_v59 }
 0x3ac   : > { %2542 = vmatpush.msra.mxu3 %v6843_v18  ;;  %2588 = vmatpush.msrb.mxu2 %v6980_v60 }
 0x3ad   : > { %4023 = vmatmul.msk.f32.gmra.mxu3 %vm8416_vm9, %v6765_v24  ;;  %2504 = vmatpush.msrb.mxu0 %v6526_v20  ;;  %v1977_v61 = vsel %vm1975_vm10, %v8418_v45, %v7002_v42  ;;  %v7023_v20 = vpop.permute.xlu0 %1907 }
 0x3ae   : > { %2543 = vmatpush.msra.mxu3 %v6863_v41  ;;  %2574 = vmatpush.msrb.mxu1 %v2010_v32 }
 0x3af   : > { %2589 = vmatpush.msrb.mxu2 %v6993_v57  ;;  %2505 = vmatpush.msrb.mxu0 %v6711_v29  ;;  %v8419_v29 = vunpack.i.h.bf16 %v6899_v21 }
 0x3b0   : > { %2544 = vmatpush.msra.mxu3 %v6361_v46  ;;  %2575 = vmatpush.msrb.mxu1 %v1977_v61 }
 0x3b1   : > { %2590 = vmatpush.msrb.mxu2 %v6379_v4  ;;  %2506 = vmatpush.msrb.mxu0 %v6756_v39  ;;  %v1944_v59 = vsel %vm8420_vm12, %v8419_v29, %v1940_v3  ;;  %v1912_v39 = vsel %vm825_vm11, %v8421_v51, %v7023_v20 }
 0x3b2   : > { %4024 = vmatmul.msk.f32.vlgmr.msra.gmra.mxu2 %vm8384_vm3, %v6722_v49  ;;  %2545 = vmatpush.msra.mxu3 %v6892_v7  ;;  %v8422_v7 = vunpack.i.h.bf16 %v6487_v25 }
 0x3b3   : > { %2576 = vmatpush.msrb.mxu1 %v1944_v59  ;;  %2591 = vmatpush.msrb.mxu2 %v2010_v32 }
 0x3b4   : > { %2466 = vmatmul.f32.gmra.mxu1 %v6727_v63  ;;  %2507 = vmatpush.msrb.mxu0 %v6779_v33  ;;  %v7046_v21 = vsel %vm759_vm13, %v4563_v43, %v8422_v7  ;;  %v8423_v33 = vunpack.i.h.bf16 %v6485_v36  ;;  %v2007_v43 = vpop.permute.xlu1 %2006 }
 0x3b5   : > { %2546 = vmatpush.msra.mxu3 %v6910_v6  ;;  %2577 = vmatpush.msrb.mxu1 %v1912_v39  ;;  %v8428_v6 = vunpack.i.h.bf16 %v6560_v15  ;;  %v1974_v15 = vpop.permute.xlu2 %1973  ;;  %v1942_v37 = vpop.permute.xlu0 %1941 }
 0x3b6   : > { %2592 = vmatpush.msrb.mxu2 %v1977_v61  ;;  %2508 = vmatpush.msrb.mxu0 %v6341_v27  ;;  %v7058_v25 = vsel %vm1846_vm8, %v8424_v22, %v8423_v33  ;;  %v8426_v27 = vunpack.i.h.bf16 %v6558_v47  ;;  %vm8430_vm8 = vmmov %vm8425_vm1 }
 0x3b7   : > { %2631 = vmatpush.msra.mxu1 %v7046_v21  ;;  %2547 = vmatpush.msra.mxu3 %v6926_v34  ;;  %v7085_v47 = vsel %vm495_vm2, %v4588_v38, %v8428_v6  ;;  %v8446_v34 = vld [vmem:[#allocation21_spill] sm:$0xff] }
 0x3b8   : > { %2593 = vmatpush.msrb.mxu2 %v1944_v59  ;;  %2509 = vmatmul.f32.vlgmr.msrb.gmra.mxu0 %v6668_v16  ;;  %v7073_v36 = vsel %vm561_vm0, %v8427_v52, %v8426_v27  ;;  %vm8429_vm0 = vmmov %vm8403_vm5  ;;  %v8447_v38 = vunpack.i.l.bf16 %v8446_v34 }
 0x3b9   : > { %2615 = vmatpush.msra.mxu0 %v7058_v25  ;;  %2632 = vmatpush.msra.mxu1 %v7058_v25  ;;  %vm8444_vm15 = vmmov %vm8429_vm0 }
 0x3ba   : > { %2548 = vmatpush.msra.mxu3 %v1913_v40  ;;  %2594 = vmatpush.msrb.mxu2 %v1912_v39  ;;  %v8448_v40 = vld [vmem:[#allocation17_spill] sm:$0xff]  ;;  %vm8450_vm5 = vmmov %vm8425_vm1 }
 0x3bb   : > { %4025 = vmatmul.msk.f32.gmra.mxu2 %vm8425_vm1, %v6765_v24  ;;  %2616 = vmatpush.msra.mxu0 %v6674_v0 }
 0x3bc   : > { %2633 = vmatpush.msra.mxu1 %v6674_v0  ;;  %2549 = vmatpush.msra.mxu3 %v6873_v11 }
 0x3bd   : > { %2595 = vmatpush.msrb.mxu2 %v6966_v54  ;;  %2617 = vmatpush.msra.mxu0 %v7073_v36 }
 0x3be   : > { %2634 = vmatpush.msra.mxu1 %v7073_v36  ;;  %2550 = vmatpush.msra.mxu3 %v6690_v58  ;;  %v1910_v58 = vpop.permute.xlu1 %1909 }
 0x3bf   : > { %2596 = vmatpush.msrb.mxu2 %v6814_v9  ;;  %2618 = vmatpush.msra.mxu0 %v7085_v47  ;;  %v2009_v9 = vsel %vm2008_vm4, %v6984_v12, %v2007_v43 }
 0x3c0   : > { %2635 = vmatpush.msra.mxu1 %v7085_v47  ;;  %2551 = vmatpush.msra.mxu3 %v6717_v50  ;;  %v1976_v50 = vsel %vm1975_vm10, %v7002_v42, %v1974_v15 }
 0x3c1   : > { %2597 = vmatpush.msrb.mxu2 %v6829_v35  ;;  %2512 = vmatmul.f32.gmra.mxu0 %v6727_v63 }
 0x3c2   : > { %2619 = vmatpush.msra.mxu0 %v6381_v55  ;;  %2636 = vmatpush.msra.mxu1 %v6381_v55 }
 0x3c3   : > { %2552 = vmatpush.msra.mxu3 %v6760_v26  ;;  %2598 = vmatpush.msrb.mxu2 %v6843_v18  ;;  %v1943_v26 = vsel %vm8429_vm0, %v1940_v3, %v1942_v37 }
 0x3c4   : > { %2620 = vmatpush.msra.mxu0 %v2009_v9  ;;  %2637 = vmatpush.msra.mxu1 %v2009_v9 }
 0x3c5   : > { %2553 = vmatpush.msra.mxu3 %v6785_v23  ;;  %2599 = vmatpush.msrb.mxu2 %v6863_v41  ;;  %v1911_v23 = vsel %vm825_vm11, %v7023_v20, %v1910_v58  ;;  %v8445_v41 = vld [vmem:[#allocation16_spill] sm:$0xff] }
 0x3c6   : > { %2621 = vmatpush.msra.mxu0 %v1976_v50  ;;  %2638 = vmatpush.msra.mxu1 %v1976_v50 }
 0x3c7   : > { %2554 = vmatpush.msra.mxu3 %v6359_v44  ;;  %2600 = vmatpush.msrb.mxu2 %v6361_v46  ;;  %v8431_v44 = vld [vmem:[#allocation25_spill] sm:$0xff]  ;;  %v8432_v46 = vld [vmem:[#allocation19_spill] sm:$0xff] }
 0x3c8   : > { %2555 = vmatmul.f32.vlgmr.msra.gmra.mxu3 %v6668_v16  ;;  %2622 = vmatpush.msra.mxu0 %v1943_v26 }
 0x3c9   : > { %2639 = vmatpush.msra.mxu1 %v1943_v26  ;;  %2661 = vmatpush.msrb.mxu3 %v6604_v30 }
 0x3ca   : > { %2707 = vmatpush.msra.mxu2 %v6446_v31  ;;  %2623 = vmatpush.msra.mxu0 %v1911_v23  ;;  %v8433_v31 = vld [vmem:[#allocation23_spill] sm:$0xff] }
 0x3cb   : > { %2640 = vmatpush.msra.mxu1 %v1911_v23  ;;  %2662 = vmatpush.msrb.mxu3 %v6620_v2 }
 0x3cc   : > { %2708 = vmatpush.msra.mxu2 %v6466_v56  ;;  %2677 = vmatpush.msrb.mxu0 %v6584_v17  ;;  %v8434_v56 = vld [vmem:[#allocation20_spill] sm:$0xff] }
 0x3cd   : > { %2641 = vmatpush.msra.mxu1 %v6972_v8  ;;  %2663 = vmatpush.msrb.mxu3 %v6639_v28 }
 0x3ce   : > { %2709 = vmatpush.msra.mxu2 %v6473_v62  ;;  %2678 = vmatpush.msrb.mxu0 %v6604_v30  ;;  %v8435_v62 = vunpack.i.l.bf16 %v8434_v56  ;;  %v8436_v30 = vld [vmem:[#allocation15_spill] sm:$0xff] }
 0x3cf   : > { %4026 = vmatmul.msk.f32.vlgmr.msrb.gmra.mxu1 %vm8430_vm8, %v6722_v49  ;;  %2664 = vmatpush.msrb.mxu3 %v6656_v53 }
 0x3d0   : > { %2642 = vmatpush.msra.mxu1 %v6940_v14  ;;  %2710 = vmatpush.msra.mxu2 %v8431_v44  ;;  %v2016_v17 = vsel %vm2008_vm4, %v2007_v43, %v8435_v62  ;;  %vm8441_vm4 = vmmov %vm8425_vm1  ;;  %v1918_v14 = vsel %vm825_vm11, %v1910_v58, %v8447_v38  ;;  %v2851_v62 = vld [vmem:[%s7991_s4] sm:$0xff] }
 0x3d1   : > { %2679 = vmatpush.msrb.mxu0 %v6620_v2  ;;  %2558 = vmatmul.f32.gmra.mxu3 %v6727_v63  ;;  %v8437_v2 = vld [vmem:[#allocation22_spill] sm:$0xff]  ;;  %vm8452_vm11 = vmmov %vm8425_vm1 }
 0x3d2   : > { %2601 = vmatmul.f32.vlgmr.msrb.gmra.mxu2 %v6668_v16  ;;  %2643 = vmatpush.msra.mxu1 %v6958_v48  ;;  %v8438_v1 = vunpack.i.l.bf16 %v8437_v2 }
 0x3d3   : > { %2665 = vmatpush.msrb.mxu3 %v8432_v46  ;;  %2711 = vmatpush.msra.mxu2 %v8433_v31 }
 0x3d4   : > { %2680 = vmatpush.msrb.mxu0 %v6639_v28  ;;  %2644 = vmatpush.msra.mxu1 %v6980_v60  ;;  %v1983_v35 = vsel %vm1975_vm10, %v1974_v15, %v8438_v1  ;;  %v8439_v28 = vld [vmem:[#allocation18_spill] sm:$0xff]  ;;  %vm8449_vm10 = vmmov %vm8425_vm1 }
 0x3d5   : > { %2666 = vmatpush.msrb.mxu3 %v2016_v17  ;;  %2712 = vmatpush.msra.mxu2 %v8436_v30 }
 0x3d6   : > { %2681 = vmatpush.msrb.mxu0 %v6656_v53  ;;  %2645 = vmatpush.msra.mxu1 %v6993_v57  ;;  %v8442_v53 = vld [vmem:[#allocation24_spill] sm:$0xff] }
 0x3d7   : > { %2667 = vmatpush.msrb.mxu3 %v1983_v35  ;;  %2713 = vmatpush.msra.mxu2 %v8439_v28  ;;  %v8443_v18 = vunpack.i.l.bf16 %v8442_v53 }
 0x3d8   : > { %2682 = vmatpush.msrb.mxu0 %v8432_v46  ;;  %4027 = vmatmul.msk.f32.gmra.mxu1 %vm8440_vm14, %v6765_v24  ;;  %v2852_v46 = vld [vmem:[%s7991_s4 + $0x8] sm:$0xff] }
 0x3d9   : > { %4028 = vmatmul.msk.f32.vlgmr.msra.gmra.mxu0 %vm8441_vm4, %v6722_v49  ;;  %2646 = vmatpush.msra.mxu1 %v6379_v4  ;;  %v1950_v11 = vsel %vm8444_vm15, %v1942_v37, %v8443_v18 }
 0x3da   : > { %2668 = vmatpush.msrb.mxu3 %v1950_v11  ;;  %2714 = vmatpush.msra.mxu2 %v8445_v41 }
 0x3db   : > { %2683 = vmatpush.msrb.mxu0 %v2016_v17  ;;  %2604 = vmatmul.f32.gmra.mxu2 %v6727_v63 }
 0x3dc   : > { %2669 = vmatpush.msrb.mxu3 %v1918_v14  ;;  %2715 = vmatpush.msra.mxu2 %v8448_v40 }
 0x3dd   : > { %4030 = vmatmul.msk.f32.vlgmr.msrb.gmra.mxu3 %vm8449_vm10, %v6722_v49  ;;  %2684 = vmatpush.msrb.mxu0 %v1983_v35 }
 0x3df   : > { %2685 = vmatpush.msrb.mxu0 %v1950_v11 }
 0x3e0   : > { %2647 = vmatmul.f32.vlgmr.msra.gmra.mxu1 %v6668_v16 }
 0x3e1   : > { %2686 = vmatpush.msrb.mxu0 %v1918_v14 }
 0x3e2   : > { %4029 = vmatmul.msk.f32.gmra.mxu0 %vm8450_vm5, %v6765_v24 }
 0x3e3   : > { %2687 = vmatpush.msrb.mxu0 %v7046_v21  ;;  %4032 = vmatmul.msk.f32.vlgmr.msra.gmra.mxu2 %vm8451_vm6, %v6722_v49 }
 0x3e5   : > { %4031 = vmatmul.msk.f32.gmra.mxu3 %vm8452_vm11, %v6765_v24  ;;  %2688 = vmatpush.msrb.mxu0 %v7058_v25 }
 0x3e7   : > { %2689 = vmatpush.msrb.mxu0 %v6674_v0 }
 0x3e8   : > { %2650 = vmatmul.f32.gmra.mxu1 %v6727_v63 }
 0x3e9   : > { %2690 = vmatpush.msrb.mxu0 %v7073_v36 }
 0x3eb   : > { %2691 = vmatpush.msrb.mxu0 %v7085_v47  ;;  %4033 = vmatmul.msk.f32.gmra.mxu2 %vm8453_vm7, %v6765_v24 }
 0x3ed   : > { %2692 = vmatpush.msrb.mxu0 %v6381_v55 }
 0x3ee   : > { %2693 = vmatmul.f32.vlgmr.msrb.gmra.mxu0 %v6668_v16 }
 0x3f6   : > { %2696 = vmatmul.f32.gmra.mxu0 %v6727_v63 }
 0x3fe   : > { %v2372_v4 = vpop.f32.mrf.mxu3 }
 0x3ff   : > { %v2395_v49 = vpop.f32.mrf.mxu1 }
 0x400   : > { %v7184_v48 = vadd.f32 %v2395_v49, %v2372_v4 }
 0x402   : > { %2723 = vrot.lane.b32.xlu2 %v7184_v48, %s8199_s23 }
 0x406   : > { %v2375_v0 = vpop.f32.mrf.mxu3 }
 0x407   : > { %v2398_v54 = vpop.f32.mrf.mxu1 }
 0x408   : > { %v7188_v8 = vadd.f32 %v2398_v54, %v2375_v0 }
 0x40a   : > { %2725 = vrot.lane.b32.xlu1 %v7188_v8, %s8199_s23 }
 0x411   : > { %v2418_v24 = vpop.f32.mrf.mxu2 }
 0x413   : > { %v2441_v55 = vpop.f32.mrf.mxu0 }
 0x414   : > { %v7192_v10 = vadd.f32 %v2441_v55, %v2418_v24 }
 0x416   : > { %2727 = vrot.lane.b32.xlu0 %v7192_v10, %s8199_s23 }
 0x41b   : > { %v2444_v16 = vpop.f32.mrf.mxu0 }
 0x41f   : > { %v2421_v63 = vpop.f32.mrf.mxu2 }
 0x420   : > { %v7196_v60 = vadd.f32 %v2444_v16, %v2421_v63 }
 0x422   : > { %2729 = vrot.lane.b32.xlu2 %v7196_v60, %s8199_s23 }
 0x427   : > { %v2464_v12 = vpop.f32.mrf.mxu1  ;;  %v2487_v5 = vpop.f32.mrf.mxu3 }
 0x428   : > { %v2488_v57 = vadd.f32 %v2487_v5, %v2464_v12 }
 0x42a   : > { %2731 = vrot.lane.b32.xlu1 %v2488_v57, %s8199_s23 }
 0x430   : > { %v2490_v42 = vpop.f32.mrf.mxu3 }
 0x431   : > { %v2467_v19 = vpop.f32.mrf.mxu1 }
 0x432   : > { %v7201_v32 = vadd.f32 %v2490_v42, %v2467_v19 }
 0x434   : > { %2733 = vrot.lane.b32.xlu0 %v7201_v32, %s8199_s23 }
 0x435   : > { %v2510_v45 = vpop.f32.mrf.mxu0  ;;  %v2533_v61 = vpop.f32.mrf.mxu2 }
 0x436   : > { %v7205_v3 = vadd.f32 %v2533_v61, %v2510_v45  ;;  %v2910_v45 = vld [vmem:[%s7992_s5 + $0x78] sm:$0xff]  ;;  %v2909_v61 = vld [vmem:[%s7992_s5 + $0x70] sm:$0xff] }
 0x437   : > { %3023 = vmatpush.msra.mxu3 %v2910_v45  ;;  %v2954_v45 = vld [vmem:[%s7992_s5 + $0x1d8] sm:$0xff] }
 0x438   : > { %2735 = vrot.lane.b32.xlu2 %v7205_v3, %s8199_s23 }
 0x439   : > { %3024 = vmatpush.msra.mxu3 %v2909_v61  ;;  %v2916_v61 = vld [vmem:[%s7992_s5 + $0xa8] sm:$0xff] }
 0x43e   : > { %v2513_v20 = vpop.f32.mrf.mxu0  ;;  %v2536_v29 = vpop.f32.mrf.mxu2 }
 0x43f   : > { %v7209_v59 = vadd.f32 %v2536_v29, %v2513_v20  ;;  %v2907_v29 = vld [vmem:[%s7992_s5 + $0x60] sm:$0xff] }
 0x441   : > { %2737 = vrot.lane.b32.xlu1 %v7209_v59, %s8199_s23 }
 0x44b   : > { %v2556_v51 = vpop.f32.mrf.mxu3 }
 0x44c   : > { %v2579_v39 = vpop.f32.mrf.mxu1 }
 0x44d   : > { %v7213_v7 = vadd.f32 %v2579_v39, %v2556_v51  ;;  %v2905_v51 = vld [vmem:[%s7992_s5 + $0x50] sm:$0xff] }
 0x44f   : > { %2739 = vrot.lane.b32.xlu0 %v7213_v7, %s8199_s23 }
 0x454   : > { %v2559_v21 = vpop.f32.mrf.mxu3 }
 0x455   : > { %v2582_v33 = vpop.f32.mrf.mxu1  ;;  %v2602_v22 = vpop.f32.mrf.mxu2 }
 0x456   : > { %v2583_v25 = vadd.f32 %v2582_v33, %v2559_v21  ;;  %v2625_v43 = vpop.f32.mrf.mxu0  ;;  %v2904_v21 = vld [vmem:[%s7992_s5 + $0x48] sm:$0xff] }
 0x457   : > { %v7217_v27 = vadd.f32 %v2625_v43, %v2602_v22  ;;  %v2903_v22 = vld [vmem:[%s7992_s5 + $0x40] sm:$0xff]  ;;  %v2926_v43 = vld [vmem:[%s7992_s5 + $0xf8] sm:$0xff] }
 0x458   : > { %2741 = vrot.lane.b32.xlu2 %v2583_v25, %s8199_s23  ;;  %3046 = vmatpush.msrb.mxu1 %v2926_v43  ;;  %v2952_v43 = vld [vmem:[%s7992_s5 + $0x1c8] sm:$0xff] }
 0x459   : > { %2743 = vrot.lane.b32.xlu0 %v7217_v27, %s8199_s23 }
 0x45c   : > { %v7248_v30 = vpop.permute.xlu2 %2723 }
 0x45d   : > { %v2648_v52 = vpop.f32.mrf.mxu1 }
 0x45e   : > { %v2605_v36 = vpop.f32.mrf.mxu2 }
 0x45f   : > { %v2628_v6 = vpop.f32.mrf.mxu0 }
 0x460   : > { %v7222_v47 = vadd.f32 %v2628_v6, %v2605_v36  ;;  %v2671_v9 = vpop.f32.mrf.mxu3 }
 0x461   : > { %v7224_v15 = vadd.f32 %v2671_v9, %v2648_v52  ;;  %v2901_v52 = vld [vmem:[%s7992_s5 + $0x30] sm:$0xff]  ;;  %v2900_v9 = vld [vmem:[%s7992_s5 + $0x28] sm:$0xff] }
 0x462   : > { %2745 = vrot.lane.b32.xlu2 %v7222_v47, %s8199_s23 }
 0x463   : > { %2747 = vrot.lane.b32.xlu1 %v7224_v15, %s8199_s23 }
 0x465   : > { %v2651_v37 = vpop.f32.mrf.mxu1 }
 0x466   : > { %v2717_v50 = vpop.f32.mrf.mxu2 }
 0x468   : > { %v2674_v58 = vpop.f32.mrf.mxu3 }
 0x469   : > { %v7230_v26 = vadd.f32 %v2674_v58, %v2651_v37  ;;  %v2899_v58 = vld [vmem:[%s7992_s5 + $0x20] sm:$0xff] }
 0x46a   : > { %2860 = vperm.xlu2 %4605, %v2852_v46  }
 0x46b   : > { %v2694_v23 = vpop.f32.mrf.mxu0  ;;  %2749 = vrot.lane.b32.xlu1 %v7230_v26, %s8199_s23 }
 0x46c   : > { %v7234_v44 = vadd.f32 %v2717_v50, %v2694_v23  ;;  %v2924_v23 = vld [vmem:[%s7992_s5 + $0xe8] sm:$0xff] }
 0x46e   : > { %2751 = vrot.lane.b32.xlu0 %v7234_v44, %s8199_s23  ;;  %v2720_v31 = vpop.f32.mrf.mxu2 }
 0x473   : > { %v2697_v56 = vpop.f32.mrf.mxu0 }
 0x474   : > { %v7244_v17 = vadd.f32 %v2720_v31, %v2697_v56 }
 0x476   : > { %2753 = vrot.lane.b32.xlu1 %v7244_v17, %s8199_s23  ;;  %2855 = vperm.xlu0 %4604, %v2851_v62   ;;  %s3935_s23 = sshll.u32 %s3931_s18, 4  ;;  %s3936_s23 = int_to_ptr.hbm [resolvable:$true] %s3935_s23 }
 0x477   : > { %s4658_s14 = sshra.s32 %s3936_s23, 4  ;;  %s4659_s14 = int_to_ptr.hbm [resolvable:$true] %s4658_s14 }
 0x478   : > { %s4660_s19 = scalar_lea.hbm %s4659_s14, 1  ;;  %p4665_p3 = scmp.lt.s32.totalorder %s4659_s14, %s7999_s12 }
 0x479   : > { %p4661_p0 = scmp.ne.s32.totalorder %s4659_s14, %s4660_s19  ;;  %p4666_p4 = scmp.lt.s32.totalorder %s4664_s20, %s4660_s19 }
 0x47b   : > { %p4662_p1 = pnand %p4661_p0, %p4842_p5  ;;  %p4667_p7 = por %p4666_p4, %p4665_p3 }
 0x47c   : > { %v2730_v28 = vpop.permute.xlu2 %2729  ;;  %v7258_v53 = vpop.permute.xlu1 %2725 }
 0x47d   : > { %v2768_v40 = vsel %vm495_vm2, %v7258_v53, %v2730_v28  ;;  %p4663_p2 = pneg %p4662_p1 }
 0x47e   : > { %v7277_v4 = vmax.f32 %v7188_v8, %v2768_v40 }
 0x47f   : > { %p4668_p8 = pnand %p4667_p7, %p4663_p2 }
 0x488   : > { %v2728_v2 = vpop.permute.xlu0 %2727 }
 0x489   : > { %v2767_v1 = vsel %vm495_vm2, %v7248_v30, %v2728_v2 }
 0x48a   : > { %v7254_v35 = vmax.f32 %v7184_v48, %v2767_v1  ;;  %v2941_v1 = vld [vmem:[%s7992_s5 + $0x170] sm:$0xff] }
 0x48c   : > { %2787 = vrot.lane.b32.xlu1 %v7254_v35, %s8191_s17 }
 0x492   : > { %v2736_v18 = vpop.permute.xlu2 %2735 }
 0x49c   : > { %v2732_v11 = vpop.permute.xlu1 %2731 }
 0x49d   : > { %v2763_v41 = vsel %vm495_vm2, %v2732_v11, %v2736_v18  ;;  %v2765_v34 = vsel %vm495_vm2, %v2728_v2, %v2732_v11  ;;  %v2898_v2 = vld [vmem:[%s7992_s5 + $0x18] sm:$0xff]  ;;  %v2940_v11 = vld [vmem:[%s7992_s5 + $0x168] sm:$0xff] }
 0x49e   : > { %v7265_v38 = vmax.f32 %v7192_v10, %v2765_v34  ;;  %v7267_v14 = vmax.f32 %v2488_v57, %v2763_v41  ;;  %v2939_v41 = vld [vmem:[%s7992_s5 + $0x160] sm:$0xff]  ;;  %v2958_v34 = vld [vmem:[%s7992_s5 + $0x1f8] sm:$0xff] }
 0x49f   : > { %3092 = vmatpush.msra.mxu0 %v2958_v34  ;;  %v2944_v34 = vld [vmem:[%s7992_s5 + $0x188] sm:$0xff] }
 0x4a0   : > { %2791 = vrot.lane.b32.xlu2 %v7265_v38, %s8191_s17  ;;  %2795 = vrot.lane.b32.xlu1 %v7267_v14, %s8191_s17 }
 0x4a6   : > { %v2734_v49 = vpop.permute.xlu0 %2733 }
 0x4a7   : > { %v2766_v48 = vsel %vm495_vm2, %v2730_v28, %v2734_v49  ;;  %v2896_v28 = vld [vmem:[%s7992_s5 + $0x8] sm:$0xff] }
 0x4a8   : > { %v7282_v0 = vmax.f32 %v7196_v60, %v2766_v48  ;;  %2789 = vrot.lane.b32.xlu2 %v7277_v4, %s8191_s17  ;;  %v2920_v48 = vld [vmem:[%s7992_s5 + $0xc8] sm:$0xff] }
 0x4aa   : > { %2793 = vrot.lane.b32.xlu0 %v7282_v0, %s8191_s17 }
 0x4b2   : > { %v2742_v54 = vpop.permute.xlu2 %2741 }
 0x4b3   : > { %v2738_v24 = vpop.permute.xlu1 %2737 }
 0x4b4   : > { %v2762_v55 = vsel %vm495_vm2, %v2738_v24, %v2742_v54  ;;  %v2764_v8 = vsel %vm495_vm2, %v2734_v49, %v2738_v24  ;;  %v2895_v49 = vld [vmem:[%s7992_s5] sm:$0xff] }
 0x4b5   : > { %v7293_v10 = vmax.f32 %v7201_v32, %v2764_v8  ;;  %v7296_v16 = vmax.f32 %v7209_v59, %v2762_v55  ;;  %v2906_v59 = vld [vmem:[%s7992_s5 + $0x58] sm:$0xff] }
 0x4b7   : > { %2797 = vrot.lane.b32.xlu0 %v7293_v10, %s8191_s17  ;;  %2801 = vrot.lane.b32.xlu1 %v7296_v16, %s8191_s17 }
 0x4bc   : > { %v2746_v63 = vpop.permute.xlu2 %2745 }
 0x4bd   : > { %v2760_v60 = vsel %vm495_vm2, %v2742_v54, %v2746_v63  ;;  %v2957_v54 = vld [vmem:[%s7992_s5 + $0x1f0] sm:$0xff] }
 0x4be   : > { %v7304_v12 = vmax.f32 %v2583_v25, %v2760_v60  ;;  %v2902_v25 = vld [vmem:[%s7992_s5 + $0x38] sm:$0xff]  ;;  %v2919_v60 = vld [vmem:[%s7992_s5 + $0xc0] sm:$0xff]  ;;  %3093 = vmatpush.msra.mxu0 %v2957_v54 }
 0x4c0   : > { %2805 = vrot.lane.b32.xlu1 %v7304_v12, %s8191_s17 }
 0x4c1   : > { %v2740_v5 = vpop.permute.xlu0 %2739 }
 0x4c2   : > { %v2761_v57 = vsel %vm495_vm2, %v2736_v18, %v2740_v5  ;;  %v2921_v18 = vld [vmem:[%s7992_s5 + $0xd0] sm:$0xff] }
 0x4c3   : > { %v7311_v42 = vmax.f32 %v7205_v3, %v2761_v57  ;;  %v2908_v3 = vld [vmem:[%s7992_s5 + $0x68] sm:$0xff]  ;;  %v2955_v57 = vld [vmem:[%s7992_s5 + $0x1e0] sm:$0xff] }
 0x4c4   : > { %3025 = vmatpush.msra.mxu3 %v2908_v3  ;;  %v2935_v3 = vld [vmem:[%s7992_s5 + $0x140] sm:$0xff] }
 0x4c5   : > { %2799 = vrot.lane.b32.xlu2 %v7311_v42, %s8191_s17 }
 0x4c6   : > { %3026 = vmatpush.msra.mxu3 %v2907_v29  ;;  %v2915_v29 = vld [vmem:[%s7992_s5 + $0xa0] sm:$0xff] }
 0x4c8   : > { %3027 = vmatpush.msra.mxu3 %v2906_v59  ;;  %v2934_v59 = vld [vmem:[%s7992_s5 + $0x138] sm:$0xff] }
 0x4ca   : > { %3028 = vmatpush.msra.mxu3 %v2905_v51  ;;  %v7492_v51 = vpop.permute.xlu2 %2860 }
 0x4cb   : > { %v2744_v19 = vpop.permute.xlu0 %2743 }
 0x4cc   : > { %v2759_v32 = vsel %vm495_vm2, %v2740_v5, %v2744_v19  ;;  %3029 = vmatpush.msra.mxu3 %v2904_v21  ;;  %v2938_v5 = vld [vmem:[%s7992_s5 + $0x158] sm:$0xff]  ;;  %v2953_v21 = vld [vmem:[%s7992_s5 + $0x1d0] sm:$0xff] }
 0x4cd   : > { %v7324_v20 = vmax.f32 %v7213_v7, %v2759_v32  ;;  %v2936_v32 = vld [vmem:[%s7992_s5 + $0x148] sm:$0xff] }
 0x4ce   : > { %3030 = vmatpush.msra.mxu3 %v2903_v22  ;;  %v2913_v22 = vld [vmem:[%s7992_s5 + $0x90] sm:$0xff] }
 0x4cf   : > { %2803 = vrot.lane.b32.xlu2 %v7324_v20, %s8191_s17 }
 0x4d0   : > { %3031 = vmatpush.msra.mxu3 %v2902_v25  ;;  %v2932_v25 = vld [vmem:[%s7992_s5 + $0x128] sm:$0xff] }
 0x4d2   : > { %3032 = vmatpush.msra.mxu3 %v2901_v52  ;;  %v2931_v52 = vld [vmem:[%s7992_s5 + $0x120] sm:$0xff] }
 0x4d4   : > { %3033 = vmatpush.msra.mxu3 %v2900_v9 }
 0x4d5   : > { %v2748_v39 = vpop.permute.xlu1 %2747 }
 0x4d6   : > { %v2757_v7 = vsel %vm495_vm2, %v2744_v19, %v2748_v39  ;;  %3034 = vmatpush.msra.mxu3 %v2899_v58  ;;  %v2917_v19 = vld [vmem:[%s7992_s5 + $0xb0] sm:$0xff] }
 0x4d7   : > { %v7346_v33 = vmax.f32 %v7217_v27, %v2757_v7  ;;  %v2925_v27 = vld [vmem:[%s7992_s5 + $0xf0] sm:$0xff] }
 0x4d8   : > { %3047 = vmatpush.msrb.mxu1 %v2925_v27  ;;  %3035 = vmatpush.msra.mxu3 %v2898_v2  ;;  %v2933_v7 = vld [vmem:[%s7992_s5 + $0x130] sm:$0xff]  ;;  %v2912_v27 = vld [vmem:[%s7992_s5 + $0x88] sm:$0xff]  ;;  %v2950_v2 = vld [vmem:[%s7992_s5 + $0x1b8] sm:$0xff] }
 0x4d9   : > { %2807 = vrot.lane.b32.xlu0 %v7346_v33, %s8191_s17 }
 0x4da   : > { %3048 = vmatpush.msrb.mxu1 %v2924_v23 }
 0x4dd   : > { %v2750_v36 = vpop.permute.xlu1 %2749 }
 0x4de   : > { %v2758_v6 = vsel %vm495_vm2, %v2746_v63, %v2750_v36 }
 0x4df   : > { %v7371_v37 = vmax.f32 %v7222_v47, %v2758_v6  ;;  %v2942_v47 = vld [vmem:[%s7992_s5 + $0x178] sm:$0xff]  ;;  %v2911_v6 = vld [vmem:[%s7992_s5 + $0x80] sm:$0xff] }
 0x4e0   : > { %v2752_v50 = vpop.permute.xlu0 %2751  ;;  %3069 = vmatpush.msrb.mxu2 %v2942_v47  ;;  %v2930_v47 = vld [vmem:[%s7992_s5 + $0x118] sm:$0xff] }
 0x4e1   : > { %v2755_v46 = vsel %vm495_vm2, %v2748_v39, %v2752_v50  ;;  %v2769_v31 = vsel %vm495_vm2, %v2752_v50, %v7248_v30  ;;  %2809 = vrot.lane.b32.xlu1 %v7371_v37, %s8191_s17  ;;  %v2923_v30 = vld [vmem:[%s7992_s5 + $0xe0] sm:$0xff]  ;;  %v2914_v39 = vld [vmem:[%s7992_s5 + $0x98] sm:$0xff] }
 0x4e2   : > { %v7390_v56 = vmax.f32 %v7224_v15, %v2755_v46  ;;  %v7393_v62 = vmax.f32 %v7234_v44, %v2769_v31  ;;  %v2897_v15 = vld [vmem:[%s7992_s5 + $0x10] sm:$0xff]  ;;  %v2922_v44 = vld [vmem:[%s7992_s5 + $0xd8] sm:$0xff]  ;;  %3049 = vmatpush.msrb.mxu1 %v2923_v30  ;;  %3070 = vmatpush.msrb.mxu2 %v2941_v1 }
 0x4e3   : > { %3036 = vmatpush.msra.mxu3 %v2897_v15  ;;  %v2929_v1 = vld [vmem:[%s7992_s5 + $0x110] sm:$0xff]  ;;  %v2928_v15 = vld [vmem:[%s7992_s5 + $0x108] sm:$0xff] }
 0x4e4   : > { %2815 = vrot.lane.b32.xlu0 %v7393_v62, %s8191_s17  ;;  %2811 = vrot.lane.b32.xlu2 %v7390_v56, %s8191_s17 }
 0x4e5   : > { %3050 = vmatpush.msrb.mxu1 %v2922_v44  ;;  %3071 = vmatpush.msrb.mxu2 %v2940_v11  ;;  %v2948_v44 = vld [vmem:[%s7992_s5 + $0x1a8] sm:$0xff]  ;;  %v2946_v11 = vld [vmem:[%s7992_s5 + $0x198] sm:$0xff] }
 0x4e6   : > { %3037 = vmatpush.msra.mxu3 %v2896_v28  ;;  %v2927_v28 = vld [vmem:[%s7992_s5 + $0x100] sm:$0xff] }
 0x4e7   : > { %3051 = vmatpush.msrb.mxu1 %v2921_v18  ;;  %3072 = vmatpush.msrb.mxu2 %v2939_v41  ;;  %v2947_v18 = vld [vmem:[%s7992_s5 + $0x1a0] sm:$0xff]  ;;  %v2945_v41 = vld [vmem:[%s7992_s5 + $0x190] sm:$0xff] }
 0x4e8   : > { %v2754_v40 = vpop.permute.xlu1 %2753  ;;  %3038 = vmatpush.msra.mxu3 %v2895_v49  ;;  %v7529_v23 = vpop.permute.xlu0 %2855  ;;  %v2974_v49 = vld [vmem:[%s7992_s5 + $0x278] sm:$0xff] }
 0x4e9   : > { %v2756_v24 = vsel %vm495_vm2, %v2750_v36, %v2754_v40  ;;  %v2770_v55 = vsel %vm495_vm2, %v2754_v40, %v7258_v53  ;;  %3052 = vmatpush.msrb.mxu1 %v2920_v48  ;;  %v2937_v53 = vld [vmem:[%s7992_s5 + $0x150] sm:$0xff]  ;;  %3073 = vmatpush.msrb.mxu2 %v2938_v5  ;;  %v2951_v36 = vld [vmem:[%s7992_s5 + $0x1c0] sm:$0xff]  ;;  %v2990_v48 = vld [vmem:[%s7992_s5 + $0x2f8] sm:$0xff] }
 0x4ea   : > { %v7444_v8 = vmax.f32 %v7230_v26, %v2756_v24  ;;  %v7447_v63 = vmax.f32 %v7244_v17, %v2770_v55  ;;  %v2956_v26 = vld [vmem:[%s7992_s5 + $0x1e8] sm:$0xff]  ;;  %v2918_v17 = vld [vmem:[%s7992_s5 + $0xb8] sm:$0xff]  ;;  %v2943_v40 = vld [vmem:[%s7992_s5 + $0x180] sm:$0xff]  ;;  %3115 = vmatpush.msrb.mxu3 %v2974_v49 }
 0x4eb   : > { %3053 = vmatpush.msrb.mxu1 %v2919_v60  ;;  %3094 = vmatpush.msra.mxu0 %v2956_v26  ;;  %v2973_v24 = vld [vmem:[%s7992_s5 + $0x270] sm:$0xff]  ;;  %v2972_v26 = vld [vmem:[%s7992_s5 + $0x268] sm:$0xff] }
 0x4ec   : > { %2817 = vrot.lane.b32.xlu0 %v7447_v63, %s8191_s17  ;;  %2813 = vrot.lane.b32.xlu2 %v7444_v8, %s8191_s17  ;;  %v2989_v55 = vld [vmem:[%s7992_s5 + $0x2f0] sm:$0xff] }
 0x4ed   : > { %3054 = vmatpush.msrb.mxu1 %v2918_v17  ;;  %3074 = vmatpush.msrb.mxu2 %v2937_v53  ;;  %v2988_v17 = vld [vmem:[%s7992_s5 + $0x2e8] sm:$0xff]  ;;  %v2971_v53 = vld [vmem:[%s7992_s5 + $0x260] sm:$0xff]  ;;  %v3001_v49 = vld [vmem:[%s7992_s5 + $0x350] sm:$0xff] }
 0x4ee   : > { %3095 = vmatpush.msra.mxu0 %v2955_v57  ;;  %3116 = vmatpush.msrb.mxu3 %v2973_v24  ;;  %v2987_v57 = vld [vmem:[%s7992_s5 + $0x2e0] sm:$0xff] }
 0x4ef   : > { %3055 = vmatpush.msrb.mxu1 %v2917_v19  ;;  %3075 = vmatpush.msrb.mxu2 %v2936_v32  ;;  %v2970_v32 = vld [vmem:[%s7992_s5 + $0x258] sm:$0xff]  ;;  %v2979_v24 = vld [vmem:[%s7992_s5 + $0x2a0] sm:$0xff] }
 0x4f0   : > { %3096 = vmatpush.msra.mxu0 %v2954_v45  ;;  %3117 = vmatpush.msrb.mxu3 %v2972_v26  ;;  %v3016_v26 = vld [vmem:[%s7992_s5 + $0x3c8] sm:$0xff] }
 0x4f1   : > { %3056 = vmatpush.msrb.mxu1 %v2916_v61  ;;  %3076 = vmatpush.msrb.mxu2 %v2935_v3  ;;  %v2986_v61 = vld [vmem:[%s7992_s5 + $0x2d8] sm:$0xff]  ;;  %v2969_v3 = vld [vmem:[%s7992_s5 + $0x250] sm:$0xff] }
 0x4f2   : > { %3097 = vmatpush.msra.mxu0 %v2953_v21  ;;  %3118 = vmatpush.msrb.mxu3 %v2971_v53  ;;  %v3006_v21 = vld [vmem:[%s7992_s5 + $0x378] sm:$0xff] }
 0x4f3   : > { %3057 = vmatpush.msrb.mxu1 %v2915_v29  ;;  %3077 = vmatpush.msrb.mxu2 %v2934_v59  ;;  %v2985_v29 = vld [vmem:[%s7992_s5 + $0x2d0] sm:$0xff] }
 0x4f4   : > { %3098 = vmatpush.msra.mxu0 %v2952_v43  ;;  %3119 = vmatpush.msrb.mxu3 %v2970_v32 }
 0x4f5   : > { %3058 = vmatpush.msrb.mxu1 %v2914_v39  ;;  %3078 = vmatpush.msrb.mxu2 %v2933_v7 }
 0x4f6   : > { %3099 = vmatpush.msra.mxu0 %v2951_v36  ;;  %3120 = vmatpush.msrb.mxu3 %v2969_v3  ;;  %v2978_v3 = vld [vmem:[%s7992_s5 + $0x298] sm:$0xff] }
 0x4f7   : > { %3059 = vmatpush.msrb.mxu1 %v2913_v22  ;;  %3079 = vmatpush.msrb.mxu2 %v2932_v25  ;;  %v3022_v22 = vld [vmem:[%s7992_s5 + $0x3f8] sm:$0xff]  ;;  %v2968_v25 = vld [vmem:[%s7992_s5 + $0x248] sm:$0xff] }
 0x4f8   : > { %3100 = vmatpush.msra.mxu0 %v2950_v2  ;;  %3121 = vmatpush.msrb.mxu3 %v2968_v25  ;;  %v2982_v2 = vld [vmem:[%s7992_s5 + $0x2b8] sm:$0xff] }
 0x4f9   : > { %3060 = vmatpush.msrb.mxu1 %v2912_v27  ;;  %3080 = vmatpush.msrb.mxu2 %v2931_v52  ;;  %v2984_v27 = vld [vmem:[%s7992_s5 + $0x2c8] sm:$0xff]  ;;  %v3021_v52 = vld [vmem:[%s7992_s5 + $0x3f0] sm:$0xff]  ;;  %v3014_v25 = vld [vmem:[%s7992_s5 + $0x3b8] sm:$0xff] }
 0x4fa   : > { %v2792_v9 = vpop.permute.xlu2 %2791 }
 0x4fb   : > { %3061 = vmatpush.msrb.mxu1 %v2911_v6  ;;  %3081 = vmatpush.msrb.mxu2 %v2930_v47  ;;  %v3020_v47 = vld [vmem:[%s7992_s5 + $0x3e8] sm:$0xff] }
 0x4fd   : > { %3082 = vmatpush.msrb.mxu2 %v2929_v1  ;;  %3138 = vmatpush.msra.mxu1 %v2990_v48  ;;  %v2966_v1 = vld [vmem:[%s7992_s5 + $0x238] sm:$0xff]  ;;  %v3017_v48 = vld [vmem:[%s7992_s5 + $0x3d0] sm:$0xff] }
 0x4fe   : > { %v7524_v50 = vpop.permute.xlu1 %2787 }
 0x4ff   : > { %v2831_v58 = vsel %vm759_vm13, %v7524_v50, %v2792_v9  ;;  %3083 = vmatpush.msrb.mxu2 %v2928_v15  ;;  %3139 = vmatpush.msra.mxu1 %v2989_v55  ;;  %v3019_v15 = vld [vmem:[%s7992_s5 + $0x3e0] sm:$0xff] }
 0x500   : > { %v2835_v46 = vmax.f32 %v7254_v35, %v2831_v58  ;;  %v2949_v35 = vld [vmem:[%s7992_s5 + $0x1b0] sm:$0xff]  ;;  %v2983_v58 = vld [vmem:[%s7992_s5 + $0x2c0] sm:$0xff] }
 0x501   : > { %3101 = vmatpush.msra.mxu0 %v2949_v35  ;;  %3084 = vmatpush.msrb.mxu2 %v2927_v28  ;;  %v2965_v28 = vld [vmem:[%s7992_s5 + $0x230] sm:$0xff] }
 0x502   : > { %v2863_v31 = vadd.f32 %v7529_v23, %v2835_v46  ;;  %3140 = vmatpush.msra.mxu1 %v2988_v17  ;;  %v7597_v19 = vpop.permute.xlu2 %2789  ;;  %v3004_v46 = vld [vmem:[%s7992_s5 + $0x368] sm:$0xff] }
 0x503   : > { %3102 = vmatpush.msra.mxu0 %v2948_v44  ;;  %3161 = vmatpush.msra.mxu2 %v3006_v21  ;;  %v2981_v44 = vld [vmem:[%s7992_s5 + $0x2b0] sm:$0xff] }
 0x504   : > { %v2879_v30 = vmax.f32 %v2863_v31, 0.0  ;;  %3141 = vmatpush.msra.mxu1 %v2987_v57 }
 0x505   : > { %3103 = vmatpush.msra.mxu0 %v2947_v18 }
 0x506   : > { %3039 = vmatmul.f32.vlgmr.msra.gmra.mxu3 %v2879_v30  ;;  %3142 = vmatpush.msra.mxu1 %v2986_v61  ;;  %v2962_v61 = vld [vmem:[%s7992_s5 + $0x218] sm:$0xff] }
 0x507   : > { %3104 = vmatpush.msra.mxu0 %v2946_v11  ;;  %v3002_v11 = vld [vmem:[%s7992_s5 + $0x358] sm:$0xff] }
 0x508   : > { %3143 = vmatpush.msra.mxu1 %v2985_v29 }
 0x509   : > { %3105 = vmatpush.msra.mxu0 %v2945_v41  ;;  %v3018_v41 = vld [vmem:[%s7992_s5 + $0x3d8] sm:$0xff] }
 0x50a   : > { %3144 = vmatpush.msra.mxu1 %v2984_v27 }
 0x50b   : > { %3106 = vmatpush.msra.mxu0 %v2944_v34  ;;  %v2964_v34 = vld [vmem:[%s7992_s5 + $0x228] sm:$0xff] }
 0x50c   : > { %3145 = vmatpush.msra.mxu1 %v2983_v58  ;;  %v2959_v58 = vld [vmem:[%s7992_s5 + $0x200] sm:$0xff] }
 0x50d   : > { %3107 = vmatpush.msra.mxu0 %v2943_v40  ;;  %v2980_v40 = vld [vmem:[%s7992_s5 + $0x2a8] sm:$0xff] }
 0x50e   : > { %3146 = vmatpush.msra.mxu1 %v2982_v2 }
 0x50f   : > { %3184 = vmatpush.msrb.mxu0 %v3022_v22  ;;  %v2998_v22 = vld [vmem:[%s7992_s5 + $0x338] sm:$0xff] }
 0x510   : > { %3147 = vmatpush.msra.mxu1 %v2981_v44  ;;  %v2994_v44 = vld [vmem:[%s7992_s5 + $0x318] sm:$0xff] }
 0x511   : > { %3185 = vmatpush.msrb.mxu0 %v3021_v52 }
 0x512   : > { %v2796_v54 = vpop.permute.xlu1 %2795  ;;  %3148 = vmatpush.msra.mxu1 %v2980_v40  ;;  %v2991_v40 = vld [vmem:[%s7992_s5 + $0x300] sm:$0xff] }
 0x513   : > { %v2829_v60 = vsel %vm759_vm13, %v2792_v9, %v2796_v54  ;;  %v2967_v9 = vld [vmem:[%s7992_s5 + $0x240] sm:$0xff]  ;;  %3186 = vmatpush.msrb.mxu0 %v3020_v47  ;;  %v2996_v47 = vld [vmem:[%s7992_s5 + $0x328] sm:$0xff] }
 0x514   : > { %v2836_v5 = vmax.f32 %v7265_v38, %v2829_v60  ;;  %3122 = vmatpush.msrb.mxu3 %v2967_v9  ;;  %3149 = vmatpush.msra.mxu1 %v2979_v24  ;;  %v3013_v9 = vld [vmem:[%s7992_s5 + $0x3b0] sm:$0xff] }
 0x515   : > { %3187 = vmatpush.msrb.mxu0 %v3019_v15 }
 0x516   : > { %v2864_v38 = vadd.f32 %v7529_v23, %v2836_v5  ;;  %3123 = vmatpush.msrb.mxu3 %v2966_v1  ;;  %v3000_v5 = vld [vmem:[%s7992_s5 + $0x348] sm:$0xff]  ;;  %3150 = vmatpush.msra.mxu1 %v2978_v3 }
 0x517   : > { %3188 = vmatpush.msrb.mxu0 %v3018_v41  ;;  %v2992_v41 = vld [vmem:[%s7992_s5 + $0x308] sm:$0xff] }
 0x518   : > { %v2880_v45 = vmax.f32 %v2864_v38, 0.0  ;;  %3124 = vmatpush.msrb.mxu3 %v2965_v28  ;;  %v3010_v28 = vld [vmem:[%s7992_s5 + $0x398] sm:$0xff] }
 0x519   : > { %3189 = vmatpush.msrb.mxu0 %v3017_v48 }
 0x51a   : > { %3062 = vmatmul.f32.vlgmr.msrb.gmra.mxu1 %v2880_v45  ;;  %3125 = vmatpush.msrb.mxu3 %v2964_v34  ;;  %v3008_v34 = vld [vmem:[%s7992_s5 + $0x388] sm:$0xff] }
 0x51b   : > { %3190 = vmatpush.msrb.mxu0 %v3016_v26 }
 0x51c   : > { %v7611_v59 = vpop.permute.xlu0 %2793 }
 0x51d   : > { %v2832_v39 = vsel %vm759_vm13, %v7597_v19, %v7611_v59 }
 0x51e   : > { %v2843_v7 = vmax.f32 %v7277_v4, %v2832_v39  ;;  %v3005_v4 = vld [vmem:[%s7992_s5 + $0x370] sm:$0xff] }
 0x51f   : > { %v2800_v43 = vpop.permute.xlu2 %2799  ;;  %3162 = vmatpush.msra.mxu2 %v3005_v4  ;;  %v2960_v4 = vld [vmem:[%s7992_s5 + $0x208] sm:$0xff] }
 0x520   : > { %v2827_v36 = vsel %vm759_vm13, %v2796_v54, %v2800_v43  ;;  %v2871_v6 = vadd.f32 %v7492_v51, %v2843_v7  ;;  %v2963_v54 = vld [vmem:[%s7992_s5 + $0x220] sm:$0xff]  ;;  %v2977_v7 = vld [vmem:[%s7992_s5 + $0x290] sm:$0xff] }
 0x521   : > { %v2837_v31 = vmax.f32 %v7267_v14, %v2827_v36  ;;  %v3003_v14 = vld [vmem:[%s7992_s5 + $0x360] sm:$0xff]  ;;  %3163 = vmatpush.msra.mxu2 %v3004_v46  ;;  %3126 = vmatpush.msrb.mxu3 %v2963_v54  ;;  %v2976_v36 = vld [vmem:[%s7992_s5 + $0x288] sm:$0xff] }
 0x522   : > { %v2887_v30 = vmax.f32 %v2871_v6, 0.0  ;;  %3151 = vmatpush.msra.mxu1 %v2977_v7  ;;  %v2997_v6 = vld [vmem:[%s7992_s5 + $0x330] sm:$0xff] }
 0x523   : > { %v2865_v35 = vadd.f32 %v7529_v23, %v2837_v31  ;;  %3164 = vmatpush.msra.mxu2 %v3003_v14  ;;  %3127 = vmatpush.msrb.mxu3 %v2962_v61  ;;  %v2975_v31 = vld [vmem:[%s7992_s5 + $0x280] sm:$0xff] }
 0x524   : > { %3042 = vmatmul.f32.gmra.mxu3 %v2887_v30  ;;  %3152 = vmatpush.msra.mxu1 %v2976_v36  ;;  %v3012_v30 = vld [vmem:[%s7992_s5 + $0x3a8] sm:$0xff]  ;;  %v2995_v14 = vld [vmem:[%s7992_s5 + $0x320] sm:$0xff] }
 0x525   : > { %v2881_v18 = vmax.f32 %v2865_v35, 0.0  ;;  %3165 = vmatpush.msra.mxu2 %v3002_v11  ;;  %v3011_v35 = vld [vmem:[%s7992_s5 + $0x3a0] sm:$0xff]  ;;  %v3009_v11 = vld [vmem:[%s7992_s5 + $0x390] sm:$0xff] }
 0x526   : > { %3153 = vmatpush.msra.mxu1 %v2975_v31  ;;  %v3338_v31 = vld [vmem:[#allocation4 + $0x1f0] sm:$0xff] }
 0x527   : > { %3085 = vmatmul.f32.vlgmr.msrb.gmra.mxu2 %v2881_v18  ;;  %v2993_v18 = vld [vmem:[%s7992_s5 + $0x310] sm:$0xff] }
 0x528   : > { %3166 = vmatpush.msra.mxu2 %v3001_v49  ;;  %v3007_v49 = vld [vmem:[%s7992_s5 + $0x380] sm:$0xff] }
 0x529   : > { %v7695_v55 = vpop.permute.xlu2 %2803  ;;  %v2798_v60 = vpop.permute.xlu0 %2797 }
 0x52a   : > { %v2825_v17 = vsel %vm759_vm13, %v2800_v43, %v7695_v55  ;;  %v2830_v53 = vsel %vm759_vm13, %v7611_v59, %v2798_v60  ;;  %v2802_v57 = vpop.permute.xlu1 %2801  ;;  %3167 = vmatpush.msra.mxu2 %v3000_v5 }
 0x52b   : > { %v2838_v38 = vmax.f32 %v7311_v42, %v2825_v17  ;;  %v2844_v32 = vmax.f32 %v7282_v0, %v2830_v53  ;;  %v2828_v45 = vsel %vm759_vm13, %v2798_v60, %v2802_v57  ;;  %v2999_v0 = vld [vmem:[%s7992_s5 + $0x340] sm:$0xff] }
 0x52c   : > { %v2845_v29 = vmax.f32 %v7293_v10, %v2828_v45  ;;  %v3015_v42 = vld [vmem:[%s7992_s5 + $0x3c0] sm:$0xff]  ;;  %v2961_v10 = vld [vmem:[%s7992_s5 + $0x210] sm:$0xff]  ;;  %3168 = vmatpush.msra.mxu2 %v2999_v0 }
 0x52d   : > { %v2866_v59 = vadd.f32 %v7529_v23, %v2838_v38  ;;  %v2872_v39 = vadd.f32 %v7492_v51, %v2844_v32  ;;  %3191 = vmatpush.msrb.mxu0 %v3015_v42  ;;  %3128 = vmatpush.msrb.mxu3 %v2961_v10 }
 0x52e   : > { %v2873_v21 = vadd.f32 %v7492_v51, %v2845_v29  ;;  %3169 = vmatpush.msra.mxu2 %v2998_v22 }
 0x52f   : > { %v2882_v43 = vmax.f32 %v2866_v59, 0.0  ;;  %v2888_v27 = vmax.f32 %v2872_v39, 0.0  ;;  %3192 = vmatpush.msrb.mxu0 %v3014_v25  ;;  %3129 = vmatpush.msrb.mxu3 %v2960_v4 }
 0x530   : > { %v2889_v52 = vmax.f32 %v2873_v21, 0.0  ;;  %3170 = vmatpush.msra.mxu2 %v2997_v6  ;;  %v3222_v6 = vld [vmem:[#allocation4 + $0x78] sm:$0xff] }
 0x531   : > { %3108 = vmatmul.f32.vlgmr.msra.gmra.mxu0 %v2882_v43  ;;  %3065 = vmatmul.f32.gmra.mxu1 %v2888_v27 }
 0x532   : > { %3088 = vmatmul.f32.gmra.mxu2 %v2889_v52  ;;  %v2806_v46 = vpop.permute.xlu1 %2805  ;;  %3193 = vmatpush.msrb.mxu0 %v3013_v9  ;;  %v3239_v9 = vld [vmem:[#allocation4 + $0xf8] sm:$0xff] }
 0x533   : > { %v2826_v2 = vsel %vm759_vm13, %v2802_v57, %v2806_v46  ;;  %3130 = vmatpush.msrb.mxu3 %v2959_v58  ;;  %3171 = vmatpush.msra.mxu2 %v2996_v47  ;;  %v3221_v58 = vld [vmem:[#allocation4 + $0x70] sm:$0xff]  ;;  %v3219_v47 = vld [vmem:[#allocation4 + $0x60] sm:$0xff] }
 0x534   : > { %v2846_v1 = vmax.f32 %v7296_v16, %v2826_v2  ;;  %3194 = vmatpush.msrb.mxu0 %v3012_v30  ;;  %3263 = vmatpush.msrb.mxu1 %v3222_v6  ;;  %v3297_v2 = vld [vmem:[#allocation4 + $0x168] sm:$0xff]  ;;  %v3324_v6 = vld [vmem:[#allocation4 + $0x180] sm:$0xff] }
 0x535   : > { %3172 = vmatpush.msra.mxu2 %v2995_v14  ;;  %3243 = vmatpush.msra.mxu3 %v3239_v9  ;;  %v3337_v30 = vld [vmem:[#allocation4 + $0x1e8] sm:$0xff]  ;;  %v3218_v14 = vld [vmem:[#allocation4 + $0x58] sm:$0xff] }
 0x536   : > { %v2874_v15 = vadd.f32 %v7492_v51, %v2846_v1  ;;  %3195 = vmatpush.msrb.mxu0 %v3011_v35  ;;  %3264 = vmatpush.msrb.mxu1 %v3221_v58  ;;  %v3236_v1 = vld [vmem:[#allocation4 + $0xe0] sm:$0xff]  ;;  %v3379_v9 = vld [vmem:[#allocation4 + $0x278] sm:$0xff]  ;;  %v3418_v58 = vld [vmem:[#allocation4 + $0x2f0] sm:$0xff] }
 0x537   : > { %3173 = vmatpush.msra.mxu2 %v2994_v44  ;;  %v3296_v35 = vld [vmem:[#allocation4 + $0x160] sm:$0xff]  ;;  %v3235_v44 = vld [vmem:[#allocation4 + $0xd8] sm:$0xff] }
 0x538   : > { %v2890_v16 = vmax.f32 %v2874_v15, 0.0  ;;  %3196 = vmatpush.msrb.mxu0 %v3010_v28  ;;  %v3336_v15 = vld [vmem:[#allocation4 + $0x1e0] sm:$0xff]  ;;  %v3295_v28 = vld [vmem:[#allocation4 + $0x158] sm:$0xff] }
 0x539   : > { %3174 = vmatpush.msra.mxu2 %v2993_v18  ;;  %v3335_v18 = vld [vmem:[#allocation4 + $0x1d8] sm:$0xff] }
 0x53a   : > { %3111 = vmatmul.f32.gmra.mxu0 %v2890_v16  ;;  %v3217_v16 = vld [vmem:[#allocation4 + $0x50] sm:$0xff] }
 0x53b   : > { %3197 = vmatpush.msrb.mxu0 %v3009_v11  ;;  %3175 = vmatpush.msra.mxu2 %v2992_v41  ;;  %v3234_v11 = vld [vmem:[#allocation4 + $0xd0] sm:$0xff]  ;;  %v3216_v41 = vld [vmem:[#allocation4 + $0x48] sm:$0xff] }
 0x53d   : > { %3198 = vmatpush.msrb.mxu0 %v3008_v34  ;;  %3176 = vmatpush.msra.mxu2 %v2991_v40  ;;  %v3294_v34 = vld [vmem:[#allocation4 + $0x150] sm:$0xff] }
 0x53e   : > { %v2812_v48 = vpop.permute.xlu2 %2811  ;;  %v3334_v40 = vld [vmem:[#allocation4 + $0x1d0] sm:$0xff] }
 0x53f   : > { %3199 = vmatpush.msrb.mxu0 %v3007_v49  ;;  %v3233_v49 = vld [vmem:[#allocation4 + $0xc8] sm:$0xff] }
 0x541   : > { %3342 = vmatpush.msra.mxu0 %v3339_v13  ;;  %v3499_v13 = vld [vmem:[#allocation4 + $0x3f8] sm:$0xff] }
 0x543   : > { %3343 = vmatpush.msra.mxu0 %v3338_v31  ;;  %v3498_v31 = vld [vmem:[#allocation4 + $0x3f0] sm:$0xff] }
 0x545   : > { %3344 = vmatpush.msra.mxu0 %v3337_v30  ;;  %v3497_v30 = vld [vmem:[#allocation4 + $0x3e8] sm:$0xff] }
 0x546   : > { %v2814_v32 = vpop.permute.xlu2 %2813 }
 0x547   : > { %3345 = vmatpush.msra.mxu0 %v3336_v15  ;;  %v3496_v15 = vld [vmem:[#allocation4 + $0x3e0] sm:$0xff] }
 0x549   : > { %3346 = vmatpush.msra.mxu0 %v3335_v18  ;;  %v3495_v18 = vld [vmem:[#allocation4 + $0x3d8] sm:$0xff] }
 0x54b   : > { %v2808_v54 = vpop.permute.xlu0 %2807  ;;  %3347 = vmatpush.msra.mxu0 %v3334_v40  ;;  %v3494_v40 = vld [vmem:[#allocation4 + $0x3d0] sm:$0xff] }
 0x54c   : > { %v2821_v24 = vsel %vm759_vm13, %v2808_v54, %v2812_v48  ;;  %v2823_v60 = vsel %vm759_vm13, %v7695_v55, %v2808_v54  ;;  %v3293_v54 = vld [vmem:[#allocation4 + $0x148] sm:$0xff] }
 0x54d   : > { %v2839_v5 = vmax.f32 %v7324_v20, %v2823_v60  ;;  %v2840_v26 = vmax.f32 %v7346_v33, %v2821_v24  ;;  %v3333_v24 = vld [vmem:[#allocation4 + $0x1c8] sm:$0xff]  ;;  %v3232_v60 = vld [vmem:[#allocation4 + $0xc0] sm:$0xff] }
 0x54e   : > { %3348 = vmatpush.msra.mxu0 %v3333_v24  ;;  %v3493_v24 = vld [vmem:[#allocation4 + $0x3c8] sm:$0xff] }
 0x54f   : > { %v2867_v17 = vadd.f32 %v7529_v23, %v2839_v5  ;;  %v2868_v53 = vadd.f32 %v7529_v23, %v2840_v26  ;;  %v3214_v5 = vld [vmem:[#allocation4 + $0x38] sm:$0xff]  ;;  %v3292_v26 = vld [vmem:[#allocation4 + $0x140] sm:$0xff] }
 0x551   : > { %v2883_v57 = vmax.f32 %v2867_v17, 0.0  ;;  %v2884_v38 = vmax.f32 %v2868_v53, 0.0  ;;  %v3332_v17 = vld [vmem:[#allocation4 + $0x1c0] sm:$0xff]  ;;  %v3231_v53 = vld [vmem:[#allocation4 + $0xb8] sm:$0xff] }
 0x552   : > { %3349 = vmatpush.msra.mxu0 %v3332_v17  ;;  %v3492_v17 = vld [vmem:[#allocation4 + $0x3c0] sm:$0xff] }
 0x553   : > { %3131 = vmatmul.f32.vlgmr.msrb.gmra.mxu3 %v2883_v57  ;;  %3154 = vmatmul.f32.vlgmr.msra.gmra.mxu1 %v2884_v38  ;;  %v2810_v45 = vpop.permute.xlu1 %2809  ;;  %v3213_v57 = vld [vmem:[#allocation4 + $0x30] sm:$0xff]  ;;  %v3291_v38 = vld [vmem:[#allocation4 + $0x138] sm:$0xff] }
 0x554   : > { %v2822_v61 = vsel %vm759_vm13, %v2810_v45, %v2814_v32  ;;  %v2824_v55 = vsel %vm759_vm13, %v2806_v46, %v2810_v45  ;;  %v3299_v46 = vld [vmem:[#allocation4 + $0x178] sm:$0xff]  ;;  %v3230_v45 = vld [vmem:[#allocation4 + $0xb0] sm:$0xff] }
 0x555   : > { %v2847_v20 = vmax.f32 %v7304_v12, %v2824_v55  ;;  %v2848_v33 = vmax.f32 %v7371_v37, %v2822_v61  ;;  %3302 = vmatpush.msrb.mxu2 %v3299_v46  ;;  %v3212_v61 = vld [vmem:[#allocation4 + $0x28] sm:$0xff]  ;;  %v3290_v55 = vld [vmem:[#allocation4 + $0x130] sm:$0xff]  ;;  %v3459_v46 = vld [vmem:[#allocation4 + $0x378] sm:$0xff] }
 0x556   : > { %v2816_v3 = vpop.permute.xlu0 %2815 }
 0x557   : > { %v2819_v29 = vsel %vm759_vm13, %v2812_v48, %v2816_v3  ;;  %v2833_v0 = vsel %vm759_vm13, %v2816_v3, %v7524_v50  ;;  %v2875_v42 = vadd.f32 %v7492_v51, %v2847_v20  ;;  %v2876_v59 = vadd.f32 %v7492_v51, %v2848_v33  ;;  %v3215_v48 = vld [vmem:[#allocation4 + $0x40] sm:$0xff]  ;;  %v3330_v20 = vld [vmem:[#allocation4 + $0x1b0] sm:$0xff]  ;;  %v3229_v33 = vld [vmem:[#allocation4 + $0xa8] sm:$0xff] }
 0x558   : > { %v2841_v39 = vmax.f32 %v7390_v56, %v2819_v29  ;;  %v2842_v10 = vmax.f32 %v7393_v62, %v2833_v0  ;;  %v3211_v3 = vld [vmem:[#allocation4 + $0x20] sm:$0xff]  ;;  %v3289_v29 = vld [vmem:[#allocation4 + $0x128] sm:$0xff] }
 0x559   : > { %v2891_v7 = vmax.f32 %v2875_v42, 0.0  ;;  %v2892_v12 = vmax.f32 %v2876_v59, 0.0  ;;  %v3329_v0 = vld [vmem:[#allocation4 + $0x1a8] sm:$0xff]  ;;  %v3228_v42 = vld [vmem:[#allocation4 + $0xa0] sm:$0xff]  ;;  %v3210_v59 = vld [vmem:[#allocation4 + $0x18] sm:$0xff] }
 0x55a   : > { %v2869_v37 = vadd.f32 %v7529_v23, %v2841_v39  ;;  %v2870_v21 = vadd.f32 %v7529_v23, %v2842_v10  ;;  %v3288_v39 = vld [vmem:[#allocation4 + $0x120] sm:$0xff] }
 0x55b   : > { %3134 = vmatmul.f32.gmra.mxu3 %v2891_v7  ;;  %3157 = vmatmul.f32.gmra.mxu1 %v2892_v12  ;;  %v3328_v10 = vld [vmem:[#allocation4 + $0x1a0] sm:$0xff]  ;;  %v3227_v7 = vld [vmem:[#allocation4 + $0x98] sm:$0xff]  ;;  %v3209_v12 = vld [vmem:[#allocation4 + $0x10] sm:$0xff] }
 0x55c   : > { %v2885_v22 = vmax.f32 %v2869_v37, 0.0  ;;  %v2886_v25 = vmax.f32 %v2870_v21, 0.0  ;;  %v3287_v37 = vld [vmem:[#allocation4 + $0x118] sm:$0xff] }
 0x55d   : > { %v3327_v21 = vld [vmem:[#allocation4 + $0x198] sm:$0xff] }
 0x55e   : > { %v2818_v43 = vpop.permute.xlu0 %2817  ;;  %3177 = vmatmul.f32.vlgmr.msra.gmra.mxu2 %v2885_v22  ;;  %3200 = vmatmul.f32.vlgmr.msrb.gmra.mxu0 %v2886_v25  ;;  %v3226_v22 = vld [vmem:[#allocation4 + $0x90] sm:$0xff]  ;;  %v3208_v25 = vld [vmem:[#allocation4 + $0x8] sm:$0xff] }
 0x55f   : > { %v2820_v50 = vsel %vm759_vm13, %v2814_v32, %v2818_v43  ;;  %v2834_v56 = vsel %vm759_vm13, %v2818_v43, %v7597_v19  ;;  %v3238_v19 = vld [vmem:[#allocation4 + $0xf0] sm:$0xff]  ;;  %v3331_v32 = vld [vmem:[#allocation4 + $0x1b8] sm:$0xff] }
 0x560   : > { %v2849_v62 = vmax.f32 %v7444_v8, %v2820_v50  ;;  %v2850_v27 = vmax.f32 %v7447_v63, %v2834_v56  ;;  %v3220_v8 = vld [vmem:[#allocation4 + $0x68] sm:$0xff]  ;;  %v3298_v63 = vld [vmem:[#allocation4 + $0x170] sm:$0xff]  ;;  %3244 = vmatpush.msra.mxu3 %v3238_v19  ;;  %3350 = vmatpush.msra.mxu0 %v3331_v32  ;;  %v3491_v32 = vld [vmem:[#allocation4 + $0x3b8] sm:$0xff] }
 0x561   : > { %3303 = vmatpush.msrb.mxu2 %v3298_v63  ;;  %3265 = vmatpush.msrb.mxu1 %v3220_v8  ;;  %v3286_v43 = vld [vmem:[#allocation4 + $0x110] sm:$0xff]  ;;  %v3225_v56 = vld [vmem:[#allocation4 + $0x88] sm:$0xff] }
 0x562   : > { %v2877_v23 = vadd.f32 %v7492_v51, %v2849_v62  ;;  %v2878_v4 = vadd.f32 %v7492_v51, %v2850_v27  ;;  %v3237_v51 = vld [vmem:[#allocation4 + $0xe8] sm:$0xff]  ;;  %3351 = vmatpush.msra.mxu0 %v3330_v20  ;;  %v3326_v50 = vld [vmem:[#allocation4 + $0x190] sm:$0xff]  ;;  %v3207_v62 = vld [vmem:[#allocation4] sm:$0xff] }
 0x563   : > { %3245 = vmatpush.msra.mxu3 %v3237_v51  ;;  %3266 = vmatpush.msrb.mxu1 %v3219_v47  ;;  %v3285_v27 = vld [vmem:[#allocation4 + $0x108] sm:$0xff]  ;;  %v3378_v19 = vld [vmem:[#allocation4 + $0x270] sm:$0xff]  ;;  %v3416_v47 = vld [vmem:[#allocation4 + $0x2e0] sm:$0xff] }
 0x564   : > { %v2893_v52 = vmax.f32 %v2877_v23, 0.0  ;;  %v2894_v36 = vmax.f32 %v2878_v4, 0.0  ;;  %3304 = vmatpush.msrb.mxu2 %v3297_v2  ;;  %3352 = vmatpush.msra.mxu0 %v3329_v0  ;;  %v3325_v23 = vld [vmem:[#allocation4 + $0x188] sm:$0xff]  ;;  %v3419_v4 = vld [vmem:[#allocation4 + $0x2f8] sm:$0xff]  ;;  %v3458_v63 = vld [vmem:[#allocation4 + $0x370] sm:$0xff] }
 0x565   : > { %3246 = vmatpush.msra.mxu3 %v3236_v1  ;;  %3267 = vmatpush.msrb.mxu1 %v3218_v14  ;;  %v3417_v8 = vld [vmem:[#allocation4 + $0x2e8] sm:$0xff]  ;;  %v3376_v1 = vld [vmem:[#allocation4 + $0x260] sm:$0xff]  ;;  %v3415_v14 = vld [vmem:[#allocation4 + $0x2d8] sm:$0xff] }
 0x566   : > { %3180 = vmatmul.f32.gmra.mxu2 %v2893_v52  ;;  %3203 = vmatmul.f32.gmra.mxu0 %v2894_v36  ;;  %v3224_v52 = vld [vmem:[#allocation4 + $0x80] sm:$0xff]  ;;  %v3377_v51 = vld [vmem:[#allocation4 + $0x268] sm:$0xff]  ;;  %v3490_v20 = vld [vmem:[#allocation4 + $0x3b0] sm:$0xff] }
 0x567   : > { %3305 = vmatpush.msrb.mxu2 %v3296_v35  ;;  %3247 = vmatpush.msra.mxu3 %v3235_v44  ;;  %v3284_v36 = vld [vmem:[#allocation4 + $0x100] sm:$0xff]  ;;  %v3457_v2 = vld [vmem:[#allocation4 + $0x368] sm:$0xff]  ;;  %v3375_v44 = vld [vmem:[#allocation4 + $0x258] sm:$0xff] }
 0x568   : > { %3268 = vmatpush.msrb.mxu1 %v3217_v16  ;;  %3353 = vmatpush.msra.mxu0 %v3328_v10  ;;  %v3456_v35 = vld [vmem:[#allocation4 + $0x360] sm:$0xff]  ;;  %v3414_v16 = vld [vmem:[#allocation4 + $0x2d0] sm:$0xff]  ;;  %v3489_v0 = vld [vmem:[#allocation4 + $0x3a8] sm:$0xff] }
 0x569   : > { %3306 = vmatpush.msrb.mxu2 %v3295_v28  ;;  %3248 = vmatpush.msra.mxu3 %v3234_v11  ;;  %v3455_v28 = vld [vmem:[#allocation4 + $0x358] sm:$0xff]  ;;  %v3374_v11 = vld [vmem:[#allocation4 + $0x250] sm:$0xff]  ;;  %v3488_v10 = vld [vmem:[#allocation4 + $0x3a0] sm:$0xff] }
 0x56a   : > { %3269 = vmatpush.msrb.mxu1 %v3216_v41  ;;  %3354 = vmatpush.msra.mxu0 %v3327_v21  ;;  %v3413_v41 = vld [vmem:[#allocation4 + $0x2c8] sm:$0xff]  ;;  %v3487_v21 = vld [vmem:[#allocation4 + $0x398] sm:$0xff] }
 0x56b   : > { %3307 = vmatpush.msrb.mxu2 %v3294_v34  ;;  %3249 = vmatpush.msra.mxu3 %v3233_v49  ;;  %v3454_v34 = vld [vmem:[#allocation4 + $0x350] sm:$0xff]  ;;  %v3373_v49 = vld [vmem:[#allocation4 + $0x248] sm:$0xff] }
 0x56c   : > { %3270 = vmatpush.msrb.mxu1 %v3215_v48  ;;  %3355 = vmatpush.msra.mxu0 %v3326_v50  ;;  %v3412_v48 = vld [vmem:[#allocation4 + $0x2c0] sm:$0xff]  ;;  %v3486_v50 = vld [vmem:[#allocation4 + $0x390] sm:$0xff] }
 0x56d   : > { %3308 = vmatpush.msrb.mxu2 %v3293_v54  ;;  %3250 = vmatpush.msra.mxu3 %v3232_v60  ;;  %v3453_v54 = vld [vmem:[#allocation4 + $0x348] sm:$0xff]  ;;  %v3372_v60 = vld [vmem:[#allocation4 + $0x240] sm:$0xff] }
 0x56e   : > { %3271 = vmatpush.msrb.mxu1 %v3214_v5  ;;  %3356 = vmatpush.msra.mxu0 %v3325_v23  ;;  %v3411_v5 = vld [vmem:[#allocation4 + $0x2b8] sm:$0xff]  ;;  %v3485_v23 = vld [vmem:[#allocation4 + $0x388] sm:$0xff] }
 0x56f   : > { %3309 = vmatpush.msrb.mxu2 %v3292_v26  ;;  %3251 = vmatpush.msra.mxu3 %v3231_v53  ;;  %v3452_v26 = vld [vmem:[#allocation4 + $0x340] sm:$0xff]  ;;  %v3371_v53 = vld [vmem:[#allocation4 + $0x238] sm:$0xff] }
 0x570   : > { %3272 = vmatpush.msrb.mxu1 %v3213_v57  ;;  %3357 = vmatpush.msra.mxu0 %v3324_v6  ;;  %v3410_v57 = vld [vmem:[#allocation4 + $0x2b0] sm:$0xff] }
 0x571   : > { %3310 = vmatpush.msrb.mxu2 %v3291_v38  ;;  %3252 = vmatpush.msra.mxu3 %v3230_v45  ;;  %v3451_v38 = vld [vmem:[#allocation4 + $0x338] sm:$0xff]  ;;  %v3370_v45 = vld [vmem:[#allocation4 + $0x230] sm:$0xff] }
 0x572   : > { %3273 = vmatpush.msrb.mxu1 %v3212_v61  ;;  %3502 = vmatpush.msrb.mxu0 %v3499_v13  ;;  %v3409_v61 = vld [vmem:[#allocation4 + $0x2a8] sm:$0xff] }
 0x573   : > { %3311 = vmatpush.msrb.mxu2 %v3290_v55  ;;  %3253 = vmatpush.msra.mxu3 %v3229_v33  ;;  %v3450_v55 = vld [vmem:[#allocation4 + $0x330] sm:$0xff]  ;;  %v3369_v33 = vld [vmem:[#allocation4 + $0x228] sm:$0xff] }
 0x574   : > { %3274 = vmatpush.msrb.mxu1 %v3211_v3  ;;  %3503 = vmatpush.msrb.mxu0 %v3498_v31  ;;  %v3408_v3 = vld [vmem:[#allocation4 + $0x2a0] sm:$0xff] }
 0x575   : > { %3312 = vmatpush.msrb.mxu2 %v3289_v29  ;;  %3254 = vmatpush.msra.mxu3 %v3228_v42  ;;  %v3449_v29 = vld [vmem:[#allocation4 + $0x328] sm:$0xff]  ;;  %v3368_v42 = vld [vmem:[#allocation4 + $0x220] sm:$0xff] }
 0x576   : > { %3275 = vmatpush.msrb.mxu1 %v3210_v59  ;;  %3504 = vmatpush.msrb.mxu0 %v3497_v30  ;;  %v3407_v59 = vld [vmem:[#allocation4 + $0x298] sm:$0xff] }
 0x577   : > { %3313 = vmatpush.msrb.mxu2 %v3288_v39  ;;  %3255 = vmatpush.msra.mxu3 %v3227_v7  ;;  %v3448_v39 = vld [vmem:[#allocation4 + $0x320] sm:$0xff]  ;;  %v3367_v7 = vld [vmem:[#allocation4 + $0x218] sm:$0xff] }
 0x578   : > { %3276 = vmatpush.msrb.mxu1 %v3209_v12  ;;  %3505 = vmatpush.msrb.mxu0 %v3496_v15  ;;  %v3406_v12 = vld [vmem:[#allocation4 + $0x290] sm:$0xff] }
 0x579   : > { %3314 = vmatpush.msrb.mxu2 %v3287_v37  ;;  %3256 = vmatpush.msra.mxu3 %v3226_v22  ;;  %v3447_v37 = vld [vmem:[#allocation4 + $0x318] sm:$0xff]  ;;  %v3366_v22 = vld [vmem:[#allocation4 + $0x210] sm:$0xff] }
 0x57a   : > { %3277 = vmatpush.msrb.mxu1 %v3208_v25  ;;  %3506 = vmatpush.msrb.mxu0 %v3495_v18  ;;  %v3405_v25 = vld [vmem:[#allocation4 + $0x288] sm:$0xff] }
 0x57b   : > { %3315 = vmatpush.msrb.mxu2 %v3286_v43  ;;  %3257 = vmatpush.msra.mxu3 %v3225_v56  ;;  %v3446_v43 = vld [vmem:[#allocation4 + $0x310] sm:$0xff]  ;;  %v3365_v56 = vld [vmem:[#allocation4 + $0x208] sm:$0xff] }
 0x57c   : > { %3278 = vmatpush.msrb.mxu1 %v3207_v62  ;;  %3507 = vmatpush.msrb.mxu0 %v3494_v40  ;;  %v3404_v62 = vld [vmem:[#allocation4 + $0x280] sm:$0xff]  ;;  %v3576_v40 = vld [vmem:[#allocation4 + $0x4f0] sm:$0xff] }
 0x57d   : > { %3316 = vmatpush.msrb.mxu2 %v3285_v27  ;;  %3258 = vmatpush.msra.mxu3 %v3224_v52  ;;  %v3445_v27 = vld [vmem:[#allocation4 + $0x308] sm:$0xff]  ;;  %v3444_v52 = vld [vmem:[#allocation4 + $0x300] sm:$0xff] }
 0x57e   : > { %3422 = vmatpush.msra.mxu1 %v3419_v4  ;;  %3508 = vmatpush.msrb.mxu0 %v3493_v24  ;;  %v3364_v4 = vld [vmem:[#allocation4 + $0x200] sm:$0xff]  ;;  %v3575_v24 = vld [vmem:[#allocation4 + $0x4e8] sm:$0xff] }
 0x57f   : > { %3317 = vmatpush.msrb.mxu2 %v3284_v36  ;;  %3382 = vmatpush.msrb.mxu3 %v3379_v9  ;;  %v3484_v36 = vld [vmem:[#allocation4 + $0x380] sm:$0xff] }
 0x580   : > { %3423 = vmatpush.msra.mxu1 %v3418_v58  ;;  %3509 = vmatpush.msrb.mxu0 %v3492_v17  ;;  %v3574_v17 = vld [vmem:[#allocation4 + $0x4e0] sm:$0xff] }
 0x581   : > { %3462 = vmatpush.msra.mxu2 %v3459_v46  ;;  %3383 = vmatpush.msrb.mxu3 %v3378_v19 }
 0x582   : > { %3424 = vmatpush.msra.mxu1 %v3417_v8  ;;  %3510 = vmatpush.msrb.mxu0 %v3491_v32  ;;  %v3536_v32 = vld [vmem:[#allocation4 + $0x460] sm:$0xff] }
 0x583   : > { %3463 = vmatpush.msra.mxu2 %v3458_v63  ;;  %3384 = vmatpush.msrb.mxu3 %v3377_v51 }
 0x584   : > { %3425 = vmatpush.msra.mxu1 %v3416_v47  ;;  %3511 = vmatpush.msrb.mxu0 %v3490_v20 }
 0x585   : > { %3464 = vmatpush.msra.mxu2 %v3457_v2  ;;  %3385 = vmatpush.msrb.mxu3 %v3376_v1 }
 0x586   : > { %3426 = vmatpush.msra.mxu1 %v3415_v14  ;;  %3512 = vmatpush.msrb.mxu0 %v3489_v0 }
 0x587   : > { %3465 = vmatpush.msra.mxu2 %v3456_v35  ;;  %3386 = vmatpush.msrb.mxu3 %v3375_v44 }
 0x588   : > { %3427 = vmatpush.msra.mxu1 %v3414_v16  ;;  %3513 = vmatpush.msrb.mxu0 %v3488_v10  ;;  %v3534_v10 = vld [vmem:[#allocation4 + $0x450] sm:$0xff] }
 0x589   : > { %3466 = vmatpush.msra.mxu2 %v3455_v28  ;;  %3387 = vmatpush.msrb.mxu3 %v3374_v11  ;;  %v3040_v6 = vpop.f32.mrf.mxu3  ;;  %v3577_v28 = vld [vmem:[#allocation4 + $0x4f8] sm:$0xff] }
 0x58a   : > { %3428 = vmatpush.msra.mxu1 %v3413_v41  ;;  %3514 = vmatpush.msrb.mxu0 %v3487_v21  ;;  %v3653_v21 = vld [vmem:[#allocation4 + $0x5d0] sm:$0xff] }
 0x58b   : > { %3467 = vmatpush.msra.mxu2 %v3454_v34  ;;  %3388 = vmatpush.msrb.mxu3 %v3373_v49  ;;  %v3539_v34 = vld [vmem:[#allocation4 + $0x478] sm:$0xff] }
 0x58c   : > { %3429 = vmatpush.msra.mxu1 %v3412_v48  ;;  %3515 = vmatpush.msrb.mxu0 %v3486_v50  ;;  %v3618_v49 = vld [vmem:[#allocation4 + $0x578] sm:$0xff] }
 0x58d   : > { %3468 = vmatpush.msra.mxu2 %v3453_v54  ;;  %3389 = vmatpush.msrb.mxu3 %v3372_v60  ;;  %v3658_v48 = vld [vmem:[#allocation4 + $0x5f8] sm:$0xff]  ;;  %v3538_v54 = vld [vmem:[#allocation4 + $0x470] sm:$0xff] }
 0x58e   : > { %3430 = vmatpush.msra.mxu1 %v3411_v5  ;;  %3516 = vmatpush.msrb.mxu0 %v3485_v23  ;;  %v3617_v60 = vld [vmem:[#allocation4 + $0x570] sm:$0xff]  ;;  %v3569_v23 = vld [vmem:[#allocation4 + $0x4b8] sm:$0xff] }
 0x58f   : > { %3469 = vmatpush.msra.mxu2 %v3452_v26  ;;  %3390 = vmatpush.msrb.mxu3 %v3371_v53  ;;  %v3657_v5 = vld [vmem:[#allocation4 + $0x5f0] sm:$0xff]  ;;  %v3537_v26 = vld [vmem:[#allocation4 + $0x468] sm:$0xff] }
 0x590   : > { %3431 = vmatpush.msra.mxu1 %v3410_v57  ;;  %3517 = vmatpush.msrb.mxu0 %v3484_v36  ;;  %v3616_v53 = vld [vmem:[#allocation4 + $0x568] sm:$0xff]  ;;  %v3531_v36 = vld [vmem:[#allocation4 + $0x438] sm:$0xff] }
 0x591   : > { %3470 = vmatpush.msra.mxu2 %v3451_v38  ;;  %3391 = vmatpush.msrb.mxu3 %v3370_v45  ;;  %v3656_v57 = vld [vmem:[#allocation4 + $0x5e8] sm:$0xff]  ;;  %v3573_v45 = vld [vmem:[#allocation4 + $0x4d8] sm:$0xff] }
 0x592   : > { %3432 = vmatpush.msra.mxu1 %v3409_v61  ;;  %v3615_v61 = vld [vmem:[#allocation4 + $0x560] sm:$0xff] }
 0x593   : > { %3471 = vmatpush.msra.mxu2 %v3450_v55  ;;  %3392 = vmatpush.msrb.mxu3 %v3369_v33  ;;  %v3655_v55 = vld [vmem:[#allocation4 + $0x5e0] sm:$0xff] }
 0x594   : > { %3433 = vmatpush.msra.mxu1 %v3408_v3  ;;  %v3535_v3 = vld [vmem:[#allocation4 + $0x458] sm:$0xff] }
 0x595   : > { %3472 = vmatpush.msra.mxu2 %v3449_v29  ;;  %3393 = vmatpush.msrb.mxu3 %v3368_v42  ;;  %v3572_v42 = vld [vmem:[#allocation4 + $0x4d0] sm:$0xff] }
 0x596   : > { %3434 = vmatpush.msra.mxu1 %v3407_v59  ;;  %v3614_v59 = vld [vmem:[#allocation4 + $0x558] sm:$0xff] }
 0x597   : > { %3473 = vmatpush.msra.mxu2 %v3448_v39  ;;  %3394 = vmatpush.msrb.mxu3 %v3367_v7  ;;  %v3063_v9 = vpop.f32.mrf.mxu1  ;;  %v3654_v39 = vld [vmem:[#allocation4 + $0x5d8] sm:$0xff] }
 0x598   : > { %3435 = vmatpush.msra.mxu1 %v3406_v12  ;;  %v3064_v19 = vadd.f32 %v3063_v9, %v3040_v6  ;;  %v3571_v12 = vld [vmem:[#allocation4 + $0x4c8] sm:$0xff]  ;;  %v3568_v9 = vld [vmem:[#allocation4 + $0x4b0] sm:$0xff] }
 0x599   : > { %3474 = vmatpush.msra.mxu2 %v3447_v37  ;;  %3395 = vmatpush.msrb.mxu3 %v3366_v22  ;;  %v3613_v37 = vld [vmem:[#allocation4 + $0x550] sm:$0xff]  ;;  %v3533_v22 = vld [vmem:[#allocation4 + $0x448] sm:$0xff] }
 0x59a   : > { %3436 = vmatpush.msra.mxu1 %v3405_v25  ;;  %v3570_v25 = vld [vmem:[#allocation4 + $0x4c0] sm:$0xff] }
 0x59b   : > { %3475 = vmatpush.msra.mxu2 %v3446_v43  ;;  %3396 = vmatpush.msrb.mxu3 %v3365_v56  ;;  %v3612_v43 = vld [vmem:[#allocation4 + $0x548] sm:$0xff] }
 0x59c   : > { %3437 = vmatpush.msra.mxu1 %v3404_v62  ;;  %v3652_v56 = vld [vmem:[#allocation4 + $0x5c8] sm:$0xff]  ;;  %v3532_v62 = vld [vmem:[#allocation4 + $0x440] sm:$0xff] }
 0x59d   : > { %3476 = vmatpush.msra.mxu2 %v3445_v27  ;;  %3397 = vmatpush.msrb.mxu3 %v3364_v4  ;;  %v3611_v4 = vld [vmem:[#allocation4 + $0x540] sm:$0xff] }
 0x59f   : > { %3477 = vmatpush.msra.mxu2 %v3444_v52  ;;  %v3651_v52 = vld [vmem:[#allocation4 + $0x5c0] sm:$0xff] }
 0x5a7   : > { %v3043_v46 = vpop.f32.mrf.mxu3 }
 0x5aa   : > { %v3086_v58 = vpop.f32.mrf.mxu2 }
 0x5ab   : > { %v3087_v8 = vadd.f32 %v3086_v58, %v3064_v19  ;;  %v3610_v58 = vld [vmem:[#allocation4 + $0x538] sm:$0xff]  ;;  %v3567_v19 = vld [vmem:[#allocation4 + $0x4a8] sm:$0xff] }
 0x5ae   : > { %v3109_v13 = vpop.f32.mrf.mxu0  ;;  %v3066_v63 = vpop.f32.mrf.mxu1 }
 0x5af   : > { %v3110_v47 = vadd.f32 %v3109_v13, %v3087_v8  ;;  %v3067_v29 = vadd.f32 %v3066_v63, %v3043_v46  ;;  %v3650_v46 = vld [vmem:[#allocation4 + $0x5b8] sm:$0xff]  ;;  %v3530_v13 = vld [vmem:[#allocation4 + $0x430] sm:$0xff] }
 0x5b0   : > { %v3609_v8 = vld [vmem:[#allocation4 + $0x530] sm:$0xff] }
 0x5b5   : > { %v7834_v31 = vpop.f32.mrf.mxu2 }
 0x5b6   : > { %v3090_v7 = vadd.f32 %v7834_v31, %v3067_v29  ;;  %v3778_v29 = vld [vmem:[#allocation4 + $0x778] sm:$0xff] }
 0x5b7   : > { %v7836_v2 = vpop.f32.mrf.mxu0 }
 0x5b8   : > { %v3113_v27 = vadd.f32 %v7836_v2, %v3090_v7  ;;  %v3696_v7 = vld [vmem:[#allocation4 + $0x668] sm:$0xff] }
 0x5d0   : > { %v3155_v1 = vpop.f32.mrf.mxu1 }
 0x5d6   : > { %v3132_v51 = vpop.f32.mrf.mxu3 }
 0x5d7   : > { %v3133_v30 = vadd.f32 %v3132_v51, %v3110_v47  ;;  %v3649_v51 = vld [vmem:[#allocation4 + $0x5b0] sm:$0xff]  ;;  %v3529_v47 = vld [vmem:[#allocation4 + $0x428] sm:$0xff] }
 0x5d8   : > { %v3158_v63 = vpop.f32.mrf.mxu1 }
 0x5d9   : > { %v3156_v14 = vadd.f32 %v3155_v1, %v3133_v30  ;;  %v3566_v30 = vld [vmem:[#allocation4 + $0x4a0] sm:$0xff]  ;;  %v3608_v1 = vld [vmem:[#allocation4 + $0x528] sm:$0xff] }
 0x5db   : > { %v3201_v44 = vpop.f32.mrf.mxu0 }
 0x5de   : > { %v3135_v50 = vpop.f32.mrf.mxu3 }
 0x5df   : > { %v3136_v6 = vadd.f32 %v3135_v50, %v3113_v27  ;;  %v3815_v50 = vld [vmem:[#allocation4 + $0x7e0] sm:$0xff]  ;;  %v3774_v27 = vld [vmem:[#allocation4 + $0x758] sm:$0xff] }
 0x5e1   : > { %v3178_v35 = vpop.f32.mrf.mxu2  ;;  %v3159_v2 = vadd.f32 %v3158_v63, %v3136_v6  ;;  %v3813_v6 = vld [vmem:[#allocation4 + $0x7d0] sm:$0xff]  ;;  %v3771_v63 = vld [vmem:[#allocation4 + $0x740] sm:$0xff] }
 0x5e2   : > { %v3179_v15 = vadd.f32 %v3178_v35, %v3156_v14  ;;  %v3648_v14 = vld [vmem:[#allocation4 + $0x5a8] sm:$0xff]  ;;  %v3528_v35 = vld [vmem:[#allocation4 + $0x420] sm:$0xff] }
 0x5e4   : > { %v3202_v16 = vadd.f32 %v3201_v44, %v3179_v15  ;;  %v3565_v44 = vld [vmem:[#allocation4 + $0x498] sm:$0xff] }
 0x5e6   : > { %3279 = vmatmul.f32.vlgmr.msrb.gmra.mxu1 %v3202_v16  ;;  %v3241_v18 = vrot.slane %v3202_v16, 1  ;;  %v3300_v11 = vrot.slane %v3202_v16, 2  ;;  %v3340_v41 = vrot.slane %v3202_v16, 3  ;;  %v3420_v38 = vrot.slane %v3202_v16, 5 }
 0x5e7   : > { %3581 = vmatpush.msrb.mxu1 %v3577_v28  ;;  %v3380_v20 = vrot.slane %v3202_v16, 4  ;;  %v3460_v33 = vrot.slane %v3202_v16, 6  ;;  %v3500_v0 = vrot.slane %v3202_v16, 7  ;;  %v3607_v16 = vld [vmem:[#allocation4 + $0x520] sm:$0xff] }
 0x5e8   : > { %3259 = vmatmul.f32.vlgmr.msra.gmra.mxu3 %v3241_v18  ;;  %3318 = vmatmul.f32.vlgmr.msrb.gmra.mxu2 %v3300_v11  ;;  %v3647_v28 = vld [vmem:[#allocation4 + $0x5a0] sm:$0xff]  ;;  %v3527_v18 = vld [vmem:[#allocation4 + $0x418] sm:$0xff]  ;;  %v3564_v11 = vld [vmem:[#allocation4 + $0x490] sm:$0xff] }
 0x5e9   : > { %3358 = vmatmul.f32.vlgmr.msra.gmra.mxu0 %v3340_v41  ;;  %3540 = vmatpush.msra.mxu3 %v3539_v34  ;;  %v3181_v31 = vpop.f32.mrf.mxu2  ;;  %v3606_v41 = vld [vmem:[#allocation4 + $0x518] sm:$0xff]  ;;  %v3204_v34 = vpop.f32.mrf.mxu0 }
 0x5ea   : > { %3582 = vmatpush.msrb.mxu1 %v3576_v40  ;;  %3621 = vmatpush.msrb.mxu2 %v3618_v49  ;;  %v3182_v15 = vadd.f32 %v3181_v31, %v3159_v2  ;;  %v3646_v40 = vld [vmem:[#allocation4 + $0x598] sm:$0xff]  ;;  %v3526_v49 = vld [vmem:[#allocation4 + $0x410] sm:$0xff]  ;;  %v3811_v31 = vld [vmem:[#allocation4 + $0x7c0] sm:$0xff] }
 0x5eb   : > { %3661 = vmatpush.msra.mxu0 %v3658_v48  ;;  %3541 = vmatpush.msra.mxu3 %v3538_v54  ;;  %v3563_v54 = vld [vmem:[#allocation4 + $0x488] sm:$0xff]  ;;  %v3770_v2 = vld [vmem:[#allocation4 + $0x738] sm:$0xff] }
 0x5ec   : > { %3583 = vmatpush.msrb.mxu1 %v3575_v24  ;;  %3622 = vmatpush.msrb.mxu2 %v3617_v60  ;;  %v7840_v48 = vadd.f32 %v3204_v34, %v3182_v15  ;;  %v3605_v24 = vld [vmem:[#allocation4 + $0x510] sm:$0xff]  ;;  %v3767_v34 = vld [vmem:[#allocation4 + $0x720] sm:$0xff] }
 0x5ed   : > { %3662 = vmatpush.msra.mxu0 %v3657_v5  ;;  %3542 = vmatpush.msra.mxu3 %v3537_v26  ;;  %v3645_v60 = vld [vmem:[#allocation4 + $0x590] sm:$0xff]  ;;  %v3525_v5 = vld [vmem:[#allocation4 + $0x408] sm:$0xff]  ;;  %v3562_v26 = vld [vmem:[#allocation4 + $0x480] sm:$0xff] }
 0x5ee   : > { %3584 = vmatpush.msrb.mxu1 %v3574_v17  ;;  %3623 = vmatpush.msrb.mxu2 %v3616_v53  ;;  %v3604_v17 = vld [vmem:[#allocation4 + $0x508] sm:$0xff]  ;;  %v3809_v15 = vld [vmem:[#allocation4 + $0x7b0] sm:$0xff] }
 0x5ef   : > { %3663 = vmatpush.msra.mxu0 %v3656_v57  ;;  %3438 = vmatmul.f32.vlgmr.msra.gmra.mxu1 %v3420_v38  ;;  %v3644_v53 = vld [vmem:[#allocation4 + $0x588] sm:$0xff]  ;;  %v3579_v57 = vrot.slane %v7840_v48, 1  ;;  %v3738_v38 = vld [vmem:[#allocation4 + $0x6f8] sm:$0xff] }
 0x5f0   : > { %3543 = vmatpush.msra.mxu3 %v3536_v32  ;;  %3585 = vmatpush.msrb.mxu1 %v3573_v45  ;;  %v3524_v32 = vld [vmem:[#allocation4 + $0x400] sm:$0xff] }
 0x5f1   : > { %3624 = vmatpush.msrb.mxu2 %v3615_v61  ;;  %3664 = vmatpush.msra.mxu0 %v3655_v55  ;;  %v3603_v45 = vld [vmem:[#allocation4 + $0x500] sm:$0xff]  ;;  %v3619_v55 = vrot.slane %v7840_v48, 2 }
 0x5f2   : > { %3398 = vmatmul.f32.vlgmr.msrb.gmra.mxu3 %v3380_v20  ;;  %3478 = vmatmul.f32.vlgmr.msra.gmra.mxu2 %v3460_v33  ;;  %v3643_v61 = vld [vmem:[#allocation4 + $0x580] sm:$0xff]  ;;  %v3698_v20 = vld [vmem:[#allocation4 + $0x678] sm:$0xff]  ;;  %v3659_v33 = vrot.slane %v7840_v48, 3 }
 0x5f3   : > { %3518 = vmatmul.f32.vlgmr.msrb.gmra.mxu0 %v3500_v0  ;;  %3544 = vmatpush.msra.mxu3 %v3535_v3  ;;  %v3737_v3 = vld [vmem:[#allocation4 + $0x6f0] sm:$0xff]  ;;  %v3818_v0 = vld [vmem:[#allocation4 + $0x7f8] sm:$0xff] }
 0x5f4   : > { %3586 = vmatpush.msrb.mxu1 %v3572_v42  ;;  %3625 = vmatpush.msrb.mxu2 %v3614_v59  ;;  %v3697_v42 = vld [vmem:[#allocation4 + $0x670] sm:$0xff]  ;;  %v3736_v59 = vld [vmem:[#allocation4 + $0x6e8] sm:$0xff] }
 0x5f5   : > { %3665 = vmatpush.msra.mxu0 %v3654_v39  ;;  %3545 = vmatpush.msra.mxu3 %v3534_v10  ;;  %v3777_v39 = vld [vmem:[#allocation4 + $0x770] sm:$0xff] }
 0x5f6   : > { %3587 = vmatpush.msrb.mxu1 %v3571_v12  ;;  %3626 = vmatpush.msrb.mxu2 %v3613_v37  ;;  %v3817_v10 = vld [vmem:[#allocation4 + $0x7f0] sm:$0xff]  ;;  %v3735_v12 = vld [vmem:[#allocation4 + $0x6e0] sm:$0xff]  ;;  %v3776_v37 = vld [vmem:[#allocation4 + $0x768] sm:$0xff] }
 0x5f7   : > { %3666 = vmatpush.msra.mxu0 %v3653_v21  ;;  %3546 = vmatpush.msra.mxu3 %v3533_v22  ;;  %v3816_v21 = vld [vmem:[#allocation4 + $0x7e8] sm:$0xff]  ;;  %v3695_v22 = vld [vmem:[#allocation4 + $0x660] sm:$0xff] }
 0x5f8   : > { %3588 = vmatpush.msrb.mxu1 %v3570_v25  ;;  %3627 = vmatpush.msrb.mxu2 %v3612_v43  ;;  %v3734_v25 = vld [vmem:[#allocation4 + $0x6d8] sm:$0xff]  ;;  %v3775_v43 = vld [vmem:[#allocation4 + $0x760] sm:$0xff] }
 0x5f9   : > { %3667 = vmatpush.msra.mxu0 %v3652_v56  ;;  %3547 = vmatpush.msra.mxu3 %v3532_v62  ;;  %v3694_v56 = vld [vmem:[#allocation4 + $0x658] sm:$0xff]  ;;  %v3733_v62 = vld [vmem:[#allocation4 + $0x6d0] sm:$0xff] }
 0x5fa   : > { %3589 = vmatpush.msrb.mxu1 %v3569_v23  ;;  %3628 = vmatpush.msrb.mxu2 %v3611_v4  ;;  %v3814_v23 = vld [vmem:[#allocation4 + $0x7d8] sm:$0xff]  ;;  %v3693_v4 = vld [vmem:[#allocation4 + $0x650] sm:$0xff] }
 0x5fb   : > { %3668 = vmatpush.msra.mxu0 %v3651_v52  ;;  %3548 = vmatpush.msra.mxu3 %v3531_v36  ;;  %v3732_v52 = vld [vmem:[#allocation4 + $0x6c8] sm:$0xff]  ;;  %v3773_v36 = vld [vmem:[#allocation4 + $0x750] sm:$0xff] }
 0x5fc   : > { %3590 = vmatpush.msrb.mxu1 %v3568_v9  ;;  %3629 = vmatpush.msrb.mxu2 %v3610_v58  ;;  %v3692_v9 = vld [vmem:[#allocation4 + $0x648] sm:$0xff]  ;;  %v3731_v58 = vld [vmem:[#allocation4 + $0x6c0] sm:$0xff] }
 0x5fd   : > { %3669 = vmatpush.msra.mxu0 %v3650_v46  ;;  %3549 = vmatpush.msra.mxu3 %v3530_v13  ;;  %v3772_v46 = vld [vmem:[#allocation4 + $0x748] sm:$0xff] }
 0x5fe   : > { %3591 = vmatpush.msrb.mxu1 %v3567_v19  ;;  %3630 = vmatpush.msrb.mxu2 %v3609_v8  ;;  %v3812_v13 = vld [vmem:[#allocation4 + $0x7c8] sm:$0xff]  ;;  %v3691_v19 = vld [vmem:[#allocation4 + $0x640] sm:$0xff]  ;;  %v3730_v8 = vld [vmem:[#allocation4 + $0x6b8] sm:$0xff] }
 0x5ff   : > { %3670 = vmatpush.msra.mxu0 %v3649_v51  ;;  %3550 = vmatpush.msra.mxu3 %v3529_v47  ;;  %v3690_v51 = vld [vmem:[#allocation4 + $0x638] sm:$0xff]  ;;  %v3729_v47 = vld [vmem:[#allocation4 + $0x6b0] sm:$0xff] }
 0x600   : > { %3592 = vmatpush.msrb.mxu1 %v3566_v30  ;;  %3631 = vmatpush.msrb.mxu2 %v3608_v1  ;;  %v3810_v30 = vld [vmem:[#allocation4 + $0x7b8] sm:$0xff]  ;;  %v3689_v1 = vld [vmem:[#allocation4 + $0x630] sm:$0xff] }
 0x601   : > { %3671 = vmatpush.msra.mxu0 %v3648_v14  ;;  %3551 = vmatpush.msra.mxu3 %v3528_v35  ;;  %v3728_v14 = vld [vmem:[#allocation4 + $0x6a8] sm:$0xff]  ;;  %v3769_v35 = vld [vmem:[#allocation4 + $0x730] sm:$0xff] }
 0x602   : > { %3593 = vmatpush.msrb.mxu1 %v3565_v44  ;;  %3632 = vmatpush.msrb.mxu2 %v3607_v16  ;;  %v3688_v44 = vld [vmem:[#allocation4 + $0x628] sm:$0xff]  ;;  %v3727_v16 = vld [vmem:[#allocation4 + $0x6a0] sm:$0xff] }
 0x603   : > { %3672 = vmatpush.msra.mxu0 %v3647_v28  ;;  %3552 = vmatpush.msra.mxu3 %v3527_v18  ;;  %v3768_v28 = vld [vmem:[#allocation4 + $0x728] sm:$0xff] }
 0x604   : > { %3594 = vmatpush.msrb.mxu1 %v3564_v11  ;;  %3633 = vmatpush.msrb.mxu2 %v3606_v41  ;;  %v3808_v18 = vld [vmem:[#allocation4 + $0x7a8] sm:$0xff]  ;;  %v3687_v11 = vld [vmem:[#allocation4 + $0x620] sm:$0xff]  ;;  %v3726_v41 = vld [vmem:[#allocation4 + $0x698] sm:$0xff] }
 0x605   : > { %3673 = vmatpush.msra.mxu0 %v3646_v40  ;;  %3553 = vmatpush.msra.mxu3 %v3526_v49  ;;  %v3807_v40 = vld [vmem:[#allocation4 + $0x7a0] sm:$0xff]  ;;  %v3686_v49 = vld [vmem:[#allocation4 + $0x618] sm:$0xff] }
 0x606   : > { %3595 = vmatpush.msrb.mxu1 %v3563_v54  ;;  %3634 = vmatpush.msrb.mxu2 %v3605_v24  ;;  %v3725_v54 = vld [vmem:[#allocation4 + $0x690] sm:$0xff]  ;;  %v3766_v24 = vld [vmem:[#allocation4 + $0x718] sm:$0xff] }
 0x607   : > { %3674 = vmatpush.msra.mxu0 %v3645_v60  ;;  %3554 = vmatpush.msra.mxu3 %v3525_v5  ;;  %v3806_v60 = vld [vmem:[#allocation4 + $0x798] sm:$0xff]  ;;  %v3685_v5 = vld [vmem:[#allocation4 + $0x610] sm:$0xff] }
 0x608   : > { %3596 = vmatpush.msrb.mxu1 %v3562_v26  ;;  %3635 = vmatpush.msrb.mxu2 %v3604_v17  ;;  %v3724_v26 = vld [vmem:[#allocation4 + $0x688] sm:$0xff]  ;;  %v3765_v17 = vld [vmem:[#allocation4 + $0x710] sm:$0xff] }
 0x609   : > { %3675 = vmatpush.msra.mxu0 %v3644_v53  ;;  %3597 = vmatmul.f32.vlgmr.msrb.gmra.mxu1 %v3579_v57  ;;  %v3805_v53 = vld [vmem:[#allocation4 + $0x790] sm:$0xff]  ;;  %v3684_v57 = vld [vmem:[#allocation4 + $0x608] sm:$0xff] }
 0x60a   : > { %3741 = vmatpush.msra.mxu1 %v3738_v38  ;;  %3555 = vmatpush.msra.mxu3 %v3524_v32  ;;  %v3723_v38 = vld [vmem:[#allocation4 + $0x680] sm:$0xff]  ;;  %v3764_v32 = vld [vmem:[#allocation4 + $0x708] sm:$0xff] }
 0x60b   : > { %3636 = vmatpush.msrb.mxu2 %v3603_v45  ;;  %3676 = vmatpush.msra.mxu0 %v3643_v61  ;;  %v3804_v45 = vld [vmem:[#allocation4 + $0x788] sm:$0xff]  ;;  %v3739_v61 = vrot.slane %v7840_v48, 5 }
 0x60c   : > { %3556 = vmatmul.f32.vlgmr.msra.gmra.mxu3 %v7840_v48  ;;  %3637 = vmatmul.f32.vlgmr.msrb.gmra.mxu2 %v3619_v55  ;;  %v3683_v55 = vld [vmem:[#allocation4 + $0x600] sm:$0xff] }
 0x60d   : > { %3677 = vmatmul.f32.vlgmr.msra.gmra.mxu0 %v3659_v33  ;;  %3701 = vmatpush.msrb.mxu3 %v3698_v20  ;;  %v3763_v20 = vld [vmem:[#allocation4 + $0x700] sm:$0xff] }
 0x60e   : > { %3742 = vmatpush.msra.mxu1 %v3737_v3  ;;  %3781 = vmatpush.msra.mxu2 %v3778_v29  ;;  %v3803_v33 = vld [vmem:[#allocation4 + $0x780] sm:$0xff]  ;;  %v3699_v3 = vrot.slane %v7840_v48, 4  ;;  %v3779_v29 = vrot.slane %v7840_v48, 6 }
 0x60f   : > { %3821 = vmatpush.msrb.mxu0 %v3818_v0  ;;  %3702 = vmatpush.msrb.mxu3 %v3697_v42  ;;  %v3819_v0 = vrot.slane %v7840_v48, 7  ;;  %v3860_v42 = vld [vmem:[%s7995_s8 + $0x78] sm:$0xff]  ;;  %v3857_v48 = vld [vmem:[%s7995_s8 + $0x60] sm:$0xff] }
 0x610   : > { %3743 = vmatpush.msra.mxu1 %v3736_v59  ;;  %3782 = vmatpush.msra.mxu2 %v3777_v39  ;;  %v3859_v59 = vld [vmem:[%s7995_s8 + $0x70] sm:$0xff]  ;;  %v3858_v39 = vld [vmem:[%s7995_s8 + $0x68] sm:$0xff] }
 0x611   : > { %3822 = vmatpush.msrb.mxu0 %v3817_v10  ;;  %3703 = vmatpush.msrb.mxu3 %v3696_v7  ;;  %v3856_v10 = vld [vmem:[%s7995_s8 + $0x58] sm:$0xff] }
 0x612   : > { %3744 = vmatpush.msra.mxu1 %v3735_v12  ;;  %3783 = vmatpush.msra.mxu2 %v3776_v37  ;;  %v3855_v12 = vld [vmem:[%s7995_s8 + $0x50] sm:$0xff] }
 0x613   : > { %3823 = vmatpush.msrb.mxu0 %v3816_v21  ;;  %3704 = vmatpush.msrb.mxu3 %v3695_v22  ;;  %v3854_v21 = vld [vmem:[%s7995_s8 + $0x48] sm:$0xff] }
 0x614   : > { %3745 = vmatpush.msra.mxu1 %v3734_v25  ;;  %3784 = vmatpush.msra.mxu2 %v3775_v43  ;;  %v3853_v25 = vld [vmem:[%s7995_s8 + $0x40] sm:$0xff]  ;;  %v3852_v43 = vld [vmem:[%s7995_s8 + $0x38] sm:$0xff] }
 0x615   : > { %3824 = vmatpush.msrb.mxu0 %v3815_v50  ;;  %3705 = vmatpush.msrb.mxu3 %v3694_v56 }
 0x616   : > { %3746 = vmatpush.msra.mxu1 %v3733_v62  ;;  %3785 = vmatpush.msra.mxu2 %v3774_v27  ;;  %v3851_v62 = vld [vmem:[%s7995_s8 + $0x30] sm:$0xff] }
 0x617   : > { %3825 = vmatpush.msrb.mxu0 %v3814_v23  ;;  %3706 = vmatpush.msrb.mxu3 %v3693_v4  ;;  %v3850_v4 = vld [vmem:[%s7995_s8 + $0x28] sm:$0xff] }
 0x618   : > { %3747 = vmatpush.msra.mxu1 %v3732_v52  ;;  %3786 = vmatpush.msra.mxu2 %v3773_v36  ;;  %v3849_v36 = vld [vmem:[%s7995_s8 + $0x20] sm:$0xff] }
 0x619   : > { %3826 = vmatpush.msrb.mxu0 %v3813_v6  ;;  %3707 = vmatpush.msrb.mxu3 %v3692_v9  ;;  %v3848_v9 = vld [vmem:[%s7995_s8 + $0x18] sm:$0xff] }
 0x61a   : > { %3748 = vmatpush.msra.mxu1 %v3731_v58  ;;  %3787 = vmatpush.msra.mxu2 %v3772_v46  ;;  %v3847_v46 = vld [vmem:[%s7995_s8 + $0x10] sm:$0xff] }
 0x61b   : > { %3827 = vmatpush.msrb.mxu0 %v3812_v13  ;;  %3708 = vmatpush.msrb.mxu3 %v3691_v19  ;;  %v3846_v19 = vld [vmem:[%s7995_s8 + $0x8] sm:$0xff] }
 0x61c   : > { %3749 = vmatpush.msra.mxu1 %v3730_v8  ;;  %3788 = vmatpush.msra.mxu2 %v3771_v63  ;;  %v3845_v8 = vld [vmem:[%s7995_s8] sm:$0xff] }
 0x61d   : > { %3828 = vmatpush.msrb.mxu0 %v3811_v31  ;;  %3709 = vmatpush.msrb.mxu3 %v3690_v51  ;;  %v3898_v51 = vld [vmem:[%s7997_s10 + $0x78] sm:$0xff] }
 0x61e   : > { %3750 = vmatpush.msra.mxu1 %v3729_v47  ;;  %3789 = vmatpush.msra.mxu2 %v3770_v2  ;;  %v3897_v47 = vld [vmem:[%s7997_s10 + $0x70] sm:$0xff]  ;;  %v3896_v2 = vld [vmem:[%s7997_s10 + $0x68] sm:$0xff] }
 0x61f   : > { %3829 = vmatpush.msrb.mxu0 %v3810_v30  ;;  %3710 = vmatpush.msrb.mxu3 %v3689_v1 }
 0x620   : > { %3751 = vmatpush.msra.mxu1 %v3728_v14  ;;  %3790 = vmatpush.msra.mxu2 %v3769_v35  ;;  %v3895_v35 = vld [vmem:[%s7997_s10 + $0x60] sm:$0xff] }
 0x621   : > { %3830 = vmatpush.msrb.mxu0 %v3809_v15  ;;  %3711 = vmatpush.msrb.mxu3 %v3688_v44  ;;  %v3894_v44 = vld [vmem:[%s7997_s10 + $0x58] sm:$0xff] }
 0x622   : > { %3752 = vmatpush.msra.mxu1 %v3727_v16  ;;  %3791 = vmatpush.msra.mxu2 %v3768_v28  ;;  %v3893_v16 = vld [vmem:[%s7997_s10 + $0x50] sm:$0xff] }
 0x623   : > { %3831 = vmatpush.msrb.mxu0 %v3808_v18  ;;  %3712 = vmatpush.msrb.mxu3 %v3687_v11  ;;  %v3892_v11 = vld [vmem:[%s7997_s10 + $0x48] sm:$0xff] }
 0x624   : > { %3753 = vmatpush.msra.mxu1 %v3726_v41  ;;  %3792 = vmatpush.msra.mxu2 %v3767_v34  ;;  %v3891_v41 = vld [vmem:[%s7997_s10 + $0x40] sm:$0xff] }
 0x625   : > { %3832 = vmatpush.msrb.mxu0 %v3807_v40  ;;  %3713 = vmatpush.msrb.mxu3 %v3686_v49  ;;  %v3890_v49 = vld [vmem:[%s7997_s10 + $0x38] sm:$0xff] }
 0x626   : > { %3754 = vmatpush.msra.mxu1 %v3725_v54  ;;  %3793 = vmatpush.msra.mxu2 %v3766_v24  ;;  %v3889_v54 = vld [vmem:[%s7997_s10 + $0x30] sm:$0xff] }
 0x627   : > { %3833 = vmatpush.msrb.mxu0 %v3806_v60  ;;  %3714 = vmatpush.msrb.mxu3 %v3685_v5  ;;  %v3888_v5 = vld [vmem:[%s7997_s10 + $0x28] sm:$0xff] }
 0x628   : > { %3755 = vmatpush.msra.mxu1 %v3724_v26  ;;  %3794 = vmatpush.msra.mxu2 %v3765_v17 }
 0x629   : > { %3834 = vmatpush.msrb.mxu0 %v3805_v53  ;;  %3715 = vmatpush.msrb.mxu3 %v3684_v57  ;;  %v3887_v53 = vld [vmem:[%s7997_s10 + $0x20] sm:$0xff] }
 0x62a   : > { %3756 = vmatpush.msra.mxu1 %v3723_v38  ;;  %3795 = vmatpush.msra.mxu2 %v3764_v32  ;;  %v3886_v32 = vld [vmem:[%s7997_s10 + $0x18] sm:$0xff] }
 0x62b   : > { %3835 = vmatpush.msrb.mxu0 %v3804_v45  ;;  %3757 = vmatmul.f32.vlgmr.msra.gmra.mxu1 %v3739_v61 }
 0x62c   : > { %3716 = vmatpush.msrb.mxu3 %v3683_v55  ;;  %3796 = vmatpush.msra.mxu2 %v3763_v20  ;;  %v3842_v20 = vld [vmem:[%s7994_s7] sm:$0x1] }
 0x62d   : > { %3836 = vmatpush.msrb.mxu0 %v3803_v33  ;;  %3717 = vmatmul.f32.vlgmr.msrb.gmra.mxu3 %v3699_v3 }
 0x62e   : > { %3797 = vmatmul.f32.vlgmr.msra.gmra.mxu2 %v3779_v29  ;;  %3837 = vmatmul.f32.vlgmr.msrb.gmra.mxu0 %v3819_v0  ;;  %v3885_v0 = vld [vmem:[%s7997_s10 + $0x10] sm:$0xff] }
 0x62f   : > { %3862 = vmatpush.msra.mxu3 %v3860_v42  ;;  %3900 = vmatpush.msrb.mxu1 %v3898_v51  ;;  %v3884_v42 = vld [vmem:[%s7997_s10 + $0x8] sm:$0xff] }
 0x631   : > { %3863 = vmatpush.msra.mxu3 %v3859_v59  ;;  %3901 = vmatpush.msrb.mxu1 %v3897_v47  ;;  %v3883_v59 = vld [vmem:[%s7997_s10] sm:$0xff] }
 0x633   : > { %3864 = vmatpush.msra.mxu3 %v3858_v39  ;;  %3902 = vmatpush.msrb.mxu1 %v3896_v2  ;;  %v3861_v39 = vld [vmem:[%s7996_s9] sm:$0x1] }
 0x635   : > { %3865 = vmatpush.msra.mxu3 %v3857_v48  ;;  %3903 = vmatpush.msrb.mxu1 %v3895_v35 }
 0x637   : > { %3866 = vmatpush.msra.mxu3 %v3856_v10  ;;  %3904 = vmatpush.msrb.mxu1 %v3894_v44 }
 0x639   : > { %3867 = vmatpush.msra.mxu3 %v3855_v12  ;;  %3905 = vmatpush.msrb.mxu1 %v3893_v16  ;;  %v3899_v12 = vld [vmem:[%s7998_s11] sm:$0x1] }
 0x63b   : > { %3868 = vmatpush.msra.mxu3 %v3854_v21  ;;  %3906 = vmatpush.msrb.mxu1 %v3892_v11 }
 0x63d   : > { %3869 = vmatpush.msra.mxu3 %v3853_v25  ;;  %3907 = vmatpush.msrb.mxu1 %v3891_v41 }
 0x63f   : > { %3870 = vmatpush.msra.mxu3 %v3852_v43  ;;  %3908 = vmatpush.msrb.mxu1 %v3890_v49 }
 0x641   : > { %3871 = vmatpush.msra.mxu3 %v3851_v62  ;;  %3909 = vmatpush.msrb.mxu1 %v3889_v54 }
 0x643   : > { %3872 = vmatpush.msra.mxu3 %v3850_v4  ;;  %3910 = vmatpush.msrb.mxu1 %v3888_v5 }
 0x645   : > { %3873 = vmatpush.msra.mxu3 %v3849_v36  ;;  %3911 = vmatpush.msrb.mxu1 %v3887_v53 }
 0x647   : > { %3874 = vmatpush.msra.mxu3 %v3848_v9  ;;  %3912 = vmatpush.msrb.mxu1 %v3886_v32 }
 0x649   : > { %3875 = vmatpush.msra.mxu3 %v3847_v46  ;;  %3913 = vmatpush.msrb.mxu1 %v3885_v0 }
 0x64b   : > { %3876 = vmatpush.msra.mxu3 %v3846_v19  ;;  %3914 = vmatpush.msrb.mxu1 %v3884_v42 }
 0x64d   : > { %3877 = vmatpush.msra.mxu3 %v3845_v8  ;;  %3915 = vmatpush.msrb.mxu1 %v3883_v59 }
 0x663   : > { %v3280_v37 = vpop.f32.mrf.mxu1 }
 0x666   : > { %v3359_v27 = vpop.f32.mrf.mxu0 }
 0x66b   : > { %v3260_v7 = vpop.f32.mrf.mxu3  ;;  %v3319_v50 = vpop.f32.mrf.mxu2 }
 0x66c   : > { %v3281_v22 = vadd.f32 %v3280_v37, %v3260_v7  ;;  %v3439_v58 = vpop.f32.mrf.mxu1 }
 0x66e   : > { %v3322_v56 = vadd.f32 %v3319_v50, %v3281_v22 }
 0x670   : > { %v3362_v52 = vadd.f32 %v3359_v27, %v3322_v56  ;;  %v3519_v30 = vpop.f32.mrf.mxu0 }
 0x675   : > { %v3399_v23 = vpop.f32.mrf.mxu3  ;;  %v3479_v63 = vpop.f32.mrf.mxu2 }
 0x676   : > { %v3402_v6 = vadd.f32 %v3399_v23, %v3362_v52 }
 0x678   : > { %v3442_v13 = vadd.f32 %v3439_v58, %v3402_v6 }
 0x67a   : > { %v3482_v31 = vadd.f32 %v3479_v63, %v3442_v13 }
 0x67c   : > { %v3522_v14 = vadd.f32 %v3519_v30, %v3482_v31 }
 0x686   : > { %v3598_v28 = vpop.f32.mrf.mxu1 }
 0x68a   : > { %v3678_v24 = vpop.f32.mrf.mxu0 }
 0x68f   : > { %v3557_v1 = vpop.f32.mrf.mxu3  ;;  %v3638_v34 = vpop.f32.mrf.mxu2 }
 0x690   : > { %v3560_v15 = vadd.f32 %v3557_v1, %v3522_v14 }
 0x692   : > { %v3601_v18 = vadd.f32 %v3598_v28, %v3560_v15 }
 0x694   : > { %v3641_v40 = vadd.f32 %v3638_v34, %v3601_v18 }
 0x696   : > { %v3681_v60 = vadd.f32 %v3678_v24, %v3641_v40 }
 0x6a8   : > { %v3758_v57 = vpop.f32.mrf.mxu1 }
 0x6ab   : > { %v3838_v55 = vpop.f32.mrf.mxu0 }
 0x6b0   : > { %v3718_v26 = vpop.f32.mrf.mxu3 }
 0x6b1   : > { %v3721_v17 = vadd.f32 %v3718_v26, %v3681_v60  ;;  %v3798_v45 = vpop.f32.mrf.mxu2 }
 0x6b3   : > { %v3761_v38 = vadd.f32 %v3758_v57, %v3721_v17 }
 0x6b5   : > { %v3801_v61 = vadd.f32 %v3798_v45, %v3761_v38 }
 0x6b7   : > { %v3841_v33 = vadd.f32 %v3838_v55, %v3801_v61 }
 0x6b9   : > { %v3843_v3 = vadd.f32 %v3842_v20, %v3841_v33 }
 0x6bb   : > { %v3844_v29 = vmax.f32 %v3843_v3, 0.0 }
 0x6bd   : > { %3878 = vmatmul.f32.vlgmr.msra.gmra.mxu3 %v3844_v29 }
 0x740   : > { %v3879_v48 = vpop.f32.mrf.mxu3 }
 0x741   : > { %v3880_v10 = vadd.f32 %v3879_v48, %v3861_v39 }
 0x743   : > { %v3882_v7 = vmax.f32 %v3880_v10, 0.0 }
 0x745   : > { %3916 = vmatmul.f32.vlgmr.msrb.gmra.mxu1 %v3882_v7 }
 0x7c2   : > { %v3917_v37 = vpop.f32.mrf.mxu1 }
 0x7c3   : > { %v3918_v21 = vadd.f32 %v3917_v37, %v3899_v12 }
 0x7c5   : > { %v3920_v22 = vmax.f32 %v3918_v21, 0.0 }
 0x7c7   : > { %3921 = vst [vmem:[%s422_s15] sm:$0x1] %v3920_v22 }
 0x7c8   : > { %4671 = shalt.err (!%p4668_p8)
}
 0x7c9   : > { %4041 = dma.vmem_to_hbm [thread:$0]  (%p4842_p5), %s3934_s26, 16, %s3936_s23, %s3923_s16  }
 0x7ca PF: > { %s8454_s6 = sld [smem:[#allocation10_spill]]  ;;  %p4053_p9 = scmp.ge.s32.totalorder %s4710_s24, 2 }
 0x7cc   : > { %p4048_p10 = pnand %p4053_p9, %p4846_p6 }
 0x7ce   : > { %p4049_p11 = pneg %p4048_p10 }
 0x7d0   : > { %s3947_s27 = sand.u32 1, %s8454_s6  }
 0x7d1   : > { %s3948_s18 = scalar_lea.sflag [#allocation6], %s3947_s27 }
 0x7d2   : > { %4693 = dma.done.wait (%p4049_p11), %s3948_s18, 16  }
 0x7d3   : > { %4695 = vsyncadd (%p4049_p11), %s3948_s18, 4294967280  ;;  %s8456_s24 = sld [smem:[#allocation12_spill]]  ;;  %s8459_s21 = smov %s4702_s22 }
 0x7d4   : > { %s8457_s29 = sld [smem:[#allocation11_spill]] }
 0x7d5   : > { %s8458_s23 = sld [smem:[#allocation13_spill]] }
 0x7d9   : > { %p23_p12 = scmp.ge.s32.totalorder %s8456_s24, 4  }
 0x7da   : > { %s8460_s22 = smov %s8457_s29 }
 0x7db   :  { %25 = sbr.rel (!%p23_p12) target bundleno = 7 (0x7), region = 123 }
 0x7e0   :  { %3953 = vsyncpa [#allocation5], 1 }
 0x7e1   :  { %3955 = vsyncpa [#allocation5 + $0x1], 1 }
 0x7e2   :  { %3956 = vsyncpa [#allocation6], 1 }
 0x7e3   :  { %3958 = vsyncpa [#allocation6 + $0x1], 1 }

</bundles_post_ra>
